<compile_context>
chip_gen: v7x
topology: tpu7x:2x2x1
jax: 0.10.0
libtpu: 0.0.40
codegen_flags: <defaults>
</compile_context>

<pallas_src>
import functools

import jax
import jax.numpy as jnp
from jax.experimental import pallas as pl
from jax.experimental.pallas import tpu as pltpu


def _score_dtype_for_device():
    """bf16 score matrices on v6e/v7x (bf16 VALU/EUP); f32 elsewhere (v5e/v4)."""
    try:
        kind = jax.devices()[0].device_kind.lower()
    except Exception:
        return jnp.float32
    return jnp.bfloat16 if ("v6" in kind or "v7" in kind) else jnp.float32


def _gat_conv_kernel(x_ref, w_ref, b_ref, adj_ref, o_ref, *,
                     num_heads, out_feats, negative_slope, apply_elu,
                     score_dtype):
    """All heads of one GATConv layer on one diagonal node tile.

    x_ref  : (T, Fin)        node features of this tile (src set == dst set)
    w_ref  : (Fin, HF + 2H)  [W | W @ attn_l | W @ attn_r]  (head- and score-fused)
    b_ref  : (1, HF)         head-fused bias
    adj_ref: (1, T, T)       int8 0/1 mask block, adj[dst, src] != 0 iff edge src -> dst
    o_ref  : (T, HF)         fused output (per-head outputs flattened == .flatten(1))
    """
    HF = num_heads * out_feats
    x = x_ref[...]
    # Single fused MXU pass: projected features + both per-head attention scores.
    z_big = jnp.dot(x, w_ref[...], preferred_element_type=jnp.float32)   # (T, HF+2H)
    z_bf = z_big[:, :HF].astype(jnp.bfloat16)        # only a bf16 copy stays live
    el_t = z_big[:, HF:HF + num_heads].T.astype(score_dtype)             # (H, T) src
    er = z_big[:, HF + num_heads:HF + 2 * num_heads].astype(score_dtype)  # (T, H) dst

    adj_f = adj_ref[0].astype(score_dtype)           # (T, T) 0/1 edge mask

    for hd in range(num_heads):
        # e[dst, src] = leaky_relu(er[dst] + el[src]).
        e = er[:, hd:hd + 1] + el_t[hd:hd + 1, :]                         # (T, T)
        e = jnp.maximum(e, negative_slope * e)       # LeakyReLU (0 < slope < 1)
        # Softmax over sources.  The row max over the (superset) tile is a valid
        # shift (e - m <= 0, exp <= 1); the single post-exp multiply by the 0/1
        # mask zeroes non-edges and keeps zero-in-degree / padded rows at p == 0.
        m = jnp.max(e, axis=1, keepdims=True)
        p = jnp.exp(e - m) * adj_f                                        # (T, T)
        denom = jnp.sum(p, axis=1, keepdims=True, dtype=jnp.float32)      # (T, 1)
        inv = pl.reciprocal(jnp.where(denom > 0.0, denom, 1.0), approx=True)
        zh = z_bf[:, hd * out_feats:(hd + 1) * out_feats]                 # (T, Fout)
        acc = jnp.dot(p.astype(jnp.bfloat16), zh,
                      preferred_element_type=jnp.float32)                 # (T, Fout)
        out_h = acc * inv + b_ref[:, hd * out_feats:(hd + 1) * out_feats]
        if apply_elu:
            # ELU(alpha=1); clamp the exp argument so the untaken branch can't overflow.
            out_h = jnp.where(out_h > 0.0, out_h,
                              jnp.exp(jnp.minimum(out_h, 0.0)) - 1.0)
        # Direct slice store: no per-head temporaries list, no lane-axis concat.
        o_ref[:, hd * out_feats:(hd + 1) * out_feats] = out_h.astype(o_ref.dtype)


def gat_conv(h, params, adj_blocks, *, negative_slope, apply_elu,
             out_dtype=jnp.float32, score_dtype=jnp.float32, node_tile=128):
    """One GATConv layer (all heads fused) over pre-packed diagonal adjacency blocks.

    h          : (Np, Fin)             padded node features (Np = n_tiles * T)
    adj_blocks : (n_tiles, T, T) int8  diagonal adjacency blocks, [t, dst, src]
    Returns (Np, H*Fout) in out_dtype (== per-head outputs already flattened).
    """
    W, attn_l, attn_r, bias = params   # (H,Fin,Fout), (H,1,Fout), (H,1,Fout), (H,1,Fout)
    Np, Fin = h.shape
    H, _, Fout = W.shape
    HF = H * Fout
    HF2 = HF + 2 * H
    T = node_tile
    n_tiles = Np // T
    assert Np % T == 0 and adj_blocks.shape == (n_tiles, T, T)

    # Head-fused + score-fused parameter layout (cheap, done once per call in XLA).
    w_all = jnp.transpose(W, (1, 0, 2)).reshape(Fin, HF)   # column block hd = W[hd]
    al = attn_l.reshape(H, Fout)
    ar = attn_r.reshape(H, Fout)
    w_l = jnp.einsum('hif,hf->ih', W, al)                  # (Fin, H): col h = W[h] @ a_l[h]
    w_r = jnp.einsum('hif,hf->ih', W, ar)                  # (Fin, H): col h = W[h] @ a_r[h]
    w_big = jnp.concatenate([w_all, w_l, w_r], axis=1).astype(h.dtype)  # (Fin, HF+2H)
    b_all = bias.reshape(1, HF).astype(jnp.float32)

    kernel = functools.partial(
        _gat_conv_kernel, num_heads=H, out_feats=Fout,
        negative_slope=negative_slope, apply_elu=apply_elu,
        score_dtype=score_dtype)

    out_shape = jax.ShapeDtypeStruct((Np, HF), out_dtype)
    cost = pl.CostEstimate(
        flops=(2 * Np * Fin * HF2          # fused projection + score dots
               + 2 * Np * T * HF           # aggregation matmuls
               + 8 * Np * T * H),          # softmax / leaky-relu elementwise
        transcendentals=Np * T * H + (Np * HF if apply_elu else 0),
        bytes_accessed=(Np * Fin * h.dtype.itemsize
                        + n_tiles * T * T                          # int8 adj blocks
                        + Np * HF * jnp.dtype(out_dtype).itemsize
                        + Fin * HF2 * w_big.dtype.itemsize + 4 * HF),
    )

    # VMEM budget sized from the actual tile footprint (matters on v7x: 64 MiB VMEM).
    tile_bytes = (2 * (T * Fin * h.dtype.itemsize                   # x (double-buffered)
                       + T * T                                      # adj block (int8)
                       + T * HF * jnp.dtype(out_dtype).itemsize)    # out
                  + Fin * HF2 * w_big.dtype.itemsize + 4 * HF       # constant operands
                  + 8 * T * T * 4 + 6 * T * HF2 * 4)                # live intermediates
    vmem_limit = int(min(64 << 20, max(8 << 20, 2 * tile_bytes)))

    def build(single_buffer_consts):
        const_kw = ({'pipeline_mode': pl.Buffered(1)}
                    if single_buffer_consts else {})
        in_specs = [
            pl.BlockSpec((T, Fin), lambda t: (t, 0)),                  # node tile
            pl.BlockSpec((Fin, HF2), lambda t: (0, 0), **const_kw),    # fused weights (const)
            pl.BlockSpec((1, HF), lambda t: (0, 0), **const_kw),       # fused bias    (const)
            pl.BlockSpec((1, T, T), lambda t: (t, 0, 0)),              # packed diag adj block
        ]
        return pl.pallas_call(
            kernel,
            out_shape=out_shape,
            grid=(n_tiles,),
            in_specs=in_specs,
            out_specs=pl.BlockSpec((T, HF), lambda t: (t, 0)),
            compiler_params=pltpu.CompilerParams(
                dimension_semantics=("parallel",),
                vmem_limit_bytes=vmem_limit),
            cost_estimate=cost,
        )

    try:
        return build(True)(h, w_big, b_all, adj_blocks)
    except Exception:
        # pipeline_mode=pl.Buffered(1) unsupported on this jax version -> double-buffer.
        return build(False)(h, w_big, b_all, adj_blocks)


def gat_forward(inputs, adj, layer_params, *, num_layers, negative_slope,
                node_tile=128):
    """GAT.forward: hidden GATConv layers (+ELU, flatten heads); final layer mean over heads."""
    N = inputs.shape[0]
    T = node_tile
    n_tiles = int(pl.cdiv(N, T))
    Np = n_tiles * T
    score_dtype = _score_dtype_for_device()

    # Pad once to a lane-aligned node count.  Padded nodes are isolated
    # (all-zero adjacency), never influence real nodes, and are dropped at the end.
    h = jnp.pad(inputs, ((0, Np - N), (0, 0)))
    adj_p = jnp.pad(adj, ((0, Np - N), (0, Np - N)))

    # Pack the diagonal (T, T) blocks contiguously: (n_tiles, T, T) int8 0/1 mask.
    idx = jnp.arange(n_tiles)
    adj_diag = adj_p.reshape(n_tiles, T, n_tiles, T)[idx, :, idx, :]
    # The kernel only consumes diagonal blocks -> refuse graphs whose edges cross
    # a node-tile boundary instead of silently dropping them.
    # TODO(synk): support cross-tile graphs via a source-tile grid axis + online softmax.
    try:
        cross_tile = bool(jnp.count_nonzero(adj_p) != jnp.count_nonzero(adj_diag))
    except jax.errors.ConcretizationTypeError:
        cross_tile = False          # traced adjacency: skip host-side validation
    if cross_tile:
        raise ValueError(
            "adjacency has edges crossing a %d-node tile boundary; pad each graph "
            "to a tile boundary before batching (cross-tile edges are unsupported)." % T)
    adj_blocks = (adj_diag != 0).astype(jnp.int8)

    for l in range(num_layers):
        # fused (Np, H*Fout) bf16 output == GATConv(g, h).flatten(1)
        h = gat_conv(h, layer_params[l], adj_blocks,
                     negative_slope=negative_slope, apply_elu=True,
                     out_dtype=jnp.bfloat16, score_dtype=score_dtype,
                     node_tile=T)
    logits = gat_conv(h, layer_params[-1], adj_blocks,
                      negative_slope=negative_slope, apply_elu=False,
                      out_dtype=jnp.float32, score_dtype=score_dtype,
                      node_tile=T)
    H_last, _, C = layer_params[-1][0].shape
    return logits[:N].reshape(N, H_last, C).mean(axis=1)     # .mean(1)


def init_gatconv_params(key, in_dim, out_dim, heads):
    k1, k2, k3 = jax.random.split(key, 3)
    W = jax.random.normal(k1, (heads, in_dim, out_dim), jnp.float32) * 0.1
    attn_l = jax.random.normal(k2, (heads, 1, out_dim), jnp.float32) * 0.1
    attn_r = jax.random.normal(k3, (heads, 1, out_dim), jnp.float32) * 0.1
    bias = jnp.zeros((heads, 1, out_dim), jnp.float32)        # DGL inits bias to zeros
    return (W, attn_l, attn_r, bias)


if __name__ == "__main__":
    # Model config (small): num_layers=1 hidden GAT layer + output layer.
    num_layers = 1
    in_dim = 16
    num_hidden = 8
    num_classes = 4
    heads = [2, 2]
    negative_slope = 0.2
    # TODO(synk): feat_drop/attn_drop (identity at inference) and the residual=True
    # path are not exercised by this config.

    # Batched graph (dgl.batch): 2 graphs x 8 nodes, block-diagonal adjacency,
    # self-loops + bidirectional ring inside each graph.
    num_graphs, n_per = 2, 8
    N = num_graphs * n_per
    adj_list = [[0.0] * N for _ in range(N)]
    for g in range(num_graphs):
        base = g * n_per
        for i in range(n_per):
            adj_list[base + i][base + i] = 1.0                        # self-loop
            nxt = base + (i + 1) % n_per
            adj_list[nxt][base + i] = 1.0                             # i -> i+1
            adj_list[base + i][nxt] = 1.0                             # i+1 -> i
    adj = jnp.array(adj_list, dtype=jnp.float32)

    key = jax.random.PRNGKey(0)
    k_in, k0, k1 = jax.random.split(key, 3)
    inputs = jax.random.normal(k_in, (N, in_dim), jnp.float32)

    layer_params = [
        init_gatconv_params(k0, in_dim, num_hidden, heads[0]),                   # hidden layer
        init_gatconv_params(k1, num_hidden * heads[0], num_classes, heads[1]),   # output layer
    ]

    logits = gat_forward(inputs, adj, layer_params,
                         num_layers=num_layers, negative_slope=negative_slope)
    logits = jax.block_until_ready(logits)
    assert logits.shape == (N, num_classes)
    print("KERNEL_OK")
</pallas_src>

<mosaic_0001>
module attributes {stable_mosaic.version = 11 : i64} {
  func.func @_gat_conv_kernel(%arg0: i32, %arg1: memref<128x16xf32, #tpu.memory_space<vmem>>, %arg2: memref<16x20xf32, #tpu.memory_space<vmem>>, %arg3: memref<1x16xf32, #tpu.memory_space<vmem>>, %arg4: memref<1x128x128xi8, #tpu.memory_space<vmem>>, %arg5: memref<128x16xbf16, #tpu.memory_space<vmem>>) attributes {dimension_semantics = [#tpu.dimension_semantics<parallel>], iteration_bounds = array<i64: 1>, scalar_prefetch = 0 : i64, scratch_operands = 0 : i64, tpu.core_type = #tpu.core_type<tc>, window_params = [{transform_indices = @transform_0, window_bounds = array<i64: 128, 16>}, {pipeline_mode = #tpu.pipeline_mode<synchronous>, transform_indices = @transform_1, window_bounds = array<i64: 16, 20>}, {pipeline_mode = #tpu.pipeline_mode<synchronous>, transform_indices = @transform_2, window_bounds = array<i64: 1, 16>}, {transform_indices = @transform_3, window_bounds = array<i64: 1, 128, 128>}, {transform_indices = @transform_4, window_bounds = array<i64: 128, 16>}]} {
    %c0 = arith.constant 0 : index
    %c0_0 = arith.constant 0 : index
    %0 = vector.load %arg1[%c0, %c0_0] : memref<128x16xf32, #tpu.memory_space<vmem>>, vector<128x16xf32>
    %c0_1 = arith.constant 0 : index
    %c0_2 = arith.constant 0 : index
    %1 = vector.load %arg2[%c0_1, %c0_2] : memref<16x20xf32, #tpu.memory_space<vmem>>, vector<16x20xf32>
    %cst = arith.constant dense<0.000000e+00> : vector<128x20xf32>
    %2 = tpu.matmul %0, %1, %cst {dimension_numbers = #tpu.dot_dimension_numbers<[1], [0], [0], [1], [0, 0, 1, 1], [], []>} : vector<128x16xf32>, vector<16x20xf32>, vector<128x20xf32> -> vector<128x20xf32>
    %3 = vector.extract_strided_slice %2 {offsets = [0, 0], sizes = [128, 16], strides = [1, 1]} : vector<128x20xf32> to vector<128x16xf32>
    %4 = arith.truncf %3 : vector<128x16xf32> to vector<128x16xbf16>
    %5 = vector.extract_strided_slice %2 {offsets = [0, 16], sizes = [128, 2], strides = [1, 1]} : vector<128x20xf32> to vector<128x2xf32>
    %6 = tpu.transpose %5, [1, 0] : vector<128x2xf32> -> vector<2x128xf32>
    %7 = vector.extract_strided_slice %2 {offsets = [0, 18], sizes = [128, 2], strides = [1, 1]} : vector<128x20xf32> to vector<128x2xf32>
    %c0_3 = arith.constant 0 : index
    %c0_4 = arith.constant 0 : index
    %c0_5 = arith.constant 0 : index
    %8 = vector.load %arg4[%c0_3, %c0_4, %c0_5] : memref<1x128x128xi8, #tpu.memory_space<vmem>>, vector<1x128x128xi8>
    %9 = vector.shape_cast %8 : vector<1x128x128xi8> to vector<128x128xi8>
    %10 = arith.sitofp %9 : vector<128x128xi8> to vector<128x128xf32>
    %11 = vector.extract_strided_slice %7 {offsets = [0, 0], sizes = [128, 1], strides = [1, 1]} : vector<128x2xf32> to vector<128x1xf32>
    %12 = vector.extract_strided_slice %6 {offsets = [0, 0], sizes = [1, 128], strides = [1, 1]} : vector<2x128xf32> to vector<1x128xf32>
    %13 = vector.broadcast %11 : vector<128x1xf32> to vector<128x128xf32>
    %14 = vector.broadcast %12 : vector<1x128xf32> to vector<128x128xf32>
    %15 = arith.addf %13, %14 : vector<128x128xf32>
    %cst_6 = arith.constant 2.000000e-01 : f32
    %16 = vector.broadcast %cst_6 : f32 to vector<128x128xf32>
    %17 = arith.mulf %16, %15 : vector<128x128xf32>
    %18 = arith.maximumf %15, %17 : vector<128x128xf32>
    %cst_7 = arith.constant dense<0xFF800000> : vector<128xf32>
    %19 = vector.multi_reduction <maximumf>, %18, %cst_7 [1] : vector<128x128xf32> to vector<128xf32>
    %20 = vector.shape_cast %19 : vector<128xf32> to vector<128x1xf32>
    %21 = vector.broadcast %20 : vector<128x1xf32> to vector<128x128xf32>
    %22 = arith.subf %18, %21 : vector<128x128xf32>
    %23 = math.exp %22 : vector<128x128xf32>
    %24 = arith.mulf %23, %10 : vector<128x128xf32>
    %cst_8 = arith.constant dense<0.000000e+00> : vector<128xf32>
    %25 = vector.multi_reduction <add>, %24, %cst_8 [1] : vector<128x128xf32> to vector<128xf32>
    %26 = vector.shape_cast %25 : vector<128xf32> to vector<128x1xf32>
    %cst_9 = arith.constant 0.000000e+00 : f32
    %27 = vector.broadcast %cst_9 : f32 to vector<128x1xf32>
    %28 = arith.cmpf ogt, %26, %27 : vector<128x1xf32>
    %cst_10 = arith.constant 1.000000e+00 : f32
    %29 = vector.broadcast %cst_10 : f32 to vector<128x1xf32>
    %30 = arith.select %28, %26, %29 : vector<128x1xi1>, vector<128x1xf32>
    %31 = tpu.reciprocal %30 {approx = true} : vector<128x1xf32> -> vector<128x1xf32>
    %32 = vector.extract_strided_slice %4 {offsets = [0, 0], sizes = [128, 8], strides = [1, 1]} : vector<128x16xbf16> to vector<128x8xbf16>
    %33 = arith.truncf %24 : vector<128x128xf32> to vector<128x128xbf16>
    %cst_11 = arith.constant dense<0.000000e+00> : vector<128x8xf32>
    %34 = tpu.matmul %33, %32, %cst_11 {dimension_numbers = #tpu.dot_dimension_numbers<[1], [0], [0], [1], [0, 0, 1, 1], [], []>} : vector<128x128xbf16>, vector<128x8xbf16>, vector<128x8xf32> -> vector<128x8xf32>
    %35 = vector.broadcast %31 : vector<128x1xf32> to vector<128x8xf32>
    %36 = arith.mulf %34, %35 : vector<128x8xf32>
    %c0_12 = arith.constant 0 : index
    %c0_13 = arith.constant 0 : index
    %37 = vector.load %arg3[%c0_12, %c0_13] : memref<1x16xf32, #tpu.memory_space<vmem>>, vector<1x8xf32>
    %38 = vector.broadcast %37 : vector<1x8xf32> to vector<128x8xf32>
    %39 = arith.addf %36, %38 : vector<128x8xf32>
    %cst_14 = arith.constant 0.000000e+00 : f32
    %40 = vector.broadcast %cst_14 : f32 to vector<128x8xf32>
    %41 = arith.cmpf ogt, %39, %40 : vector<128x8xf32>
    %cst_15 = arith.constant 0.000000e+00 : f32
    %42 = vector.broadcast %cst_15 : f32 to vector<128x8xf32>
    %43 = arith.minimumf %39, %42 : vector<128x8xf32>
    %44 = math.exp %43 : vector<128x8xf32>
    %cst_16 = arith.constant 1.000000e+00 : f32
    %45 = vector.broadcast %cst_16 : f32 to vector<128x8xf32>
    %46 = arith.subf %44, %45 : vector<128x8xf32>
    %47 = arith.select %41, %39, %46 : vector<128x8xi1>, vector<128x8xf32>
    %48 = arith.truncf %47 : vector<128x8xf32> to vector<128x8xbf16>
    %c0_17 = arith.constant 0 : index
    %c0_18 = arith.constant 0 : index
    %49 = vector.load %arg5[%c0_17, %c0_18] : memref<128x16xbf16, #tpu.memory_space<vmem>>, vector<128x8xbf16>
    tpu.vector_store %arg5[%c0_17, %c0_18], %48 {strides = array<i32>} : memref<128x16xbf16, #tpu.memory_space<vmem>>, vector<128x8xbf16>,
    %50 = vector.extract_strided_slice %7 {offsets = [0, 1], sizes = [128, 1], strides = [1, 1]} : vector<128x2xf32> to vector<128x1xf32>
    %51 = vector.extract_strided_slice %6 {offsets = [1, 0], sizes = [1, 128], strides = [1, 1]} : vector<2x128xf32> to vector<1x128xf32>
    %52 = vector.broadcast %50 : vector<128x1xf32> to vector<128x128xf32>
    %53 = vector.broadcast %51 : vector<1x128xf32> to vector<128x128xf32>
    %54 = arith.addf %52, %53 : vector<128x128xf32>
    %cst_19 = arith.constant 2.000000e-01 : f32
    %55 = vector.broadcast %cst_19 : f32 to vector<128x128xf32>
    %56 = arith.mulf %55, %54 : vector<128x128xf32>
    %57 = arith.maximumf %54, %56 : vector<128x128xf32>
    %cst_20 = arith.constant dense<0xFF800000> : vector<128xf32>
    %58 = vector.multi_reduction <maximumf>, %57, %cst_20 [1] : vector<128x128xf32> to vector<128xf32>
    %59 = vector.shape_cast %58 : vector<128xf32> to vector<128x1xf32>
    %60 = vector.broadcast %59 : vector<128x1xf32> to vector<128x128xf32>
    %61 = arith.subf %57, %60 : vector<128x128xf32>
    %62 = math.exp %61 : vector<128x128xf32>
    %63 = arith.mulf %62, %10 : vector<128x128xf32>
    %cst_21 = arith.constant dense<0.000000e+00> : vector<128xf32>
    %64 = vector.multi_reduction <add>, %63, %cst_21 [1] : vector<128x128xf32> to vector<128xf32>
    %65 = vector.shape_cast %64 : vector<128xf32> to vector<128x1xf32>
    %cst_22 = arith.constant 0.000000e+00 : f32
    %66 = vector.broadcast %cst_22 : f32 to vector<128x1xf32>
    %67 = arith.cmpf ogt, %65, %66 : vector<128x1xf32>
    %cst_23 = arith.constant 1.000000e+00 : f32
    %68 = vector.broadcast %cst_23 : f32 to vector<128x1xf32>
    %69 = arith.select %67, %65, %68 : vector<128x1xi1>, vector<128x1xf32>
    %70 = tpu.reciprocal %69 {approx = true} : vector<128x1xf32> -> vector<128x1xf32>
    %71 = vector.extract_strided_slice %4 {offsets = [0, 8], sizes = [128, 8], strides = [1, 1]} : vector<128x16xbf16> to vector<128x8xbf16>
    %72 = arith.truncf %63 : vector<128x128xf32> to vector<128x128xbf16>
    %cst_24 = arith.constant dense<0.000000e+00> : vector<128x8xf32>
    %73 = tpu.matmul %72, %71, %cst_24 {dimension_numbers = #tpu.dot_dimension_numbers<[1], [0], [0], [1], [0, 0, 1, 1], [], []>} : vector<128x128xbf16>, vector<128x8xbf16>, vector<128x8xf32> -> vector<128x8xf32>
    %74 = vector.broadcast %70 : vector<128x1xf32> to vector<128x8xf32>
    %75 = arith.mulf %73, %74 : vector<128x8xf32>
    %c0_25 = arith.constant 0 : index
    %c8 = arith.constant 8 : index
    %76 = vector.load %arg3[%c0_25, %c8] : memref<1x16xf32, #tpu.memory_space<vmem>>, vector<1x8xf32>
    %77 = vector.broadcast %76 : vector<1x8xf32> to vector<128x8xf32>
    %78 = arith.addf %75, %77 : vector<128x8xf32>
    %cst_26 = arith.constant 0.000000e+00 : f32
    %79 = vector.broadcast %cst_26 : f32 to vector<128x8xf32>
    %80 = arith.cmpf ogt, %78, %79 : vector<128x8xf32>
    %cst_27 = arith.constant 0.000000e+00 : f32
    %81 = vector.broadcast %cst_27 : f32 to vector<128x8xf32>
    %82 = arith.minimumf %78, %81 : vector<128x8xf32>
    %83 = math.exp %82 : vector<128x8xf32>
    %cst_28 = arith.constant 1.000000e+00 : f32
    %84 = vector.broadcast %cst_28 : f32 to vector<128x8xf32>
    %85 = arith.subf %83, %84 : vector<128x8xf32>
    %86 = arith.select %80, %78, %85 : vector<128x8xi1>, vector<128x8xf32>
    %87 = arith.truncf %86 : vector<128x8xf32> to vector<128x8xbf16>
    %c0_29 = arith.constant 0 : index
    %c8_30 = arith.constant 8 : index
    %88 = vector.load %arg5[%c0_29, %c8_30] : memref<128x16xbf16, #tpu.memory_space<vmem>>, vector<128x8xbf16>
    tpu.vector_store %arg5[%c0_29, %c8_30], %87 {strides = array<i32>} : memref<128x16xbf16, #tpu.memory_space<vmem>>, vector<128x8xbf16>,
    return
  }
  func.func @transform_0(%arg0: i32) -> (i32, i32) {
    %c0_i32 = arith.constant 0 : i32
    %c0_i32_0 = arith.constant 0 : i32
    return %arg0, %c0_i32 : i32, i32
  }
  func.func @transform_1(%arg0: i32) -> (i32, i32) {
    %c0_i32 = arith.constant 0 : i32
    %c0_i32_0 = arith.constant 0 : i32
    %c0_i32_1 = arith.constant 0 : i32
    return %c0_i32, %c0_i32_0 : i32, i32
  }
  func.func @transform_2(%arg0: i32) -> (i32, i32) {
    %c0_i32 = arith.constant 0 : i32
    %c0_i32_0 = arith.constant 0 : i32
    %c0_i32_1 = arith.constant 0 : i32
    return %c0_i32, %c0_i32_0 : i32, i32
  }
  func.func @transform_3(%arg0: i32) -> (i32, i32, i32) {
    %c0_i32 = arith.constant 0 : i32
    %c0_i32_0 = arith.constant 0 : i32
    %c0_i32_1 = arith.constant 0 : i32
    return %arg0, %c0_i32, %c0_i32_0 : i32, i32, i32
  }
  func.func @transform_4(%arg0: i32) -> (i32, i32) {
    %c0_i32 = arith.constant 0 : i32
    %c0_i32_0 = arith.constant 0 : i32
    return %arg0, %c0_i32 : i32, i32
  }
}

module attributes {stable_mosaic.version = 11 : i64} {
  func.func @_gat_conv_kernel(%arg0: i32, %arg1: memref<128x16xf32, #tpu.memory_space<vmem>>, %arg2: memref<16x20xf32, #tpu.memory_space<vmem>>, %arg3: memref<1x16xf32, #tpu.memory_space<vmem>>, %arg4: memref<1x128x128xi8, #tpu.memory_space<vmem>>, %arg5: memref<128x16xbf16, #tpu.memory_space<vmem>>) attributes {dimension_semantics = [#tpu.dimension_semantics<parallel>], iteration_bounds = array<i64: 1>, scalar_prefetch = 0 : i64, scratch_operands = 0 : i64, tpu.core_type = #tpu.core_type<tc>, window_params = [{transform_indices = @transform_0, window_bounds = array<i64: 128, 16>}, {pipeline_mode = #tpu.pipeline_mode<synchronous>, transform_indices = @transform_1, window_bounds = array<i64: 16, 20>}, {pipeline_mode = #tpu.pipeline_mode<synchronous>, transform_indices = @transform_2, window_bounds = array<i64: 1, 16>}, {transform_indices = @transform_3, window_bounds = array<i64: 1, 128, 128>}, {transform_indices = @transform_4, window_bounds = array<i64: 128, 16>}]} {
    %c0 = arith.constant 0 : index
    %c0_0 = arith.constant 0 : index
    %0 = vector.load %arg1[%c0, %c0_0] : memref<128x16xf32, #tpu.memory_space<vmem>>, vector<128x16xf32>
    %c0_1 = arith.constant 0 : index
    %c0_2 = arith.constant 0 : index
    %1 = vector.load %arg2[%c0_1, %c0_2] : memref<16x20xf32, #tpu.memory_space<vmem>>, vector<16x20xf32>
    %cst = arith.constant dense<0.000000e+00> : vector<128x20xf32>
    %2 = tpu.matmul %0, %1, %cst {dimension_numbers = #tpu.dot_dimension_numbers<[1], [0], [0], [1], [0, 0, 1, 1], [], []>} : vector<128x16xf32>, vector<16x20xf32>, vector<128x20xf32> -> vector<128x20xf32>
    %3 = vector.extract_strided_slice %2 {offsets = [0, 0], sizes = [128, 16], strides = [1, 1]} : vector<128x20xf32> to vector<128x16xf32>
    %4 = arith.truncf %3 : vector<128x16xf32> to vector<128x16xbf16>
    %5 = vector.extract_strided_slice %2 {offsets = [0, 16], sizes = [128, 2], strides = [1, 1]} : vector<128x20xf32> to vector<128x2xf32>
    %6 = tpu.transpose %5, [1, 0] : vector<128x2xf32> -> vector<2x128xf32>
    %7 = vector.extract_strided_slice %2 {offsets = [0, 18], sizes = [128, 2], strides = [1, 1]} : vector<128x20xf32> to vector<128x2xf32>
    %c0_3 = arith.constant 0 : index
    %c0_4 = arith.constant 0 : index
    %c0_5 = arith.constant 0 : index
    %8 = vector.load %arg4[%c0_3, %c0_4, %c0_5] : memref<1x128x128xi8, #tpu.memory_space<vmem>>, vector<1x128x128xi8>
    %9 = vector.shape_cast %8 : vector<1x128x128xi8> to vector<128x128xi8>
    %10 = arith.sitofp %9 : vector<128x128xi8> to vector<128x128xf32>
    %11 = vector.extract_strided_slice %7 {offsets = [0, 0], sizes = [128, 1], strides = [1, 1]} : vector<128x2xf32> to vector<128x1xf32>
    %12 = vector.extract_strided_slice %6 {offsets = [0, 0], sizes = [1, 128], strides = [1, 1]} : vector<2x128xf32> to vector<1x128xf32>
    %13 = vector.broadcast %11 : vector<128x1xf32> to vector<128x128xf32>
    %14 = vector.broadcast %12 : vector<1x128xf32> to vector<128x128xf32>
    %15 = arith.addf %13, %14 : vector<128x128xf32>
    %cst_6 = arith.constant 2.000000e-01 : f32
    %16 = vector.broadcast %cst_6 : f32 to vector<128x128xf32>
    %17 = arith.mulf %16, %15 : vector<128x128xf32>
    %18 = arith.maximumf %15, %17 : vector<128x128xf32>
    %cst_7 = arith.constant dense<0xFF800000> : vector<128xf32>
    %19 = vector.multi_reduction <maximumf>, %18, %cst_7 [1] : vector<128x128xf32> to vector<128xf32>
    %20 = vector.shape_cast %19 : vector<128xf32> to vector<128x1xf32>
    %21 = vector.broadcast %20 : vector<128x1xf32> to vector<128x128xf32>
    %22 = arith.subf %18, %21 : vector<128x128xf32>
    %23 = math.exp %22 : vector<128x128xf32>
    %24 = arith.mulf %23, %10 : vector<128x128xf32>
    %cst_8 = arith.constant dense<0.000000e+00> : vector<128xf32>
    %25 = vector.multi_reduction <add>, %24, %cst_8 [1] : vector<128x128xf32> to vector<128xf32>
    %26 = vector.shape_cast %25 : vector<128xf32> to vector<128x1xf32>
    %cst_9 = arith.constant 0.000000e+00 : f32
    %27 = vector.broadcast %cst_9 : f32 to vector<128x1xf32>
    %28 = arith.cmpf ogt, %26, %27 : vector<128x1xf32>
    %cst_10 = arith.constant 1.000000e+00 : f32
    %29 = vector.broadcast %cst_10 : f32 to vector<128x1xf32>
    %30 = arith.select %28, %26, %29 : vector<128x1xi1>, vector<128x1xf32>
    %31 = tpu.reciprocal %30 {approx = true} : vector<128x1xf32> -> vector<128x1xf32>
    %32 = vector.extract_strided_slice %4 {offsets = [0, 0], sizes = [128, 8], strides = [1, 1]} : vector<128x16xbf16> to vector<128x8xbf16>
    %33 = arith.truncf %24 : vector<128x128xf32> to vector<128x128xbf16>
    %cst_11 = arith.constant dense<0.000000e+00> : vector<128x8xf32>
    %34 = tpu.matmul %33, %32, %cst_11 {dimension_numbers = #tpu.dot_dimension_numbers<[1], [0], [0], [1], [0, 0, 1, 1], [], []>} : vector<128x128xbf16>, vector<128x8xbf16>, vector<128x8xf32> -> vector<128x8xf32>
    %35 = vector.broadcast %31 : vector<128x1xf32> to vector<128x8xf32>
    %36 = arith.mulf %34, %35 : vector<128x8xf32>
    %c0_12 = arith.constant 0 : index
    %c0_13 = arith.constant 0 : index
    %37 = vector.load %arg3[%c0_12, %c0_13] : memref<1x16xf32, #tpu.memory_space<vmem>>, vector<1x8xf32>
    %38 = vector.broadcast %37 : vector<1x8xf32> to vector<128x8xf32>
    %39 = arith.addf %36, %38 : vector<128x8xf32>
    %cst_14 = arith.constant 0.000000e+00 : f32
    %40 = vector.broadcast %cst_14 : f32 to vector<128x8xf32>
    %41 = arith.cmpf ogt, %39, %40 : vector<128x8xf32>
    %cst_15 = arith.constant 0.000000e+00 : f32
    %42 = vector.broadcast %cst_15 : f32 to vector<128x8xf32>
    %43 = arith.minimumf %39, %42 : vector<128x8xf32>
    %44 = math.exp %43 : vector<128x8xf32>
    %cst_16 = arith.constant 1.000000e+00 : f32
    %45 = vector.broadcast %cst_16 : f32 to vector<128x8xf32>
    %46 = arith.subf %44, %45 : vector<128x8xf32>
    %47 = arith.select %41, %39, %46 : vector<128x8xi1>, vector<128x8xf32>
    %48 = arith.truncf %47 : vector<128x8xf32> to vector<128x8xbf16>
    %c0_17 = arith.constant 0 : index
    %c0_18 = arith.constant 0 : index
    %49 = vector.load %arg5[%c0_17, %c0_18] : memref<128x16xbf16, #tpu.memory_space<vmem>>, vector<128x8xbf16>
    tpu.vector_store %arg5[%c0_17, %c0_18], %48 {strides = array<i32>} : memref<128x16xbf16, #tpu.memory_space<vmem>>, vector<128x8xbf16>,
    %50 = vector.extract_strided_slice %7 {offsets = [0, 1], sizes = [128, 1], strides = [1, 1]} : vector<128x2xf32> to vector<128x1xf32>
    %51 = vector.extract_strided_slice %6 {offsets = [1, 0], sizes = [1, 128], strides = [1, 1]} : vector<2x128xf32> to vector<1x128xf32>
    %52 = vector.broadcast %50 : vector<128x1xf32> to vector<128x128xf32>
    %53 = vector.broadcast %51 : vector<1x128xf32> to vector<128x128xf32>
    %54 = arith.addf %52, %53 : vector<128x128xf32>
    %cst_19 = arith.constant 2.000000e-01 : f32
    %55 = vector.broadcast %cst_19 : f32 to vector<128x128xf32>
    %56 = arith.mulf %55, %54 : vector<128x128xf32>
    %57 = arith.maximumf %54, %56 : vector<128x128xf32>
    %cst_20 = arith.constant dense<0xFF800000> : vector<128xf32>
    %58 = vector.multi_reduction <maximumf>, %57, %cst_20 [1] : vector<128x128xf32> to vector<128xf32>
    %59 = vector.shape_cast %58 : vector<128xf32> to vector<128x1xf32>
    %60 = vector.broadcast %59 : vector<128x1xf32> to vector<128x128xf32>
    %61 = arith.subf %57, %60 : vector<128x128xf32>
    %62 = math.exp %61 : vector<128x128xf32>
    %63 = arith.mulf %62, %10 : vector<128x128xf32>
    %cst_21 = arith.constant dense<0.000000e+00> : vector<128xf32>
    %64 = vector.multi_reduction <add>, %63, %cst_21 [1] : vector<128x128xf32> to vector<128xf32>
    %65 = vector.shape_cast %64 : vector<128xf32> to vector<128x1xf32>
    %cst_22 = arith.constant 0.000000e+00 : f32
    %66 = vector.broadcast %cst_22 : f32 to vector<128x1xf32>
    %67 = arith.cmpf ogt, %65, %66 : vector<128x1xf32>
    %cst_23 = arith.constant 1.000000e+00 : f32
    %68 = vector.broadcast %cst_23 : f32 to vector<128x1xf32>
    %69 = arith.select %67, %65, %68 : vector<128x1xi1>, vector<128x1xf32>
    %70 = tpu.reciprocal %69 {approx = true} : vector<128x1xf32> -> vector<128x1xf32>
    %71 = vector.extract_strided_slice %4 {offsets = [0, 8], sizes = [128, 8], strides = [1, 1]} : vector<128x16xbf16> to vector<128x8xbf16>
    %72 = arith.truncf %63 : vector<128x128xf32> to vector<128x128xbf16>
    %cst_24 = arith.constant dense<0.000000e+00> : vector<128x8xf32>
    %73 = tpu.matmul %72, %71, %cst_24 {dimension_numbers = #tpu.dot_dimension_numbers<[1], [0], [0], [1], [0, 0, 1, 1], [], []>} : vector<128x128xbf16>, vector<128x8xbf16>, vector<128x8xf32> -> vector<128x8xf32>
    %74 = vector.broadcast %70 : vector<128x1xf32> to vector<128x8xf32>
    %75 = arith.mulf %73, %74 : vector<128x8xf32>
    %c0_25 = arith.constant 0 : index
    %c8 = arith.constant 8 : index
    %76 = vector.load %arg3[%c0_25, %c8] : memref<1x16xf32, #tpu.memory_space<vmem>>, vector<1x8xf32>
    %77 = vector.broadcast %76 : vector<1x8xf32> to vector<128x8xf32>
    %78 = arith.addf %75, %77 : vector<128x8xf32>
    %cst_26 = arith.constant 0.000000e+00 : f32
    %79 = vector.broadcast %cst_26 : f32 to vector<128x8xf32>
    %80 = arith.cmpf ogt, %78, %79 : vector<128x8xf32>
    %cst_27 = arith.constant 0.000000e+00 : f32
    %81 = vector.broadcast %cst_27 : f32 to vector<128x8xf32>
    %82 = arith.minimumf %78, %81 : vector<128x8xf32>
    %83 = math.exp %82 : vector<128x8xf32>
    %cst_28 = arith.constant 1.000000e+00 : f32
    %84 = vector.broadcast %cst_28 : f32 to vector<128x8xf32>
    %85 = arith.subf %83, %84 : vector<128x8xf32>
    %86 = arith.select %80, %78, %85 : vector<128x8xi1>, vector<128x8xf32>
    %87 = arith.truncf %86 : vector<128x8xf32> to vector<128x8xbf16>
    %c0_29 = arith.constant 0 : index
    %c8_30 = arith.constant 8 : index
    %88 = vector.load %arg5[%c0_29, %c8_30] : memref<128x16xbf16, #tpu.memory_space<vmem>>, vector<128x8xbf16>
    tpu.vector_store %arg5[%c0_29, %c8_30], %87 {strides = array<i32>} : memref<128x16xbf16, #tpu.memory_space<vmem>>, vector<128x8xbf16>,
    return
  }
  func.func @transform_0(%arg0: i32) -> (i32, i32) {
    %c0_i32 = arith.constant 0 : i32
    %c0_i32_0 = arith.constant 0 : i32
    return %arg0, %c0_i32 : i32, i32
  }
  func.func @transform_1(%arg0: i32) -> (i32, i32) {
    %c0_i32 = arith.constant 0 : i32
    %c0_i32_0 = arith.constant 0 : i32
    %c0_i32_1 = arith.constant 0 : i32
    return %c0_i32, %c0_i32_0 : i32, i32
  }
  func.func @transform_2(%arg0: i32) -> (i32, i32) {
    %c0_i32 = arith.constant 0 : i32
    %c0_i32_0 = arith.constant 0 : i32
    %c0_i32_1 = arith.constant 0 : i32
    return %c0_i32, %c0_i32_0 : i32, i32
  }
  func.func @transform_3(%arg0: i32) -> (i32, i32, i32) {
    %c0_i32 = arith.constant 0 : i32
    %c0_i32_0 = arith.constant 0 : i32
    %c0_i32_1 = arith.constant 0 : i32
    return %arg0, %c0_i32, %c0_i32_0 : i32, i32, i32
  }
  func.func @transform_4(%arg0: i32) -> (i32, i32) {
    %c0_i32 = arith.constant 0 : i32
    %c0_i32_0 = arith.constant 0 : i32
    return %arg0, %c0_i32 : i32, i32
  }
}

</mosaic_0001>

<bundles_post_ra>
// kernel: tpu_custom_call.1
= control target key start
LH: loop header
LB: loop body
LE: loop exit
PB: predicated region body
PF: predicated region fallthrough
CT: control target
= control target key end

     0   :  { %vm36_vm0 = vcmask 130048   ;;  %v2144_v3 = vmov 19   ;;  %v2145_v20 = vmov 18   ;;  %s2146_s24 = smov 112   ;;  %s2148_s7 = smov 8   ;;  %s3096_s1 = inlined_call_operand.vmem [shape: f32[16,20], index: 1, kind: input, shape index: {}]   ;;  %s3097_s0 = inlined_call_operand.vmem [shape: f32[128,16], index: 0, kind: input, shape index: {}]   ;;  %s3098_s3 = inlined_call_operand.vmem [shape: s8[1,128,128], index: 3, kind: input, shape index: {}]   ;;  %s3099_s2 = inlined_call_operand.vmem [shape: f32[1,16], index: 2, kind: input, shape index: {}]   ;;  %s3100_s4 = inlined_call_operand.vmem [shape: bf16[128,16], index: 4, kind: output, shape index: {}]  }
   0x1   :  { %v34_v0 = vld [vmem:[%s3096_s1] sm:$0xff]  ;;  %v35_v1 = vld [vmem:[%s3096_s1 + $0x8] sm:$0xff]  ;;  %1931 = vset.pattern.permute.xlu1 %v2144_v3  ;;  %v20_v6 = vld [vmem:[%s3097_s0 + $0x10] sm:$0xff]  ;;  %1932 = vset.pattern.permute.xlu0 %v2145_v20 }
   0x2   :  { %v18_v2 = vld [vmem:[%s3097_s0] sm:$0xff]  ;;  %v1922_v4 = vpack.c.bf16 %v35_v1, %v34_v0  ;;  %v19_v5 = vld [vmem:[%s3097_s0 + $0x8] sm:$0xff]  ;;  %v21_v7 = vld [vmem:[%s3097_s0 + $0x18] sm:$0xff] }
   0x3   :  { %1834 = vmatprep.mubr.msk.f32.mxu0 %vm36_vm0, %v18_v2  ;;  %v22_v8 = vld [vmem:[%s3097_s0 + $0x20] sm:$0xff]  ;;  %v23_v9 = vld [vmem:[%s3097_s0 + $0x28] sm:$0xff]  ;;  %v24_v10 = vld [vmem:[%s3097_s0 + $0x30] sm:$0xff] }
   0x4   :  { %1923 = vmatprep.subr.bf16.mxu0 %v1922_v4  ;;  %v25_v11 = vld [vmem:[%s3097_s0 + $0x38] sm:$0xff]  ;;  %v26_v12 = vld [vmem:[%s3097_s0 + $0x40] sm:$0xff]  ;;  %v27_v13 = vld [vmem:[%s3097_s0 + $0x48] sm:$0xff] }
   0x5   :  { %1925 = vmatpush3.bf16.msra.mxu0 %v1922_v4  ;;  %v28_v14 = vld [vmem:[%s3097_s0 + $0x50] sm:$0xff]  ;;  %v29_v15 = vld [vmem:[%s3097_s0 + $0x58] sm:$0xff]  ;;  %v30_v16 = vld [vmem:[%s3097_s0 + $0x60] sm:$0xff] }
   0x6   :  { %v31_v17 = vld [vmem:[%s3097_s0 + $0x68] sm:$0xff]  ;;  %v32_v18 = vld [vmem:[%s3097_s0 + $0x70] sm:$0xff]  ;;  %v33_v19 = vld [vmem:[%s3097_s0 + $0x78] sm:$0xff]  ;;  %s2147_s0 = smov 120  }
   0x8   :  { %1835 = vmatmul.mubr.msk.f32.vlgmr.msra.gmra.mrb[0].mxu0 %vm36_vm0, %v19_v5 }
   0x9   :  { %1837 = vmatprep.mubr.msk.f32.mxu0 %vm36_vm0, %v20_v6 }
   0xc   :  { %1838 = vmatmul.mubr.msk.f32.gmra.mrb[2].mxu0 %vm36_vm0, %v21_v7 }
   0xd   :  { %1840 = vmatprep.mubr.msk.f32.mxu0 %vm36_vm0, %v22_v8 }
  0x10   :  { %1841 = vmatmul.mubr.msk.f32.gmra.mrb[4].mxu0 %vm36_vm0, %v23_v9 }
  0x11   :  { %1843 = vmatprep.mubr.msk.f32.mxu0 %vm36_vm0, %v24_v10 }
  0x14   :  { %1844 = vmatmul.mubr.msk.f32.gmra.mrb[6].mxu0 %vm36_vm0, %v25_v11 }
  0x15   :  { %1846 = vmatprep.mubr.msk.f32.mxu0 %vm36_vm0, %v26_v12 }
  0x18   :  { %1847 = vmatmul.mubr.msk.f32.gmra.mrb[8].mxu0 %vm36_vm0, %v27_v13 }
  0x19   :  { %1849 = vmatprep.mubr.msk.f32.mxu0 %vm36_vm0, %v28_v14 }
  0x1c   :  { %1850 = vmatmul.mubr.msk.f32.gmra.mrb[10].mxu0 %vm36_vm0, %v29_v15 }
  0x1d   :  { %1852 = vmatprep.mubr.msk.f32.mxu0 %vm36_vm0, %v30_v16 }
  0x20   :  { %1853 = vmatmul.mubr.msk.f32.gmra.mrb[12].mxu0 %vm36_vm0, %v31_v17 }
  0x21   :  { %1855 = vmatprep.mubr.msk.f32.mxu0 %vm36_vm0, %v32_v18 }
  0x24   :  { %1856 = vmatmul.mubr.msk.f32.gmra.mrb[14].mxu0 %vm36_vm0, %v33_v19 }
  0xdb   :  { %v1836_v21 = vpop.f32.mrb[0].mxu0 }
  0xdc   :  { %988 = vperm.xlu1 %1931, %v1836_v21   ;;  %256 = vrot.lane.b32.xlu0 %v1836_v21, %s2146_s24  ;;  %v151_v22 = vpop.f32.mrb[1].mxu0 }
  0xdd   :  { %v2247_v23 = vpack.c.bf16 %v1836_v21, %v151_v22 }
  0xdf   :  { %v1839_v24 = vpop.f32.mrb[2].mxu0  ;;  %1858 = vmatprep.subr.bf16.mxu1 %v2247_v23 }
  0xe0   :  { %375 = vperm.xlu0 %1932, %v1836_v21   ;;  %1859 = vmatpush3.bf16.msra.mxu1 %v2247_v23  ;;  %v161_v25 = vpop.f32.mrb[3].mxu0 }
  0xe1   :  { %260 = vrot.lane.b32.xlu1 %v1839_v24, %s2146_s24  ;;  %v2252_v26 = vpack.c.bf16 %v1839_v24, %v161_v25 }
  0xe3   :  { %v1842_v27 = vpop.f32.mrb[4].mxu0  ;;  %1860 = vmatprep.subr.bf16.mxu1 %v2252_v26 }
  0xe4   :  { %254 = vrot.lane.b32.xlu0 %v151_v22, %s2146_s24  ;;  %v171_v28 = vpop.f32.mrb[5].mxu0  ;;  %1861 = vmatpush3.bf16.msra.mxu1 %v2252_v26 }
  0xe5   :  { %258 = vrot.lane.b32.xlu1 %v161_v25, %s2146_s24  ;;  %1933 = vset.pattern.permute.xlu0 %v2144_v3  ;;  %v2259_v29 = vpack.c.bf16 %v1842_v27, %v171_v28 }
  0xe7   :  { %v1845_v30 = vpop.f32.mrb[6].mxu0  ;;  %1862 = vmatprep.subr.bf16.mxu1 %v2259_v29 }
  0xe8   :  { %984 = vperm.xlu0 %1933, %v151_v22   ;;  %v181_v31 = vpop.f32.mrb[7].mxu0  ;;  %1863 = vmatpush3.bf16.msra.mxu1 %v2259_v29 }
  0xe9   :  { %992 = vperm.xlu1 %1931, %v161_v25   ;;  %v233_v32 = vpack.c.bf16 %v1845_v30, %v181_v31 }
  0xeb   :  { %v1848_v33 = vpop.f32.mrb[8].mxu0  ;;  %1864 = vmatprep.subr.bf16.mxu1 %v233_v32 }
  0xec   :  { %1934 = vset.pattern.permute.xlu0 %v2145_v20  ;;  %v191_v34 = vpop.f32.mrb[9].mxu0  ;;  %1865 = vmatpush3.bf16.msra.mxu1 %v233_v32 }
  0xed   :  { %264 = vrot.lane.b32.xlu1 %v1842_v27, %s2146_s24  ;;  %371 = vperm.xlu0 %1934, %v151_v22   ;;  %v234_v35 = vpack.c.bf16 %v1848_v33, %v191_v34 }
  0xef   :  { %v2265_v36 = vpop.f32.mrb[10].mxu0  ;;  %1866 = vmatprep.subr.bf16.mxu1 %v234_v35 }
  0xf0   :  { %v2267_v37 = vpop.f32.mrb[11].mxu0  ;;  %1867 = vmatpush3.bf16.msra.mxu1 %v234_v35 }
  0xf1   :  { %1000 = vperm.xlu1 %1931, %v171_v28   ;;  %1935 = vset.pattern.permute.xlu0 %v2144_v3  ;;  %v2272_v38 = vpack.c.bf16 %v2265_v36, %v2267_v37 }
  0xf2   :  { %996 = vperm.xlu0 %1935, %v1839_v24  }
  0xf3   :  { %v1854_v39 = vpop.f32.mrb[12].mxu0  ;;  %1868 = vmatprep.subr.bf16.mxu1 %v2272_v38 }
  0xf4   :  { %v211_v40 = vpop.f32.mrb[13].mxu0  ;;  %1869 = vmatpush3.bf16.msra.mxu1 %v2272_v38 }
  0xf5   :  { %268 = vrot.lane.b32.xlu1 %v1845_v30, %s2146_s24  ;;  %v2277_v41 = vpack.c.bf16 %v1854_v39, %v211_v40 }
  0xf6   :  { %1936 = vset.pattern.permute.xlu0 %v2145_v20 }
  0xf7   :  { %383 = vperm.xlu0 %1936, %v1839_v24   ;;  %v1857_v42 = vpop.f32.mrb[14].mxu0  ;;  %1870 = vmatprep.subr.bf16.mxu1 %v2277_v41 }
  0xf8   :  { %v221_v43 = vpop.f32.mrb[15].mxu0  ;;  %1871 = vmatpush3.bf16.msra.mxu1 %v2277_v41 }
  0xf9   :  { %1008 = vperm.xlu1 %1931, %v181_v31   ;;  %v2282_v44 = vpack.c.bf16 %v1857_v42, %v221_v43 }
  0xfb   :  { %379 = vperm.xlu0 %1936, %v161_v25   ;;  %1872 = vmatprep.subr.bf16.mxu1 %v2282_v44 }
  0xfc   :  { %1873 = vmatpush3.bf16.msra.mxu1 %v2282_v44 }
  0xfd   :  { %272 = vrot.lane.b32.xlu1 %v1848_v33, %s2146_s24 }
  0xfe   :  { %1942 = vset.pattern.permute.xlu1 %v2145_v20 }
  0xff   :  { %1937 = vset.pattern.permute.xlu0 %v2144_v3 }
 0x100   :  { %1004 = vperm.xlu0 %1937, %v1842_v27  }
 0x101   :  { %407 = vperm.xlu1 %1942, %v1848_v33  }
 0x104   :  { %1938 = vset.pattern.permute.xlu0 %v2145_v20 }
 0x105   :  { %1943 = vset.pattern.permute.xlu1 %v2144_v3  ;;  %391 = vperm.xlu0 %1938, %v1842_v27  }
 0x106   :  { %1016 = vperm.xlu1 %1943, %v191_v34  }
 0x109   :  { %262 = vrot.lane.b32.xlu0 %v171_v28, %s2146_s24 }
 0x10a   :  { %276 = vrot.lane.b32.xlu1 %v2265_v36, %s2146_s24 }
 0x10d   :  { %387 = vperm.xlu0 %1938, %v171_v28  }
 0x10e   :  { %1024 = vperm.xlu1 %1943, %v2267_v37  }
 0x111   :  { %1939 = vset.pattern.permute.xlu0 %v2144_v3 }
 0x112   :  { %280 = vrot.lane.b32.xlu1 %v1854_v39, %s2146_s24  ;;  %1012 = vperm.xlu0 %1939, %v1845_v30  }
 0x116   :  { %1032 = vperm.xlu1 %1943, %v211_v40   ;;  %1940 = vset.pattern.permute.xlu0 %v2145_v20 }
 0x117   :  { %399 = vperm.xlu0 %1940, %v1845_v30  }
 0x11a   :  { %284 = vrot.lane.b32.xlu1 %v1857_v42, %s2146_s24 }
 0x11b   :  { %266 = vrot.lane.b32.xlu0 %v181_v31, %s2146_s24  ;;  %1947 = vset.pattern.permute.xlu1 %v2145_v20 }
 0x11e   :  { %423 = vperm.xlu1 %1947, %v1854_v39  }
 0x11f   :  { %395 = vperm.xlu0 %1940, %v181_v31  }
 0x122   :  { %1297 = vrot.lane.b32.xlu1 %v233_v32, %s2147_s0 }
 0x123   :  { %1941 = vset.pattern.permute.xlu0 %v2144_v3  ;;  %1948 = vset.pattern.permute.xlu1 %v2144_v3 }
 0x124   :  { %1020 = vperm.xlu0 %1941, %v1848_v33   ;;  %v434_v33 = vlaneseq }
 0x126   :  { %1299 = vrot.lane.b32.xlu1 %v234_v35, %s2147_s0  ;;  %v435_v35 = vshrl.u32 %v434_v33, 7 }
 0x128   :  { %270 = vrot.lane.b32.xlu0 %v191_v34, %s2146_s24 }
 0x129   :  { %1944 = vset.pattern.permute.xlu0 %v2145_v20 }
 0x12a   :  { %1040 = vperm.xlu1 %1948, %v221_v43  }
 0x12c   :  { %403 = vperm.xlu0 %1944, %v191_v34  }
 0x12e   :  { %1949 = vset.pattern.permute.xlu1 %v2145_v20 }
 0x12f   :  { %427 = vperm.xlu1 %1949, %v221_v43  }
 0x130   :  { %1945 = vset.pattern.permute.xlu0 %v2144_v3 }
 0x131   :  { %1028 = vperm.xlu0 %1945, %v2265_v36  }
 0x135   :  { %274 = vrot.lane.b32.xlu0 %v2267_v37, %s2146_s24 }
 0x139   :  { %1036 = vperm.xlu0 %1945, %v1854_v39  }
 0x13d   :  { %278 = vrot.lane.b32.xlu0 %v211_v40, %s2146_s24 }
 0x141   :  { %1044 = vperm.xlu0 %1945, %v1857_v42  }
 0x145   :  { %282 = vrot.lane.b32.xlu0 %v221_v43, %s2146_s24 }
 0x146   :  { %1946 = vset.pattern.permute.xlu0 %v2145_v20 }
 0x149   :  { %1291 = vrot.lane.b32.xlu0 %v2247_v23, %s2147_s0 }
 0x14d   :  { %411 = vperm.xlu0 %1946, %v2267_v37   ;;  %v1049_v37 = vsub.s32 1, %v435_v35 }
 0x14e   :  { %v257_v45 = vpop.permute.xlu0 %256 }
 0x151   :  { %415 = vperm.xlu0 %1946, %v2265_v36  }
 0x155   :  { %1293 = vrot.lane.b32.xlu0 %v2252_v26, %s2147_s0 }
 0x159   :  { %419 = vperm.xlu0 %1946, %v211_v40  }
 0x15b   :  { %v2323_v46 = vpop.permute.xlu1 %988 }
 0x15d   :  { %1295 = vrot.lane.b32.xlu0 %v2259_v29, %s2147_s0 }
 0x15f   :  { %v2325_v47 = vpop.permute.xlu0 %375  ;;  %v261_v49 = vpop.permute.xlu1 %260 }
 0x161   :  { %431 = vperm.xlu0 %1946, %v1857_v42  }
 0x163   :  { %v255_v48 = vpop.permute.xlu0 %254  ;;  %v259_v51 = vpop.permute.xlu1 %258 }
 0x164   :  { %302 = vxpose.xlu1.b32.start [1/16] (narrow) %v255_v48, 8 }
 0x165   :  { %1301 = vrot.lane.b32.xlu0 %v2272_v38, %s2147_s0 }
 0x166   :  { %1950 = vset.pattern.permute.xlu0 %v2144_v3 }
 0x167   :  { %v2330_v50 = vpop.permute.xlu0 %984 }
 0x168   :  { %303 = vxpose.xlu1.b32.cont [2/16] (narrow) %v257_v45, 8  ;;  %v2342_v57 = vpop.permute.xlu1 %992 }
 0x16c   :  { %v2332_v52 = vpop.permute.xlu0 %371  ;;  %304 = vxpose.xlu1.b32.cont [3/16] (narrow) %v259_v51, 8  ;;  %v265_v59 = vpop.permute.xlu1 %264 }
 0x170   :  { %305 = vxpose.xlu1.b32.cont [4/16] (narrow) %v261_v49, 8  ;;  %v2346_v61 = vpop.permute.xlu1 %1000 }
 0x171   :  { %v2334_v53 = vpop.permute.xlu0 %996 }
 0x174   :  { %v269_v0 = vpop.permute.xlu1 %268 }
 0x176   :  { %v2336_v54 = vpop.permute.xlu0 %383 }
 0x178   :  { %v2354_v2 = vpop.permute.xlu1 %1008 }
 0x17a   :  { %v2338_v55 = vpop.permute.xlu0 %379 }
 0x17c   :  { %v273_v4 = vpop.permute.xlu1 %272 }
 0x17f   :  { %v2340_v56 = vpop.permute.xlu0 %1004 }
 0x180   :  { %v2358_v7 = vpop.permute.xlu1 %407 }
 0x184   :  { %v2344_v58 = vpop.permute.xlu0 %391 }
 0x185   :  { %v2360_v9 = vpop.permute.xlu1 %1016 }
 0x188   :  { %v263_v60 = vpop.permute.xlu0 %262 }
 0x189   :  { %306 = vxpose.xlu1.b32.cont [5/16] (narrow) %v263_v60, 8  ;;  %v277_v11 = vpop.permute.xlu1 %276 }
 0x18c   :  { %v2348_v62 = vpop.permute.xlu0 %387 }
 0x18d   :  { %307 = vxpose.xlu1.b32.cont [6/16] (narrow) %v265_v59, 8  ;;  %v2366_v14 = vpop.permute.xlu1 %1024 }
 0x191   :  { %v2350_v63 = vpop.permute.xlu0 %1012  ;;  %v281_v16 = vpop.permute.xlu1 %280 }
 0x195   :  { %v1033_v19 = vpop.permute.xlu1 %1032 }
 0x196   :  { %v2352_v1 = vpop.permute.xlu0 %399 }
 0x199   :  { %v285_v21 = vpop.permute.xlu1 %284 }
 0x19a   :  { %v267_v3 = vpop.permute.xlu0 %266 }
 0x19b   :  { %308 = vxpose.xlu1.b32.cont [7/16] (narrow) %v267_v3, 8 }
 0x19d   :  { %v2376_v26 = vpop.permute.xlu1 %423 }
 0x19e   :  { %v2356_v5 = vpop.permute.xlu0 %395 }
 0x19f   :  { %309 = vxpose.xlu1.b32.cont [8/16] (narrow) %v269_v0, 8 }
 0x1a1   :  { %v1298_v28 = vpop.permute.xlu1 %1297 }
 0x1a3   :  { %v1021_v6 = vpop.permute.xlu0 %1020 }
 0x1a5   :  { %v1300_v31 = vpop.permute.xlu1 %1299 }
 0x1a7   :  { %v271_v8 = vpop.permute.xlu0 %270 }
 0x1a8   :  { %310 = vxpose.xlu1.b32.cont [9/16] (narrow) %v271_v8, 8 }
 0x1a9   :  { %v1041_v34 = vpop.permute.xlu1 %1040 }
 0x1ab   :  { %v2362_v10 = vpop.permute.xlu0 %403 }
 0x1ac   :  { %311 = vxpose.xlu1.b32.cont [10/16] (narrow) %v273_v4, 8 }
 0x1ae   :  { %v428_v36 = vpop.permute.xlu1 %427 }
 0x1b0   :  { %v2364_v12 = vpop.permute.xlu0 %1028 }
 0x1b4   :  { %v275_v13 = vpop.permute.xlu0 %274 }
 0x1b5   :  { %312 = vxpose.xlu1.b32.cont [11/16] (narrow) %v275_v13, 8 }
 0x1b8   :  { %v2368_v15 = vpop.permute.xlu0 %1036 }
 0x1b9   :  { %313 = vxpose.xlu1.b32.cont [12/16] (narrow) %v277_v11, 8 }
 0x1bc   :  { %v279_v17 = vpop.permute.xlu0 %278 }
 0x1bd   :  { %314 = vxpose.xlu1.b32.cont [13/16] (narrow) %v279_v17, 8 }
 0x1c0   :  { %v2370_v18 = vpop.permute.xlu0 %1044 }
 0x1c1   :  { %315 = vxpose.xlu1.b32.cont [14/16] (narrow) %v281_v16, 8 }
 0x1c4   :  { %v283_v20 = vpop.permute.xlu0 %282 }
 0x1c5   :  { %316 = vxpose.xlu1.b32.cont [15/16] (narrow) %v283_v20, 8 }
 0x1c8   :  { %v1292_v22 = vpop.permute.xlu0 %1291 }
 0x1c9   :  { %317 = vxpose.xlu1.b32.end [16/16] (narrow) %v285_v21, 8  ;;  %1890 = vmatprep.subr.bf16.mxu0 %v1292_v22 }
 0x1ca   :  { %1891 = vmatpush3.bf16.msra.mxu0 %v1292_v22 }
 0x1cc   :  { %v2372_v23 = vpop.permute.xlu0 %411 }
 0x1d0   :  { %v2374_v24 = vpop.permute.xlu0 %415 }
 0x1d4   :  { %v1294_v25 = vpop.permute.xlu0 %1293 }
 0x1d5   :  { %1892 = vmatprep.subr.bf16.mxu0 %v1294_v25 }
 0x1d6   :  { %1893 = vmatpush3.bf16.msra.mxu0 %v1294_v25 }
 0x1d8   :  { %v2378_v27 = vpop.permute.xlu0 %419 }
 0x1dc   :  { %v1296_v29 = vpop.permute.xlu0 %1295 }
 0x1dd   :  { %1894 = vmatprep.subr.bf16.mxu0 %v1296_v29 }
 0x1de   :  { %1895 = vmatpush3.bf16.msra.mxu0 %v1296_v29 }
 0x1df   :  { %1896 = vmatprep.subr.bf16.mxu0 %v1298_v28 }
 0x1e0   :  { %v2380_v30 = vpop.permute.xlu0 %431 }
 0x1e2   :  { %1897 = vmatpush3.bf16.msra.mxu0 %v1298_v28 }
 0x1e3   :  { %1898 = vmatprep.subr.bf16.mxu0 %v1300_v31 }
 0x1e4   :  { %v1302_v32 = vpop.permute.xlu0 %1301 }
 0x1e6   :  { %1899 = vmatpush3.bf16.msra.mxu0 %v1300_v31 }
 0x1e7   :  { %1900 = vmatprep.subr.bf16.mxu0 %v1302_v32 }
 0x1ea   :  { %1901 = vmatpush3.bf16.msra.mxu0 %v1302_v32 }
 0x20d   :  { %v318_v38 = vpop.trf.xlu1 }
 0x20e   :  { %v1050_v39 = vrot.slane %v318_v38, %v1049_v37 }
 0x210   :  { %v1056_v40 = vadd.f32 %v1050_v39, %v2340_v56  ;;  %v1051_v42 = vadd.f32 %v1050_v39, %v2330_v50  ;;  %v1060_v43 = vadd.f32 %v1050_v39, %v1021_v6  ;;  %v1052_v45 = vadd.f32 %v1050_v39, %v2323_v46 }
 0x211   :  { %v1063_v51 = vadd.f32 %v1050_v39, %v1033_v19  ;;  %v1053_v59 = vadd.f32 %v1050_v39, %v2342_v57  ;;  %v436_v56 = vsub.s32 0, %v435_v35  ;;  %v1065_v50 = vadd.f32 %v1050_v39, %v1041_v34 }
 0x212   :  { %v1072_v48 = vmul.f32 0.2, %v1056_v40  ;;  %v1067_v49 = vmul.f32 0.2, %v1051_v42  ;;  %v1076_v3 = vmul.f32 0.2, %v1060_v43  ;;  %v1054_v6 = vadd.f32 %v1050_v39, %v2334_v53 }
 0x213   :  { %v1068_v4 = vmul.f32 0.2, %v1052_v45  ;;  %v1079_v11 = vmul.f32 0.2, %v1063_v51  ;;  %v1069_v57 = vmul.f32 0.2, %v1053_v59  ;;  %v2399_v13 = vrot.slane %v318_v38, %v436_v56 }
 0x214   :  { %v2386_v60 = vmax.f32 %v1056_v40, %v1072_v48  ;;  %v2388_v0 = vmax.f32 %v1051_v42, %v1067_v49  ;;  %v2393_v46 = vmax.f32 %v1060_v43, %v1076_v3  ;;  %v1055_v16 = vadd.f32 %v1050_v39, %v2346_v61 }
 0x215   :  { %v2395_v8 = vmax.f32 %v1052_v45, %v1068_v4  ;;  %v2402_v17 = vmax.f32 %v1063_v51, %v1079_v11  ;;  %v2404_v19 = vmax.f32 %v1053_v59, %v1069_v57  ;;  %v1081_v20 = vmul.f32 0.2, %v1065_v50 }
 0x216   :  { %1109 = vmax.xlane.f32.xlu1 %v2386_v60  ;;  %1099 = vmax.xlane.f32.xlu0 %v2388_v0  ;;  %v1070_v53 = vmul.f32 0.2, %v1054_v6  ;;  %v2409_v21 = vadd.f32 %v2399_v13, %v428_v36  ;;  %v1071_v28 = vmul.f32 0.2, %v1055_v16  ;;  %v1057_v61 = vadd.f32 %v1050_v39, %v2354_v2 }
 0x217   :  { %v2411_v22 = vmax.f32 %v1065_v50, %v1081_v20  ;;  %v1058_v32 = vadd.f32 %v1050_v39, %v2350_v63  ;;  %v1059_v35 = vadd.f32 %v1050_v39, %v2360_v9  ;;  %v1061_v37 = vadd.f32 %v1050_v39, %v2366_v14 }
 0x218   :  { %v2413_v25 = vmax.f32 %v1054_v6, %v1070_v53  ;;  %v2418_v29 = vmax.f32 %v1055_v16, %v1071_v28  ;;  %v1073_v31 = vmul.f32 0.2, %v1057_v61  ;;  %v1062_v63 = vadd.f32 %v1050_v39, %v2364_v12 }
 0x219   :  { %v1074_v34 = vmul.f32 0.2, %v1058_v32  ;;  %v1075_v2 = vmul.f32 0.2, %v1059_v35  ;;  %v1077_v40 = vmul.f32 0.2, %v1061_v37  ;;  %v1064_v43 = vadd.f32 %v1050_v39, %v2368_v15 }
 0x21a   :  { %1117 = vmax.xlane.f32.xlu1 %v2393_v46  ;;  %1101 = vmax.xlane.f32.xlu0 %v2395_v8  ;;  %v2422_v33 = vmax.f32 %v1057_v61, %v1073_v31  ;;  %v1078_v42 = vmul.f32 0.2, %v1062_v63  ;;  %v1066_v48 = vadd.f32 %v1050_v39, %v2370_v18  ;;  %v438_v15 = vadd.f32 %v2399_v13, %v2332_v52 }
 0x21b   :  { %v2426_v36 = vmax.f32 %v1058_v32, %v1074_v34  ;;  %v2430_v38 = vmax.f32 %v1059_v35, %v1075_v2  ;;  %v2436_v9 = vmax.f32 %v1061_v37, %v1077_v40  ;;  %v1080_v45 = vmul.f32 0.2, %v1064_v43 }
 0x21c   :  { %v2440_v14 = vmax.f32 %v1062_v63, %v1078_v42  ;;  %v1082_v49 = vmul.f32 0.2, %v1066_v48  ;;  %v454_v51 = vmul.f32 0.2, %v438_v15  ;;  %v440_v59 = vadd.f32 %v2399_v13, %v2338_v55 }
 0x21d   :  { %v2444_v12 = vmax.f32 %v1064_v43, %v1080_v45  ;;  %v442_v39 = vadd.f32 %v2399_v13, %v2348_v62  ;;  %v444_v52 = vadd.f32 %v2399_v13, %v2356_v5  ;;  %v446_v6 = vadd.f32 %v2399_v13, %v2362_v10 }
 0x21e   :  { %1123 = vmax.xlane.f32.xlu1 %v2402_v17  ;;  %1103 = vmax.xlane.f32.xlu0 %v2404_v19  ;;  %v2454_v3 = vmax.f32 %v438_v15, %v454_v51  ;;  %v456_v18 = vmul.f32 0.2, %v440_v59  ;;  %v450_v16 = vadd.f32 %v2399_v13, %v2378_v27  ;;  %v468_v28 = vmul.f32 0.2, %v2409_v21 }
 0x21f   :  { %v458_v56 = vmul.f32 0.2, %v442_v39  ;;  %v460_v50 = vmul.f32 0.2, %v444_v52  ;;  %v462_v11 = vmul.f32 0.2, %v446_v6  ;;  %v441_v31 = vadd.f32 %v2399_v13, %v2336_v54 }
 0x220   :  { %v2461_v4 = vmax.f32 %v440_v59, %v456_v18  ;;  %v466_v10 = vmul.f32 0.2, %v450_v16  ;;  %v2491_v61 = vmax.f32 %v2409_v21, %v468_v28  ;;  %v443_v35 = vadd.f32 %v2399_v13, %v2344_v58 }
 0x221   :  { %v2466_v55 = vmax.f32 %v442_v39, %v458_v56  ;;  %v2471_v62 = vmax.f32 %v444_v52, %v460_v50  ;;  %v2476_v57 = vmax.f32 %v446_v6, %v462_v11  ;;  %v457_v34 = vmul.f32 0.2, %v441_v31 }
 0x222   :  { %1127 = vmax.xlane.f32.xlu1 %v2411_v22  ;;  %1105 = vmax.xlane.f32.xlu0 %v2413_v25  ;;  %v2484_v53 = vmax.f32 %v450_v16, %v466_v10  ;;  %v459_v2 = vmul.f32 0.2, %v443_v35  ;;  %v445_v21 = vadd.f32 %v2399_v13, %v2352_v1  ;;  %v447_v40 = vadd.f32 %v2399_v13, %v2358_v7 }
 0x223   :  { %v449_v42 = vadd.f32 %v2399_v13, %v2374_v24  ;;  %v451_v45 = vadd.f32 %v2399_v13, %v2376_v26 }
 0x224   :  { %v2506_v37 = vmax.f32 %v443_v35, %v459_v2  ;;  %v461_v54 = vmul.f32 0.2, %v445_v21  ;;  %v463_v58 = vmul.f32 0.2, %v447_v40 }
 0x225   :  { %v465_v1 = vmul.f32 0.2, %v449_v42  ;;  %v467_v7 = vmul.f32 0.2, %v451_v45 }
 0x226   :  { %1107 = vmax.xlane.f32.xlu0 %v2418_v29  ;;  %v2511_v63 = vmax.f32 %v445_v21, %v461_v54  ;;  %v2516_v43 = vmax.f32 %v447_v40, %v463_v58 }
 0x227   :  { %v2526_v15 = vmax.f32 %v451_v45, %v467_v7 }
 0x22a   :  { %1111 = vmax.xlane.f32.xlu0 %v2422_v33 }
 0x22e   :  { %1113 = vmax.xlane.f32.xlu0 %v2426_v36 }
 0x232   :  { %1115 = vmax.xlane.f32.xlu0 %v2430_v38 }
 0x233   :  { %1303 = vrot.lane.b32.xlu1 %v2277_v41, %s2147_s0  ;;  %v2447_v41 = vmax.f32 %v1066_v48, %v1082_v49  ;;  %v2521_v48 = vmax.f32 %v449_v42, %v465_v1  ;;  %v453_v49 = vadd.f32 %v2399_v13, %v2380_v30 }
 0x235   :  { %v469_v24 = vmul.f32 0.2, %v453_v49 }
 0x236   :  { %1119 = vmax.xlane.f32.xlu0 %v2436_v9 }
 0x237   :  { %v2529_v51 = vmax.f32 %v453_v49, %v469_v24  ;;  %v335_v49 = vld [vmem:[%s3098_s3 + $0x8] sm:$0xff] }
 0x23a   :  { %1121 = vmax.xlane.f32.xlu0 %v2440_v14 }
 0x23e   :  { %1125 = vmax.xlane.f32.xlu0 %v2444_v12 }
 0x242   :  { %1129 = vmax.xlane.f32.xlu0 %v2447_v41 }
 0x257   :  { %486 = vmax.xlane.f32.xlu1 %v2454_v3 }
 0x258   :  { %1305 = vrot.lane.b32.xlu0 %v2282_v44, %s2147_s0  ;;  %v448_v44 = vadd.f32 %v2399_v13, %v2372_v23  ;;  %v439_v23 = vadd.f32 %v2399_v13, %v2325_v47  ;;  %v2501_v47 = vmax.f32 %v441_v31, %v457_v34  ;;  %v334_v13 = vld [vmem:[%s3098_s3] sm:$0xff] }
 0x259   :  { %v340_v40 = vunpack.c.2.s8 %v334_v13  ;;  %v341_v1 = vunpack.c.3.s8 %v334_v13 }
 0x25a   :  { %v464_v5 = vmul.f32 0.2, %v448_v44  ;;  %v455_v27 = vmul.f32 0.2, %v439_v23 }
 0x25b   :  { %490 = vmax.xlane.f32.xlu1 %v2461_v4 }
 0x25c   :  { %v2481_v20 = vmax.f32 %v448_v44, %v464_v5  ;;  %v2496_v32 = vmax.f32 %v439_v23, %v455_v27  ;;  %v338_v5 = vunpack.c.0.s8 %v334_v13  ;;  %v339_v23 = vunpack.c.1.s8 %v334_v13 }
 0x25e   :  { %v2544_v27 = vcvt.s32.f32 %v338_v5  ;;  %v2547_v54 = vcvt.s32.f32 %v339_v23 }
 0x25f   :  { %494 = vmax.xlane.f32.xlu1 %v2466_v55 }
 0x263   :  { %498 = vmax.xlane.f32.xlu1 %v2471_v62 }
 0x267   :  { %502 = vmax.xlane.f32.xlu1 %v2476_v57 }
 0x26b   :  { %506 = vmax.xlane.f32.xlu1 %v2481_v20 }
 0x26f   :  { %510 = vmax.xlane.f32.xlu1 %v2484_v53 }
 0x273   :  { %514 = vmax.xlane.f32.xlu1 %v2491_v61 }
 0x277   :  { %488 = vmax.xlane.f32.xlu0 %v2496_v32 }
 0x27b   :  { %492 = vmax.xlane.f32.xlu0 %v2501_v47 }
 0x27f   :  { %496 = vmax.xlane.f32.xlu0 %v2506_v37 }
 0x283   :  { %500 = vmax.xlane.f32.xlu0 %v2511_v63 }
 0x287   :  { %504 = vmax.xlane.f32.xlu0 %v2516_v43 }
 0x28b   :  { %508 = vmax.xlane.f32.xlu0 %v2521_v48 }
 0x28f   :  { %512 = vmax.xlane.f32.xlu0 %v2526_v15 }
 0x293   :  { %516 = vmax.xlane.f32.xlu0 %v2529_v51 }
 0x2a3   :  { %v1110_v26 = vpop.xlane.xlu1 %1109  ;;  %v1100_v59 = vpop.xlane.xlu0 %1099 }
 0x2a4   :  { %v1131_v18 = vsub.f32 %v2388_v0, %v1100_v59  ;;  %v1136_v0 = vsub.f32 %v2386_v60, %v1110_v26 }
 0x2a6   :  { %v1147_v39 = vmul.f32 1.442695, %v1131_v18  ;;  %v1157_v35 = vmul.f32 1.442695, %v1136_v0 }
 0x2a7   :  { %v1118_v56 = vpop.xlane.xlu1 %1117  ;;  %v1102_v52 = vpop.xlane.xlu0 %1101 }
 0x2a8   :  { %v1132_v30 = vsub.f32 %v2395_v8, %v1102_v52  ;;  %1951 = vpow2.f32 %v1147_v39  ;;  %v1140_v24 = vsub.f32 %v2393_v46, %v1118_v56  ;;  %v2558_v52 = vcvt.s32.f32 %v341_v1 }
 0x2aa   :  { %v1149_v50 = vmul.f32 1.442695, %v1132_v30  ;;  %v342_v30 = vunpack.c.0.s8 %v335_v49 }
 0x2ab   :  { %v2537_v6 = vpop.xlane.xlu1 %1123  ;;  %v1104_v11 = vpop.xlane.xlu0 %1103 }
 0x2ac   :  { %v1133_v44 = vsub.f32 %v2404_v19, %v1104_v11  ;;  %1953 = vpow2.f32 %v1149_v50  ;;  %v343_v50 = vunpack.c.1.s8 %v335_v49  ;;  %v1165_v11 = vmul.f32 1.442695, %v1140_v24 }
 0x2ad   :  { %v2565_v5 = vcvt.s32.f32 %v342_v30 }
 0x2ae   :  { %v1151_v16 = vmul.f32 1.442695, %v1133_v44 }
 0x2af   :  { %v2541_v10 = vpop.xlane.xlu1 %1127  ;;  %v1106_v28 = vpop.xlane.xlu0 %1105 }
 0x2b0   :  { %v1134_v8 = vsub.f32 %v2413_v25, %v1106_v28  ;;  %1955 = vpow2.f32 %v1151_v16  ;;  %v344_v16 = vunpack.c.2.s8 %v335_v49 }
 0x2b2   :  { %v1153_v31 = vmul.f32 1.442695, %v1134_v8  ;;  %v1952_v34 = vpop.eup %1951 }
 0x2b3   :  { %v1304_v2 = vpop.permute.xlu1 %1303  ;;  %v1108_v21 = vpop.xlane.xlu0 %1107  ;;  %v1179_v60 = vmul.f32 %v1952_v34, %v2544_v27 }
 0x2b4   :  { %v1135_v19 = vsub.f32 %v2418_v29, %v1108_v21  ;;  %1902 = vmatprep.subr.bf16.mxu0 %v1304_v2  ;;  %1957 = vpow2.f32 %v1153_v31  ;;  %v2552_v29 = vcvt.s32.f32 %v340_v40  ;;  %v1143_v31 = vsub.f32 %v2402_v17, %v2537_v6  ;;  %v336_v17 = vld [vmem:[%s3098_s3 + $0x10] sm:$0xff] }
 0x2b5   :  { %1903 = vmatpush3.bf16.msra.mxu0 %v1304_v2  ;;  %1195 = vadd.xlane.f32.xlu1 %v1179_v60  ;;  %1959 = vpow2.f32 %v1157_v35  ;;  %v345_v21 = vunpack.c.3.s8 %v335_v49  ;;  %v348_v30 = vunpack.c.2.s8 %v336_v17 }
 0x2b6   :  { %v1155_v25 = vmul.f32 1.442695, %v1135_v19  ;;  %v1954_v58 = vpop.eup %1953  ;;  %v2579_v19 = vcvt.s32.f32 %v344_v16  ;;  %v1171_v40 = vmul.f32 1.442695, %v1143_v31 }
 0x2b7   :  { %v1112_v42 = vpop.xlane.xlu0 %1111  ;;  %v1180_v45 = vmul.f32 %v1954_v58, %v2547_v54  ;;  %v2592_v1 = vcvt.s32.f32 %v345_v21 }
 0x2b8   :  { %1961 = vpow2.f32 %v1155_v25  ;;  %v1137_v7 = vsub.f32 %v2422_v33, %v1112_v42  ;;  %v1145_v25 = vsub.f32 %v2411_v22, %v2541_v10 }
 0x2b9   :  { %v1275_v26 = vpack.c.bf16 %v1180_v45, %v1179_v60  ;;  %1197 = vadd.xlane.f32.xlu0 %v1180_v45  ;;  %v346_v45 = vunpack.c.0.s8 %v336_v17 }
 0x2ba   :  { %v1159_v59 = vmul.f32 1.442695, %v1137_v7  ;;  %v1956_v18 = vpop.eup %1955  ;;  %v347_v7 = vunpack.c.1.s8 %v336_v17 }
 0x2bb   :  { %v1114_v39 = vpop.xlane.xlu0 %1113  ;;  %1906 = vmatprep.mubr.bf16.mxu0 %v1275_v26  ;;  %v2562_v13 = vmul.f32 %v1956_v18, %v2552_v29  ;;  %v1175_v26 = vmul.f32 1.442695, %v1145_v25  ;;  %v2600_v18 = vcvt.s32.f32 %v346_v45 }
 0x2bc   :  { %1963 = vpow2.f32 %v1159_v59  ;;  %v1138_v33 = vsub.f32 %v2426_v36, %v1114_v39  ;;  %v2571_v36 = vcvt.s32.f32 %v343_v50  ;;  %v2602_v39 = vcvt.s32.f32 %v347_v7 }
 0x2bd   :  { %1199 = vadd.xlane.f32.xlu1 %v2562_v13 }
 0x2be   :  { %v1161_v44 = vmul.f32 1.442695, %v1138_v33  ;;  %v1958_v46 = vpop.eup %1957  ;;  %v337_v33 = vld [vmem:[%s3098_s3 + $0x18] sm:$0xff] }
 0x2bf   :  { %v1116_v56 = vpop.xlane.xlu0 %1115  ;;  %v2568_v0 = vmul.f32 %v1958_v46, %v2558_v52  ;;  %v1960_v8 = vpop.eup %1959  ;;  %v350_v46 = vunpack.c.0.s8 %v337_v33 }
 0x2c0   :  { %1965 = vpow2.f32 %v1161_v44  ;;  %v1139_v28 = vsub.f32 %v2430_v38, %v1116_v56  ;;  %v2583_v60 = vmul.f32 %v1960_v8, %v2571_v36  ;;  %v349_v8 = vunpack.c.3.s8 %v336_v17 }
 0x2c1   :  { %1967 = vpow2.f32 %v1165_v11  ;;  %1201 = vadd.xlane.f32.xlu0 %v2568_v0  ;;  %v2616_v25 = vcvt.s32.f32 %v350_v46 }
 0x2c2   :  { %v1962_v23 = vpop.eup %1961  ;;  %v1163_v34 = vmul.f32 1.442695, %v1139_v28 }
 0x2c3   :  { %v1120_v35 = vpop.xlane.xlu0 %1119  ;;  %v2577_v2 = vmul.f32 %v1962_v23, %v2565_v5  ;;  %v2610_v23 = vcvt.s32.f32 %v348_v30 }
 0x2c4   :  { %1969 = vpow2.f32 %v1163_v34  ;;  %v1141_v38 = vsub.f32 %v2436_v9, %v1120_v35  ;;  %v352_v35 = vunpack.c.2.s8 %v337_v33 }
 0x2c5   :  { %1203 = vadd.xlane.f32.xlu1 %v2577_v2  ;;  %1205 = vadd.xlane.f32.xlu0 %v2583_v60 }
 0x2c6   :  { %v1964_v6 = vpop.eup %1963  ;;  %v1167_v58 = vmul.f32 1.442695, %v1141_v38  ;;  %v2613_v38 = vcvt.s32.f32 %v349_v8  ;;  %v2638_v8 = vld [vmem:[%s3099_s2] ss:$0 sm:$0xff] }
 0x2c7   :  { %v1122_v42 = vpop.xlane.xlu0 %1121  ;;  %v2595_v9 = vmul.f32 %v1964_v6, %v2579_v19 }
 0x2c8   :  { %1971 = vpow2.f32 %v1167_v58  ;;  %v1142_v49 = vsub.f32 %v2440_v14, %v1122_v42  ;;  %v2620_v42 = vcvt.s32.f32 %v352_v35 }
 0x2c9   :  { %1207 = vadd.xlane.f32.xlu1 %v2595_v9  ;;  %1973 = vpow2.f32 %v1171_v40  ;;  %v351_v40 = vunpack.c.1.s8 %v337_v33 }
 0x2ca   :  { %v1966_v24 = vpop.eup %1965  ;;  %v1169_v22 = vmul.f32 1.442695, %v1142_v49 }
 0x2cb   :  { %v1186_v10 = vmul.f32 %v1966_v24, %v2592_v1  ;;  %v1126_v59 = vpop.xlane.xlu0 %1125  ;;  %v1968_v50 = vpop.eup %1967  ;;  %v2623_v7 = vcvt.s32.f32 %v351_v40  ;;  %v353_v24 = vunpack.c.3.s8 %v337_v33 }
 0x2cc   :  { %1975 = vpow2.f32 %v1169_v22  ;;  %v1144_v14 = vsub.f32 %v2444_v12, %v1126_v59  ;;  %v1188_v28 = vmul.f32 %v1968_v50, %v2602_v39  ;;  %v1277_v22 = vpack.c.bf16 %v2583_v60, %v2577_v2 }
 0x2cd   :  { %1209 = vadd.xlane.f32.xlu0 %v1186_v10  ;;  %1977 = vpow2.f32 %v1175_v26  ;;  %v1278_v33 = vpack.c.bf16 %v1186_v10, %v2595_v9 }
 0x2ce   :  { %v1970_v11 = vpop.eup %1969  ;;  %v1173_v44 = vmul.f32 1.442695, %v1144_v14 }
 0x2cf   :  { %v1130_v56 = vpop.xlane.xlu0 %1129  ;;  %v1187_v16 = vmul.f32 %v1970_v11, %v2600_v18 }
 0x2d0   :  { %1979 = vpow2.f32 %v1173_v44  ;;  %v1146_v31 = vsub.f32 %v2447_v41, %v1130_v56  ;;  %v1276_v41 = vpack.c.bf16 %v2568_v0, %v2562_v13  ;;  %v2629_v0 = vcvt.s32.f32 %v353_v24 }
 0x2d1   :  { %1211 = vadd.xlane.f32.xlu1 %v1187_v16  ;;  %1213 = vadd.xlane.f32.xlu0 %v1188_v28  ;;  %v1279_v14 = vpack.c.bf16 %v1188_v28, %v1187_v16 }
 0x2d2   :  { %v1972_v34 = vpop.eup %1971  ;;  %v1177_v12 = vmul.f32 1.442695, %v1146_v31 }
 0x2d3   :  { %v1306_v21 = vpop.permute.xlu0 %1305  ;;  %v1189_v6 = vmul.f32 %v1972_v34, %v2610_v23  ;;  %v1974_v58 = vpop.eup %1973 }
 0x2d4   :  { %1981 = vpow2.f32 %v1177_v12  ;;  %1904 = vmatprep.subr.bf16.mxu0 %v1306_v21  ;;  %v1191_v49 = vmul.f32 %v1974_v58, %v2616_v25 }
 0x2d5   :  { %1215 = vadd.xlane.f32.xlu1 %v1189_v6  ;;  %1905 = vmatpush3.bf16.msra.mxu0 %v1306_v21 }
 0x2d6   :  { %v1976_v17 = vpop.eup %1975 }
 0x2d7   :  { %v1190_v45 = vmul.f32 %v1976_v17, %v2613_v38  ;;  %v1978_v26 = vpop.eup %1977 }
 0x2d8   :  { %1907 = vmatmul.mubr.bf16.vlgmr.msra.gmra.mrb[16].mxu0 %v1276_v41  ;;  %v1193_v30 = vmul.f32 %v1978_v26, %v2620_v42 }
 0x2d9   :  { %1219 = vadd.xlane.f32.xlu1 %v1191_v49  ;;  %1217 = vadd.xlane.f32.xlu0 %v1190_v45  ;;  %v1280_v44 = vpack.c.bf16 %v1190_v45, %v1189_v6 }
 0x2da   :  { %v1980_v59 = vpop.eup %1979  ;;  %1910 = vmatprep.mubr.bf16.mxu0 %v1277_v22 }
 0x2db   :  { %v1192_v13 = vmul.f32 %v1980_v59, %v2623_v7 }
 0x2dd   :  { %1223 = vadd.xlane.f32.xlu1 %v1193_v30  ;;  %1221 = vadd.xlane.f32.xlu0 %v1192_v13  ;;  %v1281_v46 = vpack.c.bf16 %v1192_v13, %v1191_v49 }
 0x2de   :  { %v1982_v50 = vpop.eup %1981 }
 0x2df   :  { %v1194_v11 = vmul.f32 %v1982_v50, %v2629_v0 }
 0x2e0   :  { %1911 = vmatmul.mubr.bf16.gmra.mrb[20].mxu0 %v1278_v33 }
 0x2e1   :  { %1225 = vadd.xlane.f32.xlu0 %v1194_v11  ;;  %1914 = vmatprep.mubr.bf16.mxu0 %v1279_v14  ;;  %v1282_v9 = vpack.c.bf16 %v1194_v11, %v1193_v30 }
 0x2e4   :  { %v487_v2 = vpop.xlane.xlu1 %486 }
 0x2e5   :  { %v518_v60 = vsub.f32 %v2454_v3, %v487_v2 }
 0x2e7   :  { %v534_v56 = vmul.f32 1.442695, %v518_v60 }
 0x2e8   :  { %1915 = vmatmul.mubr.bf16.gmra.mrb[24].mxu0 %v1280_v44  ;;  %v491_v16 = vpop.xlane.xlu1 %490 }
 0x2e9   :  { %1983 = vpow2.f32 %v534_v56  ;;  %1918 = vmatprep.mubr.bf16.mxu0 %v1281_v46  ;;  %v520_v34 = vsub.f32 %v2461_v4, %v491_v16 }
 0x2eb   :  { %v538_v6 = vmul.f32 1.442695, %v520_v34 }
 0x2ec   :  { %v495_v28 = vpop.xlane.xlu1 %494 }
 0x2ed   :  { %v522_v40 = vsub.f32 %v2466_v55, %v495_v28 }
 0x2ee   :  { %1434 = vrot.lane.b32.xlu1 %v2638_v8, %s2147_s0 }
 0x2ef   :  { %v542_v45 = vmul.f32 1.442695, %v522_v40 }
 0x2f0   :  { %1919 = vmatmul.mubr.bf16.gmra.mrb[28].mxu0 %v1282_v9  ;;  %v499_v31 = vpop.xlane.xlu1 %498 }
 0x2f3   :  { %v1984_v10 = vpop.eup %1983 }
 0x2f4   :  { %v566_v3 = vmul.f32 %v1984_v10, %v2544_v27  ;;  %v503_v21 = vpop.xlane.xlu1 %502  ;;  %v524_v27 = vsub.f32 %v2471_v62, %v499_v31 }
 0x2f5   :  { %v526_v22 = vsub.f32 %v2476_v57, %v503_v21 }
 0x2f6   :  { %582 = vadd.xlane.f32.xlu0 %v566_v3 }
 0x2f7   :  { %v550_v50 = vmul.f32 1.442695, %v526_v22 }
 0x2f8   :  { %v507_v24 = vpop.xlane.xlu1 %506 }
 0x2f9   :  { %v528_v62 = vsub.f32 %v2481_v20, %v507_v24 }
 0x2fb   :  { %v554_v44 = vmul.f32 1.442695, %v528_v62 }
 0x304   :  { %v489_v12 = vpop.xlane.xlu0 %488 }
 0x305   :  { %v519_v35 = vsub.f32 %v2496_v32, %v489_v12  ;;  %v546_v32 = vmul.f32 1.442695, %v524_v27 }
 0x307   :  { %v536_v58 = vmul.f32 1.442695, %v519_v35 }
 0x308   :  { %v493_v17 = vpop.xlane.xlu0 %492 }
 0x309   :  { %1985 = vpow2.f32 %v536_v58  ;;  %v521_v41 = vsub.f32 %v2501_v47, %v493_v17  ;;  %v511_v47 = vpop.xlane.xlu1 %510 }
 0x30a   :  { %1987 = vpow2.f32 %v538_v6 }
 0x30b   :  { %v540_v49 = vmul.f32 1.442695, %v521_v41 }
 0x30c   :  { %v497_v26 = vpop.xlane.xlu0 %496 }
 0x30d   :  { %1989 = vpow2.f32 %v540_v49  ;;  %v523_v4 = vsub.f32 %v2506_v37, %v497_v26  ;;  %v515_v56 = vpop.xlane.xlu1 %514 }
 0x30e   :  { %1991 = vpow2.f32 %v542_v45  ;;  %v532_v31 = vsub.f32 %v2491_v61, %v515_v56 }
 0x30f   :  { %v544_v55 = vmul.f32 1.442695, %v523_v4 }
 0x310   :  { %v501_v59 = vpop.xlane.xlu0 %500  ;;  %v562_v6 = vmul.f32 1.442695, %v532_v31 }
 0x311   :  { %1993 = vpow2.f32 %v544_v55  ;;  %v525_v13 = vsub.f32 %v2511_v63, %v501_v59  ;;  %v530_v63 = vsub.f32 %v2484_v53, %v511_v47 }
 0x312   :  { %1995 = vpow2.f32 %v546_v32 }
 0x313   :  { %v1986_v30 = vpop.eup %1985  ;;  %v548_v33 = vmul.f32 1.442695, %v525_v13  ;;  %v558_v28 = vmul.f32 1.442695, %v530_v63 }
 0x314   :  { %v505_v14 = vpop.xlane.xlu0 %504  ;;  %v567_v11 = vmul.f32 %v1986_v30, %v2547_v54  ;;  %v1988_v37 = vpop.eup %1987 }
 0x315   :  { %1997 = vpow2.f32 %v548_v33  ;;  %v527_v2 = vsub.f32 %v2516_v43, %v505_v14  ;;  %v568_v20 = vmul.f32 %v1988_v37, %v2552_v29 }
 0x316   :  { %584 = vadd.xlane.f32.xlu0 %v567_v11  ;;  %v662_v57 = vpack.c.bf16 %v567_v11, %v566_v3  ;;  %1999 = vpow2.f32 %v550_v50 }
 0x317   :  { %v1990_v60 = vpop.eup %1989  ;;  %v552_v46 = vmul.f32 1.442695, %v527_v2 }
 0x318   :  { %1874 = vmatprep.mubr.bf16.mxu1 %v662_v57  ;;  %v509_v9 = vpop.xlane.xlu0 %508  ;;  %v569_v10 = vmul.f32 %v1990_v60, %v2558_v52  ;;  %v1992_v54 = vpop.eup %1991 }
 0x319   :  { %2001 = vpow2.f32 %v552_v46  ;;  %v529_v16 = vsub.f32 %v2521_v48, %v509_v9  ;;  %v570_v12 = vmul.f32 %v1992_v54, %v2565_v5 }
 0x31a   :  { %586 = vadd.xlane.f32.xlu0 %v568_v20  ;;  %v663_v43 = vpack.c.bf16 %v569_v10, %v568_v20  ;;  %2003 = vpow2.f32 %v554_v44 }
 0x31b   :  { %v1994_v3 = vpop.eup %1993  ;;  %v556_v53 = vmul.f32 1.442695, %v529_v16 }
 0x31c   :  { %v513_v34 = vpop.xlane.xlu0 %512  ;;  %1875 = vmatmul.mubr.bf16.vlgmr.msra.gmra.mrb[0].mxu1 %v663_v43  ;;  %v571_v29 = vmul.f32 %v1994_v3, %v2571_v36  ;;  %v1996_v35 = vpop.eup %1995 }
 0x31d   :  { %2005 = vpow2.f32 %v556_v53  ;;  %v531_v52 = vsub.f32 %v2526_v15, %v513_v34  ;;  %v572_v61 = vmul.f32 %v1996_v35, %v2579_v19 }
 0x31e   :  { %588 = vadd.xlane.f32.xlu0 %v569_v10  ;;  %592 = vadd.xlane.f32.xlu1 %v571_v29  ;;  %v664_v48 = vpack.c.bf16 %v571_v29, %v570_v12  ;;  %2007 = vpow2.f32 %v558_v28 }
 0x31f   :  { %v1998_v21 = vpop.eup %1997  ;;  %v560_v40 = vmul.f32 1.442695, %v531_v52 }
 0x320   :  { %v517_v58 = vpop.xlane.xlu0 %516  ;;  %1878 = vmatprep.mubr.bf16.mxu1 %v664_v48  ;;  %v573_v17 = vmul.f32 %v1998_v21, %v2592_v1  ;;  %v2000_v5 = vpop.eup %1999 }
 0x321   :  { %2009 = vpow2.f32 %v560_v40  ;;  %v533_v36 = vsub.f32 %v2529_v51, %v517_v58  ;;  %v574_v27 = vmul.f32 %v2000_v5, %v2600_v18 }
 0x322   :  { %590 = vadd.xlane.f32.xlu0 %v570_v12  ;;  %v665_v41 = vpack.c.bf16 %v573_v17, %v572_v61  ;;  %2011 = vpow2.f32 %v562_v6 }
 0x323   :  { %v2002_v15 = vpop.eup %2001  ;;  %v564_v45 = vmul.f32 1.442695, %v533_v36 }
 0x324   :  { %1879 = vmatmul.mubr.bf16.gmra.mrb[4].mxu1 %v665_v41  ;;  %v575_v49 = vmul.f32 %v2002_v15, %v2602_v39  ;;  %v2004_v24 = vpop.eup %2003 }
 0x325   :  { %2013 = vpow2.f32 %v564_v45  ;;  %v576_v1 = vmul.f32 %v2004_v24, %v2610_v23 }
 0x326   :  { %594 = vadd.xlane.f32.xlu0 %v572_v61  ;;  %v666_v19 = vpack.c.bf16 %v575_v49, %v574_v27 }
 0x327   :  { %v2006_v26 = vpop.eup %2005 }
 0x328   :  { %1882 = vmatprep.mubr.bf16.mxu1 %v666_v19  ;;  %v577_v51 = vmul.f32 %v2006_v26, %v2613_v38  ;;  %v2008_v4 = vpop.eup %2007 }
 0x329   :  { %v578_v55 = vmul.f32 %v2008_v4, %v2616_v25 }
 0x32a   :  { %596 = vadd.xlane.f32.xlu0 %v573_v17  ;;  %v667_v32 = vpack.c.bf16 %v577_v51, %v576_v1 }
 0x32b   :  { %v2010_v22 = vpop.eup %2009 }
 0x32c   :  { %1883 = vmatmul.mubr.bf16.gmra.mrb[8].mxu1 %v667_v32  ;;  %v579_v18 = vmul.f32 %v2010_v22, %v2623_v7  ;;  %v2012_v39 = vpop.eup %2011 }
 0x32d   :  { %v580_v47 = vmul.f32 %v2012_v39, %v2620_v42 }
 0x32e   :  { %598 = vadd.xlane.f32.xlu0 %v574_v27  ;;  %v668_v59 = vpack.c.bf16 %v579_v18, %v578_v55 }
 0x32f   :  { %v2014_v13 = vpop.eup %2013 }
 0x330   :  { %1886 = vmatprep.mubr.bf16.mxu1 %v668_v59  ;;  %v581_v23 = vmul.f32 %v2014_v13, %v2629_v0 }
 0x332   :  { %600 = vadd.xlane.f32.xlu0 %v575_v49  ;;  %612 = vadd.xlane.f32.xlu1 %v581_v23  ;;  %v669_v38 = vpack.c.bf16 %v581_v23, %v580_v47 }
 0x334   :  { %1887 = vmatmul.mubr.bf16.gmra.mrb[12].mxu1 %v669_v38 }
 0x336   :  { %602 = vadd.xlane.f32.xlu0 %v576_v1 }
 0x33a   :  { %604 = vadd.xlane.f32.xlu0 %v577_v51 }
 0x33e   :  { %606 = vadd.xlane.f32.xlu0 %v578_v55 }
 0x342   :  { %608 = vadd.xlane.f32.xlu0 %v579_v18  ;;  %v1196_v7 = vpop.xlane.xlu1 %1195 }
 0x343   :  { %vm1227_vm2 = vcmp.gt.f32.partialorder %v1196_v7, 0.0 }
 0x344   :  { %v1243_v60 = vsel %vm1227_vm2, %v1196_v7, 1.0 }
 0x346   :  { %610 = vadd.xlane.f32.xlu0 %v580_v47  ;;  %v1198_v25 = vpop.xlane.xlu0 %1197 }
 0x347   :  { %vm1228_vm6 = vcmp.gt.f32.partialorder %v1198_v25, 0.0 }
 0x348   :  { %v1244_v10 = vsel %vm1228_vm6, %v1198_v25, 1.0 }
 0x34a   :  { %v1200_v50 = vpop.xlane.xlu1 %1199 }
 0x34b   :  { %vm1229_vm1 = vcmp.gt.f32.partialorder %v1200_v50, 0.0 }
 0x34c   :  { %v1245_v57 = vsel %vm1229_vm1, %v1200_v50, 1.0 }
 0x34d   :  { %2015 = vrcp.f32 %v1245_v57 }
 0x34e   :  { %v1202_v30 = vpop.xlane.xlu0 %1201  ;;  %2017 = vrcp.f32 %v1243_v60 }
 0x34f   :  { %vm1230_vm3 = vcmp.gt.f32.partialorder %v1202_v30, 0.0 }
 0x350   :  { %v1246_v46 = vsel %vm1230_vm3, %v1202_v30, 1.0 }
 0x351   :  { %2019 = vrcp.f32 %v1246_v46 }
 0x352   :  { %v1206_v62 = vpop.xlane.xlu0 %1205  ;;  %v1204_v33 = vpop.xlane.xlu1 %1203 }
 0x353   :  { %vm1231_vm5 = vcmp.gt.f32.partialorder %v1204_v33, 0.0  ;;  %vm1232_vm8 = vcmp.gt.f32.partialorder %v1206_v62, 0.0 }
 0x354   :  { %v1247_v20 = vsel %vm1231_vm5, %v1204_v33, 1.0  ;;  %v1248_v53 = vsel %vm1232_vm8, %v1206_v62, 1.0 }
 0x356   :  { %v1208_v11 = vpop.xlane.xlu1 %1207 }
 0x357   :  { %vm1233_vm4 = vcmp.gt.f32.partialorder %v1208_v11, 0.0  ;;  %v2016_v3 = vpop.eup %2015 }
 0x358   :  { %v1249_v9 = vsel %vm1233_vm4, %v1208_v11, 1.0  ;;  %v2018_v31 = vpop.eup %2017 }
 0x359   :  { %2021 = vrcp.f32 %v1249_v9 }
 0x35a   :  { %v1210_v14 = vpop.xlane.xlu0 %1209  ;;  %2023 = vrcp.f32 %v1247_v20 }
 0x35b   :  { %vm1234_vm7 = vcmp.gt.f32.partialorder %v1210_v14, 0.0  ;;  %2025 = vrcp.f32 %v1244_v10  ;;  %v2020_v17 = vpop.eup %2019 }
 0x35c   :  { %v1250_v43 = vsel %vm1234_vm7, %v1210_v14, 1.0 }
 0x35d   :  { %2027 = vrcp.f32 %v1250_v43 }
 0x35e   :  { %v1214_v42 = vpop.xlane.xlu0 %1213  ;;  %v1212_v37 = vpop.xlane.xlu1 %1211  ;;  %2029 = vrcp.f32 %v1248_v53 }
 0x35f   :  { %vm1235_vm10 = vcmp.gt.f32.partialorder %v1212_v37, 0.0  ;;  %vm1236_vm12 = vcmp.gt.f32.partialorder %v1214_v42, 0.0 }
 0x360   :  { %v1251_v58 = vsel %vm1235_vm10, %v1212_v37, 1.0  ;;  %v1252_v27 = vsel %vm1236_vm12, %v1214_v42, 1.0 }
 0x362   :  { %v1216_v2 = vpop.xlane.xlu1 %1215 }
 0x363   :  { %vm1237_vm9 = vcmp.gt.f32.partialorder %v1216_v2, 0.0  ;;  %v2022_v45 = vpop.eup %2021 }
 0x364   :  { %v1253_v35 = vsel %vm1237_vm9, %v1216_v2, 1.0  ;;  %v2024_v26 = vpop.eup %2023 }
 0x365   :  { %2031 = vrcp.f32 %v1253_v35  ;;  %v2026_v4 = vpop.eup %2025 }
 0x366   :  { %v1218_v0 = vpop.xlane.xlu0 %1217  ;;  %v2675_v63 = vpop.xlane.xlu1 %1219  ;;  %2033 = vrcp.f32 %v1251_v58 }
 0x367   :  { %vm1238_vm11 = vcmp.gt.f32.partialorder %v1218_v0, 0.0  ;;  %vm1239_vm13 = vcmp.gt.f32.partialorder %v2675_v63, 0.0  ;;  %v2028_v47 = vpop.eup %2027 }
 0x368   :  { %v1254_v5 = vsel %vm1238_vm11, %v1218_v0, 1.0  ;;  %v1255_v25 = vsel %vm1239_vm13, %v2675_v63, 1.0  ;;  %v2030_v50 = vpop.eup %2029 }
 0x369   :  { %2035 = vrcp.f32 %v1254_v5 }
 0x36a   :  { %v2673_v44 = vpop.xlane.xlu0 %1221  ;;  %v1224_v54 = vpop.xlane.xlu1 %1223 }
 0x36b   :  { %vm1241_vm14 = vcmp.gt.f32.partialorder %v1224_v54, 0.0  ;;  %vm1240_vm15 = vcmp.gt.f32.partialorder %v2673_v44, 0.0 }
 0x36c   :  { %v1257_v23 = vsel %vm1241_vm14, %v1224_v54, 1.0  ;;  %v1256_v20 = vsel %vm1240_vm15, %v2673_v44, 1.0 }
 0x36e   :  { %v2677_v56 = vpop.xlane.xlu0 %1225  ;;  %v2681_v34 = vpop.permute.xlu1 %1434 }
 0x36f   :  { %v2032_v11 = vpop.eup %2031  ;;  %vm1242_vm0 = vcmp.gt.f32.partialorder %v2677_v56, 0.0 }
 0x370   :  { %v2034_v60 = vpop.eup %2033 }
 0x383   :  { %v2679_v16 = vpop.xlane.xlu0 %582 }
 0x384   :  { %vm614_vm14 = vcmp.gt.f32.partialorder %v2679_v16, 0.0 }
 0x3a3   :  { %v2683_v52 = vpop.xlane.xlu0 %584 }
 0x3a7   :  { %v2693_v49 = vpop.xlane.xlu0 %586 }
 0x3a8   :  { %vm616_vm13 = vcmp.gt.f32.partialorder %v2693_v49, 0.0 }
 0x3ab   :  { %v1908_v28 = vpop.f32.mrb[16].mxu0  ;;  %v2709_v62 = vpop.xlane.xlu0 %588 }
 0x3ac   :  { %v1414_v12 = vmul.f32 %v2016_v3, %v1908_v28  ;;  %v1349_v29 = vpop.f32.mrb[17].mxu0  ;;  %v2036_v3 = vpop.eup %2035 }
 0x3ad   :  { %v1412_v48 = vmul.f32 %v2018_v31, %v1349_v29  ;;  %v1909_v21 = vpop.f32.mrb[18].mxu0  ;;  %v1258_v29 = vsel %vm1242_vm0, %v2677_v56, 1.0  ;;  %vm617_vm0 = vcmp.gt.f32.partialorder %v2709_v62, 0.0 }
 0x3ae   :  { %v2686_v6 = vadd.f32 %v2681_v34, %v1414_v12  ;;  %v1352_v40 = vpop.f32.mrb[19].mxu0  ;;  %v1415_v15 = vmul.f32 %v2020_v17, %v1909_v21 }
 0x3af   :  { %v2689_v61 = vadd.f32 %v2681_v34, %v1412_v48  ;;  %v1413_v39 = vmul.f32 %v2026_v4, %v1352_v40  ;;  %v2727_v35 = vpop.xlane.xlu0 %590 }
 0x3b0   :  { %v1471_v36 = vmin.f32 %v2686_v6, 0.0  ;;  %v2697_v22 = vadd.f32 %v2681_v34, %v1415_v15  ;;  %vm1455_vm3 = vcmp.gt.f32.partialorder %v2686_v6, 0.0 }
 0x3b1   :  { %v1469_v41 = vmin.f32 %v2689_v61, 0.0  ;;  %v2715_v42 = vadd.f32 %v2681_v34, %v1413_v39  ;;  %vm1453_vm1 = vcmp.gt.f32.partialorder %v2689_v61, 0.0 }
 0x3b2   :  { %v1489_v32 = vmul.f32 1.442695, %v1471_v36  ;;  %v1472_v33 = vmin.f32 %v2697_v22, 0.0  ;;  %vm1456_vm5 = vcmp.gt.f32.partialorder %v2697_v22, 0.0 }
 0x3b3   :  { %v1485_v24 = vmul.f32 1.442695, %v1469_v41  ;;  %v1912_v19 = vpop.f32.mrb[20].mxu0  ;;  %v1470_v28 = vmin.f32 %v2715_v42, 0.0  ;;  %v2744_v39 = vpop.xlane.xlu0 %594  ;;  %vm1454_vm8 = vcmp.gt.f32.partialorder %v2715_v42, 0.0 }
 0x3b4   :  { %v1418_v1 = vmul.f32 %v2022_v45, %v1912_v19  ;;  %v1365_v51 = vpop.f32.mrb[21].mxu0  ;;  %v1491_v10 = vmul.f32 1.442695, %v1472_v33 }
 0x3b5   :  { %2037 = vpow2.f32 %v1485_v24  ;;  %v1416_v55 = vmul.f32 %v2024_v26, %v1365_v51  ;;  %v1913_v18 = vpop.f32.mrb[22].mxu0  ;;  %v1487_v41 = vmul.f32 1.442695, %v1470_v28 }
 0x3b6   :  { %v2700_v59 = vadd.f32 %v2681_v34, %v1418_v1  ;;  %v1368_v13 = vpop.f32.mrb[23].mxu0  ;;  %2039 = vrcp.f32 %v1252_v27  ;;  %v1419_v30 = vmul.f32 %v2028_v47, %v1913_v18 }
 0x3b7   :  { %v2703_v38 = vadd.f32 %v2681_v34, %v1416_v55  ;;  %2041 = vpow2.f32 %v1489_v32  ;;  %v1417_v2 = vmul.f32 %v2030_v50, %v1368_v13 }
 0x3b8   :  { %v1475_v7 = vmin.f32 %v2700_v59, 0.0  ;;  %2043 = vrcp.f32 %v1257_v23  ;;  %v2719_v63 = vadd.f32 %v2681_v34, %v1419_v30  ;;  %vm1459_vm2 = vcmp.gt.f32.partialorder %v2700_v59, 0.0 }
 0x3b9   :  { %v1473_v14 = vmin.f32 %v2703_v38, 0.0  ;;  %2045 = vrcp.f32 %v1255_v25  ;;  %v2730_v48 = vadd.f32 %v2681_v34, %v1417_v2  ;;  %vm1457_vm4 = vcmp.gt.f32.partialorder %v2703_v38, 0.0 }
 0x3ba   :  { %v1497_v37 = vmul.f32 1.442695, %v1475_v7  ;;  %v1476_v58 = vmin.f32 %v2719_v63, 0.0  ;;  %vm1460_vm9 = vcmp.gt.f32.partialorder %v2719_v63, 0.0 }
 0x3bb   :  { %v1493_v0 = vmul.f32 1.442695, %v1473_v14  ;;  %v1916_v57 = vpop.f32.mrb[24].mxu0  ;;  %v1474_v24 = vmin.f32 %v2730_v48, 0.0  ;;  %vm1458_vm10 = vcmp.gt.f32.partialorder %v2730_v48, 0.0 }
 0x3bc   :  { %2047 = vpow2.f32 %v1497_v37  ;;  %v1422_v46 = vmul.f32 %v2032_v11, %v1916_v57  ;;  %v1381_v9 = vpop.f32.mrb[25].mxu0  ;;  %v1499_v4 = vmul.f32 1.442695, %v1476_v58 }
 0x3bd   :  { %2049 = vpow2.f32 %v1493_v0  ;;  %v1420_v54 = vmul.f32 %v2034_v60, %v1381_v9  ;;  %v1917_v43 = vpop.f32.mrb[26].mxu0  ;;  %v1495_v33 = vmul.f32 1.442695, %v1474_v24 }
 0x3be   :  { %v2724_v31 = vadd.f32 %v2681_v34, %v1422_v46  ;;  %v1384_v53 = vpop.f32.mrb[27].mxu0  ;;  %v1423_v21 = vmul.f32 %v2036_v3, %v1917_v43  ;;  %2051 = vrcp.f32 %v1256_v20  ;;  %v2764_v43 = vpop.xlane.xlu0 %596 }
 0x3bf   :  { %v2038_v12 = vpop.eup %2037  ;;  %v2733_v44 = vadd.f32 %v2681_v34, %v1420_v54  ;;  %2053 = vpow2.f32 %v1491_v10 }
 0x3c0   :  { %v1716_v40 = vadd.f32 -1.0, %v2038_v12  ;;  %v1479_v17 = vmin.f32 %v2724_v31, 0.0  ;;  %v2040_v5 = vpop.eup %2039  ;;  %2055 = vrcp.f32 %v1258_v29  ;;  %v2742_v26 = vadd.f32 %v2681_v34, %v1423_v21 }
 0x3c1   :  { %v1477_v56 = vmin.f32 %v2733_v44, 0.0  ;;  %v2042_v45 = vpop.eup %2041  ;;  %v1421_v32 = vmul.f32 %v2040_v5, %v1384_v53  ;;  %vm1463_vm6 = vcmp.gt.f32.partialorder %v2724_v31, 0.0  ;;  %vm1461_vm7 = vcmp.gt.f32.partialorder %v2733_v44, 0.0 }
 0x3c2   :  { %v1533_v36 = vsel %vm1453_vm1, %v2689_v61, %v1716_v40  ;;  %v1505_v15 = vmul.f32 1.442695, %v1479_v17  ;;  %v2044_v51 = vpop.eup %2043  ;;  %v1718_v25 = vadd.f32 -1.0, %v2042_v45  ;;  %v1480_v14 = vmin.f32 %v2742_v26, 0.0 }
 0x3c3   :  { %v1764_v27 = vpack.c.bf16 %v1533_v36, %v1533_v36  ;;  %v1501_v19 = vmul.f32 1.442695, %v1477_v56  ;;  %v1920_v1 = vpop.f32.mrb[28].mxu0  ;;  %v2046_v18 = vpop.eup %2045  ;;  %v2753_v0 = vadd.f32 %v2681_v34, %v1421_v32  ;;  %vm1464_vm15 = vcmp.gt.f32.partialorder %v2742_v26, 0.0 }
 0x3c4   :  { %2057 = vpow2.f32 %v1505_v15  ;;  %v1397_v55 = vpop.f32.mrb[29].mxu0  ;;  %v1426_v61 = vmul.f32 %v2044_v51, %v1920_v1  ;;  %v1535_v20 = vsel %vm1455_vm3, %v2686_v6, %v1718_v25  ;;  %v1507_v3 = vmul.f32 1.442695, %v1480_v14 }
 0x3c5   :  { %2059 = vpow2.f32 %v1501_v19  ;;  %v1921_v13 = vpop.f32.mrb[30].mxu0  ;;  %1597 = vrot.lane.b32.xlu0 %v1764_v27, %s2148_s7  ;;  %v1424_v23 = vmul.f32 %v2046_v18, %v1397_v55  ;;  %v1766_v29 = vpack.c.bf16 %v1535_v20, %v1535_v20  ;;  %v2780_v19 = vpop.xlane.xlu0 %598  ;;  %vm615_vm1 = vcmp.gt.f32.partialorder %v2683_v52, 0.0 }
 0x3c6   :  { %v2048_v47 = vpop.eup %2047  ;;  %2061 = vpow2.f32 %v1487_v41  ;;  %v1400_v7 = vpop.f32.mrb[31].mxu0  ;;  %v2750_v11 = vadd.f32 %v2681_v34, %v1426_v61 }
 0x3c7   :  { %v2050_v30 = vpop.eup %2049  ;;  %v1722_v50 = vadd.f32 -1.0, %v2048_v47  ;;  %2063 = vpow2.f32 %v1499_v4  ;;  %v2756_v2 = vadd.f32 %v2681_v34, %v1424_v23  ;;  %1601 = vrot.lane.b32.xlu1 %v1766_v29, %s2148_s7 }
 0x3c8   :  { %v1720_v37 = vadd.f32 -1.0, %v2050_v30  ;;  %v2052_v60 = vpop.eup %2051  ;;  %v1483_v9 = vmin.f32 %v2750_v11, 0.0  ;;  %2065 = vpow2.f32 %v1495_v33  ;;  %vm1467_vm12 = vcmp.gt.f32.partialorder %v2750_v11, 0.0 }
 0x3c9   :  { %v1539_v57 = vsel %vm1459_vm2, %v2700_v59, %v1722_v50  ;;  %v2054_v10 = vpop.eup %2053  ;;  %v1478_v59 = vmin.f32 %v2753_v0, 0.0  ;;  %v1481_v12 = vmin.f32 %v2756_v2, 0.0  ;;  %v1425_v40 = vmul.f32 %v2052_v60, %v1400_v7 }
 0x3ca   :  { %v1770_v46 = vpack.c.bf16 %v1539_v57, %v1539_v57  ;;  %v1537_v54 = vsel %vm1457_vm4, %v2703_v38, %v1720_v37  ;;  %v2056_v28 = vpop.eup %2055  ;;  %v1513_v53 = vmul.f32 1.442695, %v1483_v9  ;;  %v1719_v17 = vadd.f32 -1.0, %v2054_v10 }
 0x3cb   :  { %v1427_v21 = vmul.f32 %v2056_v28, %v1921_v13  ;;  %v1768_v58 = vpack.c.bf16 %v1537_v54, %v1537_v54  ;;  %v1509_v38 = vmul.f32 1.442695, %v1481_v12  ;;  %v2773_v36 = vadd.f32 %v2681_v34, %v1425_v40 }
 0x3cc   :  { %1609 = vrot.lane.b32.xlu0 %v1770_v46, %s2148_s7  ;;  %2067 = vpow2.f32 %v1513_v53  ;;  %v1503_v45 = vmul.f32 1.442695, %v1478_v59  ;;  %v1536_v1 = vsel %vm1456_vm5, %v2697_v22, %v1719_v17  ;;  %v2792_v22 = vpop.xlane.xlu0 %600  ;;  %vm1465_vm11 = vcmp.gt.f32.partialorder %v2756_v2, 0.0 }
 0x3cd   :  { %2069 = vpow2.f32 %v1507_v3  ;;  %v2776_v27 = vadd.f32 %v2681_v34, %v1427_v21  ;;  %v1482_v32 = vmin.f32 %v2773_v36, 0.0  ;;  %v1767_v61 = vpack.c.bf16 %v1536_v1, %v1536_v1 }
 0x3ce   :  { %v2058_v6 = vpop.eup %2057  ;;  %2071 = vpow2.f32 %v1509_v38  ;;  %v632_v53 = vsel %vm616_vm13, %v2693_v49, 1.0  ;;  %v633_v40 = vsel %vm617_vm0, %v2709_v62, 1.0  ;;  %vm1462_vm2 = vcmp.gt.f32.partialorder %v2753_v0, 0.0 }
 0x3cf   :  { %v2060_v56 = vpop.eup %2059  ;;  %v1726_v5 = vadd.f32 -1.0, %v2058_v6  ;;  %2073 = vpow2.f32 %v1503_v45  ;;  %v1484_v34 = vmin.f32 %v2776_v27, 0.0  ;;  %v1511_v18 = vmul.f32 1.442695, %v1482_v32  ;;  %1603 = vrot.lane.b32.xlu1 %v1767_v61, %s2148_s7 }
 0x3d0   :  { %v2062_v41 = vpop.eup %2061  ;;  %v1724_v15 = vadd.f32 -1.0, %v2060_v56  ;;  %1605 = vrot.lane.b32.xlu0 %v1768_v58, %s2148_s7  ;;  %v2802_v20 = vpop.xlane.xlu0 %602  ;;  %vm1466_vm3 = vcmp.gt.f32.partialorder %v2773_v36, 0.0  ;;  %vm620_vm4 = vcmp.gt.f32.partialorder %v2744_v39, 0.0  ;;  %vm618_vm5 = vcmp.gt.f32.partialorder %v2727_v35, 0.0 }
 0x3d1   :  { %v1543_v24 = vsel %vm1463_vm6, %v2724_v31, %v1726_v5  ;;  %v2064_v51 = vpop.eup %2063  ;;  %v1717_v13 = vadd.f32 -1.0, %v2062_v41  ;;  %2075 = vpow2.f32 %v1511_v18  ;;  %v1515_v7 = vmul.f32 1.442695, %v1484_v34 }
 0x3d2   :  { %v1774_v4 = vpack.c.bf16 %v1543_v24, %v1543_v24  ;;  %v1541_v55 = vsel %vm1461_vm7, %v2733_v44, %v1724_v15  ;;  %v1723_v31 = vadd.f32 -1.0, %v2064_v51  ;;  %v2066_v47 = vpop.eup %2065  ;;  %vm621_vm6 = vcmp.gt.f32.partialorder %v2764_v43, 0.0 }
 0x3d3   :  { %v1772_v23 = vpack.c.bf16 %v1541_v55, %v1541_v55  ;;  %v1534_v44 = vsel %vm1454_vm8, %v2715_v42, %v1717_v13  ;;  %v1721_v14 = vadd.f32 -1.0, %v2066_v47  ;;  %2077 = vpow2.f32 %v1515_v7 }
 0x3d4   :  { %1617 = vrot.lane.b32.xlu0 %v1774_v4, %s2148_s7  ;;  %v1765_v30 = vpack.c.bf16 %v1534_v44, %v1534_v44  ;;  %v1540_v33 = vsel %vm1460_vm9, %v2719_v63, %v1723_v31  ;;  %v2818_v21 = vpop.xlane.xlu0 %604  ;;  %2079 = vrcp.f32 %v632_v53  ;;  %v636_v17 = vsel %vm620_vm4, %v2744_v39, 1.0 }
 0x3d5   :  { %v1771_v46 = vpack.c.bf16 %v1540_v33, %v1540_v33  ;;  %v1538_v42 = vsel %vm1458_vm10, %v2730_v48, %v1721_v14  ;;  %v634_v5 = vsel %vm618_vm5, %v2727_v35, 1.0  ;;  %v637_v41 = vsel %vm621_vm6, %v2764_v43, 1.0 }
 0x3d6   :  { %v2068_v25 = vpop.eup %2067  ;;  %1599 = vrot.lane.b32.xlu1 %v1765_v30, %s2148_s7  ;;  %v1769_v59 = vpack.c.bf16 %v1538_v42, %v1538_v42  ;;  %vm1468_vm8 = vcmp.gt.f32.partialorder %v2776_v27, 0.0  ;;  %vm622_vm9 = vcmp.gt.f32.partialorder %v2780_v19, 0.0  ;;  %vm624_vm10 = vcmp.gt.f32.partialorder %v2802_v20, 0.0 }
 0x3d7   :  { %v2070_v50 = vpop.eup %2069  ;;  %v1730_v57 = vadd.f32 -1.0, %v2068_v25  ;;  %v638_v32 = vsel %vm622_vm9, %v2780_v19, 1.0  ;;  %v640_v61 = vsel %vm624_vm10, %v2802_v20, 1.0 }
 0x3d8   :  { %1613 = vrot.lane.b32.xlu0 %v1772_v23, %s2148_s7  ;;  %v2072_v37 = vpop.eup %2071  ;;  %v1727_v9 = vadd.f32 -1.0, %v2070_v50 }
 0x3d9   :  { %v1728_v60 = vadd.f32 -1.0, %v2072_v37  ;;  %v2074_v63 = vpop.eup %2073  ;;  %v1547_v3 = vsel %vm1467_vm12, %v2750_v11, %v1730_v57  ;;  %v630_v11 = vsel %vm614_vm14, %v2679_v16, 1.0  ;;  %v593_v16 = vpop.xlane.xlu1 %592  ;;  %vm625_vm12 = vcmp.gt.f32.partialorder %v2818_v21, 0.0 }
 0x3da   :  { %1611 = vrot.lane.b32.xlu1 %v1771_v46, %s2148_s7  ;;  %v1544_v48 = vsel %vm1464_vm15, %v2742_v26, %v1727_v9  ;;  %v1778_v12 = vpack.c.bf16 %v1547_v3, %v1547_v3  ;;  %v631_v26 = vsel %vm615_vm1, %v2683_v52, 1.0  ;;  %2081 = vrcp.f32 %v630_v11 }
 0x3db   :  { %v1545_v10 = vsel %vm1465_vm11, %v2756_v2, %v1728_v60  ;;  %v2076_v28 = vpop.eup %2075  ;;  %v1725_v2 = vadd.f32 -1.0, %v2074_v63  ;;  %v1775_v6 = vpack.c.bf16 %v1544_v48, %v1544_v48  ;;  %2083 = vrcp.f32 %v633_v40 }
 0x3dc   :  { %v1776_v54 = vpack.c.bf16 %v1545_v10, %v1545_v10  ;;  %v1729_v29 = vadd.f32 -1.0, %v2076_v28  ;;  %2085 = vrcp.f32 %v631_v26  ;;  %vm619_vm7 = vcmp.gt.f32.partialorder %v593_v16, 0.0 }
 0x3dd   :  { %v1542_v49 = vsel %vm1462_vm2, %v2753_v0, %v1725_v2  ;;  %v2078_v58 = vpop.eup %2077  ;;  %v2831_v0 = vpop.xlane.xlu0 %606  ;;  %2087 = vrcp.f32 %v636_v17  ;;  %vm623_vm11 = vcmp.gt.f32.partialorder %v2792_v22, 0.0  ;;  %v641_v25 = vsel %vm625_vm12, %v2818_v21, 1.0 }
 0x3de   :  { %1621 = vrot.lane.b32.xlu0 %v1776_v54, %s2148_s7  ;;  %1607 = vrot.lane.b32.xlu1 %v1769_v59, %s2148_s7  ;;  %v1546_v62 = vsel %vm1466_vm3, %v2773_v36, %v1729_v29  ;;  %v1773_v38 = vpack.c.bf16 %v1542_v49, %v1542_v49  ;;  %v1731_v52 = vadd.f32 -1.0, %v2078_v58  ;;  %v635_v36 = vsel %vm619_vm7, %v593_v16, 1.0  ;;  %v2080_v45 = vpop.eup %2079  ;;  %v613_v43 = vpop.xlane.xlu1 %612 }
 0x3df   :  { %v1777_v56 = vpack.c.bf16 %v1546_v62, %v1546_v62  ;;  %2089 = vrcp.f32 %v634_v5  ;;  %vm629_vm13 = vcmp.gt.f32.partialorder %v613_v43, 0.0  ;;  %v639_v19 = vsel %vm623_vm11, %v2792_v22, 1.0 }
 0x3e0   :  { %v1548_v15 = vsel %vm1468_vm8, %v2776_v27, %v1731_v52  ;;  %2091 = vrcp.f32 %v637_v41  ;;  %v645_v22 = vsel %vm629_vm13, %v613_v43, 1.0  ;;  %vm626_vm14 = vcmp.gt.f32.partialorder %v2831_v0, 0.0 }
 0x3e1   :  { %v2842_v39 = vpop.xlane.xlu0 %608  ;;  %2093 = vrcp.f32 %v635_v36  ;;  %v1779_v1 = vpack.c.bf16 %v1548_v15, %v1548_v15  ;;  %v642_v53 = vsel %vm626_vm14, %v2831_v0, 1.0  ;;  %vm966_vm1 = vcmask 60416  }
 0x3e2   :  { %1625 = vrot.lane.b32.xlu0 %v1778_v12, %s2148_s7  ;;  %1619 = vrot.lane.b32.xlu1 %v1775_v6, %s2148_s7  ;;  %2095 = vrcp.f32 %v638_v32  ;;  %vm627_vm0 = vcmp.gt.f32.partialorder %v2842_v39, 0.0 }
 0x3e3   :  { %2097 = vrcp.f32 %v640_v61  ;;  %v643_v26 = vsel %vm627_vm0, %v2842_v39, 1.0 }
 0x3e4   :  { %v2082_v24 = vpop.eup %2081  ;;  %2099 = vrcp.f32 %v639_v19 }
 0x3e5   :  { %v2084_v4 = vpop.eup %2083  ;;  %v611_v50 = vpop.xlane.xlu0 %610  ;;  %2101 = vrcp.f32 %v641_v25 }
 0x3e6   :  { %1615 = vrot.lane.b32.xlu1 %v1773_v38, %s2148_s7  ;;  %v2086_v18 = vpop.eup %2085  ;;  %vm628_vm15 = vcmp.gt.f32.partialorder %v611_v50, 0.0 }
 0x3e7   :  { %v2088_v60 = vpop.eup %2087  ;;  %v644_v21 = vsel %vm628_vm15, %v611_v50, 1.0 }
 0x3e9   :  { %v2090_v20 = vpop.eup %2089 }
 0x3ea   :  { %1623 = vrot.lane.b32.xlu1 %v1777_v56, %s2148_s7  ;;  %v2092_v3 = vpop.eup %2091 }
 0x3eb   :  { %v2094_v2 = vpop.eup %2093 }
 0x3ec   :  { %v2096_v38 = vpop.eup %2095 }
 0x3ed   :  { %v2098_v17 = vpop.eup %2097 }
 0x3ee   :  { %1627 = vrot.lane.b32.xlu1 %v1779_v1, %s2148_s7  ;;  %v2100_v36 = vpop.eup %2099 }
 0x3ef   :  { %v1876_v35 = vpop.f32.mrb[0].mxu1 }
 0x3f0   :  { %v769_v51 = vmul.f32 %v2080_v45, %v1876_v35  ;;  %v704_v27 = vpop.f32.mrb[1].mxu1  ;;  %v2102_v35 = vpop.eup %2101 }
 0x3f1   :  { %v767_v55 = vmul.f32 %v2082_v24, %v704_v27  ;;  %v1877_v34 = vpop.f32.mrb[2].mxu1 }
 0x3f2   :  { %v2852_v31 = vadd.f32 %v2638_v8, %v769_v51  ;;  %v770_v13 = vmul.f32 %v2084_v4, %v1877_v34  ;;  %v707_v47 = vpop.f32.mrb[3].mxu1  ;;  %v2900_v51 = vld [vmem:[%s3099_s2] ss:$0 sm:$0xff] }
 0x3f3   :  { %v2858_v23 = vadd.f32 %v2638_v8, %v767_v55  ;;  %v768_v44 = vmul.f32 %v2086_v18, %v707_v47 }
 0x3f4   :  { %v824_v7 = vmin.f32 %v2852_v31, 0.0  ;;  %v2863_v30 = vadd.f32 %v2638_v8, %v770_v13  ;;  %vm808_vm2 = vcmp.gt.f32.partialorder %v2852_v31, 0.0 }
 0x3f5   :  { %v822_v33 = vmin.f32 %v2858_v23, 0.0  ;;  %v2867_v14 = vadd.f32 %v2638_v8, %v768_v44  ;;  %vm806_vm3 = vcmp.gt.f32.partialorder %v2858_v23, 0.0 }
 0x3f6   :  { %v842_v37 = vmul.f32 1.442695, %v824_v7  ;;  %v825_v57 = vmin.f32 %v2863_v30, 0.0  ;;  %vm809_vm4 = vcmp.gt.f32.partialorder %v2863_v30, 0.0 }
 0x3f7   :  { %v838_v46 = vmul.f32 1.442695, %v822_v33  ;;  %v823_v42 = vmin.f32 %v2867_v14, 0.0  ;;  %v1880_v9 = vpop.f32.mrb[4].mxu1  ;;  %vm807_vm5 = vcmp.gt.f32.partialorder %v2867_v14, 0.0 }
 0x3f8   :  { %2103 = vpow2.f32 %v842_v37  ;;  %v844_v10 = vmul.f32 1.442695, %v825_v57  ;;  %v773_v63 = vmul.f32 %v2088_v60, %v1880_v9  ;;  %v720_v54 = vpop.f32.mrb[5].mxu1 }
 0x3f9   :  { %2105 = vpow2.f32 %v838_v46  ;;  %v840_v28 = vmul.f32 1.442695, %v823_v42  ;;  %v771_v59 = vmul.f32 %v2090_v20, %v720_v54  ;;  %v1881_v48 = vpop.f32.mrb[6].mxu1 }
 0x3fa   :  { %2107 = vpow2.f32 %v844_v10  ;;  %v2877_v12 = vadd.f32 %v2638_v8, %v773_v63  ;;  %v774_v11 = vmul.f32 %v2092_v3, %v1881_v48  ;;  %v723_v29 = vpop.f32.mrb[7].mxu1 }
 0x3fb   :  { %2109 = vpow2.f32 %v840_v28  ;;  %v2881_v40 = vadd.f32 %v2638_v8, %v771_v59  ;;  %v772_v6 = vmul.f32 %v2094_v2, %v723_v29 }
 0x3fc   :  { %2111 = vrcp.f32 %v645_v22  ;;  %v828_v49 = vmin.f32 %v2877_v12, 0.0  ;;  %v2888_v58 = vadd.f32 %v2638_v8, %v774_v11  ;;  %vm812_vm6 = vcmp.gt.f32.partialorder %v2877_v12, 0.0 }
 0x3fd   :  { %2113 = vrcp.f32 %v642_v53  ;;  %v826_v16 = vmin.f32 %v2881_v40, 0.0  ;;  %v2892_v62 = vadd.f32 %v2638_v8, %v772_v6  ;;  %vm810_vm7 = vcmp.gt.f32.partialorder %v2881_v40, 0.0 }
 0x3fe   :  { %2115 = vrcp.f32 %v644_v21  ;;  %v850_v52 = vmul.f32 1.442695, %v828_v49  ;;  %v829_v0 = vmin.f32 %v2888_v58, 0.0  ;;  %vm813_vm8 = vcmp.gt.f32.partialorder %v2888_v58, 0.0 }
 0x3ff   :  { %2117 = vrcp.f32 %v643_v26  ;;  %v846_v56 = vmul.f32 1.442695, %v826_v16  ;;  %v827_v5 = vmin.f32 %v2892_v62, 0.0  ;;  %v1884_v41 = vpop.f32.mrb[8].mxu1  ;;  %vm811_vm9 = vcmp.gt.f32.partialorder %v2892_v62, 0.0 }
 0x400   :  { %2119 = vpow2.f32 %v850_v52  ;;  %v852_v15 = vmul.f32 1.442695, %v829_v0  ;;  %v777_v45 = vmul.f32 %v2098_v17, %v1884_v41  ;;  %v736_v39 = vpop.f32.mrb[9].mxu1 }
 0x401   :  { %2121 = vpow2.f32 %v846_v56  ;;  %v848_v8 = vmul.f32 1.442695, %v827_v5  ;;  %v775_v24 = vmul.f32 %v2096_v38, %v736_v39  ;;  %v1885_v43 = vpop.f32.mrb[10].mxu1 }
 0x402   :  { %v2104_v1 = vpop.eup %2103  ;;  %2123 = vpow2.f32 %v852_v15  ;;  %v2903_v27 = vadd.f32 %v2900_v51, %v777_v45  ;;  %v778_v4 = vmul.f32 %v2102_v35, %v1885_v43  ;;  %v739_v32 = vpop.f32.mrb[11].mxu1 }
 0x403   :  { %v2106_v55 = vpop.eup %2105  ;;  %v1685_v34 = vadd.f32 -1.0, %v2104_v1  ;;  %2125 = vpow2.f32 %v848_v8  ;;  %v2907_v18 = vadd.f32 %v2900_v51, %v775_v24  ;;  %v776_v33 = vmul.f32 %v2100_v36, %v739_v32 }
 0x404   :  { %v2108_v61 = vpop.eup %2107  ;;  %v1683_v13 = vadd.f32 -1.0, %v2106_v55  ;;  %v832_v47 = vmin.f32 %v2903_v27, 0.0  ;;  %v2912_v19 = vadd.f32 %v2900_v51, %v778_v4  ;;  %vm816_vm10 = vcmp.gt.f32.partialorder %v2903_v27, 0.0 }
 0x405   :  { %v2110_v44 = vpop.eup %2109  ;;  %v888_v25 = vsel %vm808_vm2, %v2852_v31, %v1685_v34  ;;  %v1686_v7 = vadd.f32 -1.0, %v2108_v61  ;;  %v830_v50 = vmin.f32 %v2907_v18, 0.0  ;;  %vm814_vm11 = vcmp.gt.f32.partialorder %v2907_v18, 0.0 }
 0x406   :  { %v2112_v22 = vpop.eup %2111  ;;  %v1750_v37 = vpack.c.bf16 %v888_v25, %v888_v25  ;;  %v886_v57 = vsel %vm806_vm3, %v2858_v23, %v1683_v13  ;;  %v1684_v60 = vadd.f32 -1.0, %v2110_v44  ;;  %v858_v46 = vmul.f32 1.442695, %v832_v47 }
 0x407   :  { %v2114_v42 = vpop.eup %2113  ;;  %v1748_v9 = vpack.c.bf16 %v886_v57, %v886_v57  ;;  %v889_v20 = vsel %vm809_vm4, %v2863_v30, %v1686_v7  ;;  %v854_v31 = vmul.f32 1.442695, %v830_v50  ;;  %v1888_v10 = vpop.f32.mrb[12].mxu1  ;;  %v833_v28 = vmin.f32 %v2912_v19, 0.0 }
 0x408   :  { %v2116_v63 = vpop.eup %2115  ;;  %v1751_v54 = vpack.c.bf16 %v889_v20, %v889_v20  ;;  %v887_v3 = vsel %vm807_vm5, %v2867_v14, %v1684_v60  ;;  %2127 = vpow2.f32 %v858_v46  ;;  %v752_v23 = vpop.f32.mrb[13].mxu1  ;;  %969 = vst.msk [vmem:[%s3100_s4 + $0x8] sm:$0xf] %vm966_vm1, %v1750_v37  ;;  %v2932_v30 = vadd.f32 %v2900_v51, %v776_v33 }
 0x409   :  { %v2118_v59 = vpop.eup %2117  ;;  %v1749_v48 = vpack.c.bf16 %v887_v3, %v887_v3  ;;  %2129 = vpow2.f32 %v854_v31  ;;  %v781_v2 = vmul.f32 %v2116_v63, %v1888_v10  ;;  %v1889_v53 = vpop.f32.mrb[14].mxu1  ;;  %967 = vst.msk [vmem:[%s3100_s4] sm:$0xf] %vm966_vm1, %v1748_v9  ;;  %v860_v11 = vmul.f32 1.442695, %v833_v28 }
 0x40a   :  { %v2120_v14 = vpop.eup %2119  ;;  %v779_v29 = vmul.f32 %v2114_v42, %v752_v23  ;;  %v782_v21 = vmul.f32 %v2112_v22, %v1889_v53  ;;  %v755_v6 = vpop.f32.mrb[15].mxu1  ;;  %970 = vst.msk [vmem:[%s3100_s4 + $0xc] sm:$0xf] %vm966_vm1, %v1751_v54  ;;  %v831_v16 = vmin.f32 %v2932_v30, 0.0  ;;  %vm817_vm12 = vcmp.gt.f32.partialorder %v2912_v19, 0.0 }
 0x40b   :  { %v2122_v26 = vpop.eup %2121  ;;  %v1689_v49 = vadd.f32 -1.0, %v2120_v14  ;;  %v2946_v38 = vadd.f32 %v2900_v51, %v781_v2  ;;  %968 = vst.msk [vmem:[%s3100_s4 + $0x4] sm:$0xf] %vm966_vm1, %v1749_v48  ;;  %2131 = vpow2.f32 %v860_v11  ;;  %v780_v34 = vmul.f32 %v2118_v59, %v755_v6 }
 0x40c   :  { %v2124_v52 = vpop.eup %2123  ;;  %v1687_v0 = vadd.f32 -1.0, %v2122_v26  ;;  %v2954_v17 = vadd.f32 %v2900_v51, %v779_v29  ;;  %v856_v36 = vmul.f32 1.442695, %v831_v16  ;;  %v2960_v15 = vadd.f32 %v2900_v51, %v782_v21 }
 0x40d   :  { %v2126_v56 = vpop.eup %2125  ;;  %v892_v5 = vsel %vm812_vm6, %v2877_v12, %v1689_v49  ;;  %v1690_v41 = vadd.f32 -1.0, %v2124_v52  ;;  %v836_v8 = vmin.f32 %v2946_v38, 0.0  ;;  %v803_v44 = vadd.f32 %v2900_v51, %v780_v34 }
 0x40e   :  { %v1754_v45 = vpack.c.bf16 %v892_v5, %v892_v5  ;;  %v890_v39 = vsel %vm810_vm7, %v2881_v40, %v1687_v0  ;;  %v1688_v35 = vadd.f32 -1.0, %v2126_v56  ;;  %2133 = vpow2.f32 %v856_v36 }
 0x40f   :  { %v1752_v24 = vpack.c.bf16 %v890_v39, %v890_v39  ;;  %v893_v43 = vsel %vm813_vm8, %v2888_v58, %v1690_v41  ;;  %v866_v4 = vmul.f32 1.442695, %v836_v8  ;;  %v834_v32 = vmin.f32 %v2954_v17, 0.0 }
 0x410   :  { %v1755_v1 = vpack.c.bf16 %v893_v43, %v893_v43  ;;  %v891_v12 = vsel %vm811_vm9, %v2892_v62, %v1688_v35  ;;  %973 = vst.msk [vmem:[%s3100_s4 + $0x18] sm:$0xf] %vm966_vm1, %v1754_v45  ;;  %v837_v55 = vmin.f32 %v2960_v15, 0.0  ;;  %v835_v50 = vmin.f32 %v803_v44, 0.0 }
 0x411   :  { %v1753_v40 = vpack.c.bf16 %v891_v12, %v891_v12  ;;  %971 = vst.msk [vmem:[%s3100_s4 + $0x10] sm:$0xf] %vm966_vm1, %v1752_v24  ;;  %2135 = vpow2.f32 %v866_v4  ;;  %v862_v62 = vmul.f32 1.442695, %v834_v32  ;;  %vm815_vm13 = vcmp.gt.f32.partialorder %v2932_v30, 0.0 }
 0x412   :  { %v2128_v58 = vpop.eup %2127  ;;  %974 = vst.msk [vmem:[%s3100_s4 + $0x1c] sm:$0xf] %vm966_vm1, %v1755_v1  ;;  %v868_v47 = vmul.f32 1.442695, %v837_v55  ;;  %v864_v60 = vmul.f32 1.442695, %v835_v50 }
 0x413   :  { %v2130_v61 = vpop.eup %2129  ;;  %v1693_v13 = vadd.f32 -1.0, %v2128_v58  ;;  %972 = vst.msk [vmem:[%s3100_s4 + $0x14] sm:$0xf] %vm966_vm1, %v1753_v40  ;;  %2137 = vpow2.f32 %v862_v62  ;;  %vm820_vm14 = vcmp.gt.f32.partialorder %v2946_v38, 0.0  ;;  %vm818_vm15 = vcmp.gt.f32.partialorder %v2954_v17, 0.0 }
 0x414   :  { %v1691_v25 = vadd.f32 -1.0, %v2130_v61  ;;  %2139 = vpow2.f32 %v868_v47  ;;  %vm821_vm0 = vcmp.gt.f32.partialorder %v2960_v15, 0.0  ;;  %vm819_vm2 = vcmp.gt.f32.partialorder %v803_v44, 0.0 }
 0x415   :  { %v896_v7 = vsel %vm816_vm10, %v2903_v27, %v1693_v13  ;;  %v2132_v33 = vpop.eup %2131  ;;  %2141 = vpow2.f32 %v864_v60  ;;  %vm1645_vm3 = vcmask 126016  }
 0x416   :  { %v1758_v22 = vpack.c.bf16 %v896_v7, %v896_v7  ;;  %v894_v37 = vsel %vm814_vm11, %v2907_v18, %v1691_v25  ;;  %v1694_v57 = vadd.f32 -1.0, %v2132_v33 }
 0x417   :  { %v1756_v51 = vpack.c.bf16 %v894_v37, %v894_v37 }
 0x418   :  { %977 = vst.msk [vmem:[%s3100_s4 + $0x28] sm:$0xf] %vm966_vm1, %v1758_v22  ;;  %v2134_v46 = vpop.eup %2133  ;;  %v897_v27 = vsel %vm817_vm12, %v2912_v19, %v1694_v57 }
 0x419   :  { %975 = vst.msk [vmem:[%s3100_s4 + $0x20] sm:$0xf] %vm966_vm1, %v1756_v51  ;;  %v1759_v18 = vpack.c.bf16 %v897_v27, %v897_v27  ;;  %v1692_v42 = vadd.f32 -1.0, %v2134_v46 }
 0x41b   :  { %v2136_v9 = vpop.eup %2135  ;;  %v895_v20 = vsel %vm815_vm13, %v2932_v30, %v1692_v42  ;;  %978 = vst.msk [vmem:[%s3100_s4 + $0x2c] sm:$0xf] %vm966_vm1, %v1759_v18 }
 0x41c   :  { %v1757_v31 = vpack.c.bf16 %v895_v20, %v895_v20  ;;  %v1697_v19 = vadd.f32 -1.0, %v2136_v9 }
 0x41d   :  { %v2138_v10 = vpop.eup %2137 }
 0x41e   :  { %v2140_v63 = vpop.eup %2139  ;;  %v900_v54 = vsel %vm820_vm14, %v2946_v38, %v1697_v19  ;;  %v1695_v3 = vadd.f32 -1.0, %v2138_v10  ;;  %976 = vst.msk [vmem:[%s3100_s4 + $0x24] sm:$0xf] %vm966_vm1, %v1757_v31 }
 0x41f   :  { %v1762_v28 = vpack.c.bf16 %v900_v54, %v900_v54  ;;  %v1698_v23 = vadd.f32 -1.0, %v2140_v63  ;;  %v2142_v2 = vpop.eup %2141 }
 0x420   :  { %v898_v59 = vsel %vm818_vm15, %v2954_v17, %v1695_v3  ;;  %v1696_v14 = vadd.f32 -1.0, %v2142_v2 }
 0x421   :  { %v1760_v48 = vpack.c.bf16 %v898_v59, %v898_v59  ;;  %v901_v30 = vsel %vm821_vm0, %v2960_v15, %v1698_v23  ;;  %981 = vst.msk [vmem:[%s3100_s4 + $0x38] sm:$0xf] %vm966_vm1, %v1762_v28 }
 0x422   :  { %v1763_v53 = vpack.c.bf16 %v901_v30, %v901_v30  ;;  %v899_v11 = vsel %vm819_vm2, %v803_v44, %v1696_v14 }
 0x423   :  { %979 = vst.msk [vmem:[%s3100_s4 + $0x30] sm:$0xf] %vm966_vm1, %v1760_v48  ;;  %v1761_v29 = vpack.c.bf16 %v899_v11, %v899_v11 }
 0x424   :  { %982 = vst.msk [vmem:[%s3100_s4 + $0x3c] sm:$0xf] %vm966_vm1, %v1763_v53 }
 0x425   :  { %980 = vst.msk [vmem:[%s3100_s4 + $0x34] sm:$0xf] %vm966_vm1, %v1761_v29 }
 0x437   :  { %v1598_v21 = vpop.permute.xlu0 %1597 }
 0x438   :  { %1646 = vst.msk [vmem:[%s3100_s4] sm:$0xf] %vm1645_vm3, %v1598_v21 }
 0x439   :  { %v1602_v26 = vpop.permute.xlu1 %1601 }
 0x43a   :  { %1648 = vst.msk [vmem:[%s3100_s4 + $0x8] sm:$0xf] %vm1645_vm3, %v1602_v26 }
 0x43e   :  { %v1610_v6 = vpop.permute.xlu0 %1609 }
 0x43f   :  { %1652 = vst.msk [vmem:[%s3100_s4 + $0x18] sm:$0xf] %vm1645_vm3, %v1610_v6 }
 0x441   :  { %v1604_v38 = vpop.permute.xlu1 %1603 }
 0x442   :  { %v1606_v49 = vpop.permute.xlu0 %1605  ;;  %1649 = vst.msk [vmem:[%s3100_s4 + $0xc] sm:$0xf] %vm1645_vm3, %v1604_v38 }
 0x443   :  { %1650 = vst.msk [vmem:[%s3100_s4 + $0x10] sm:$0xf] %vm1645_vm3, %v1606_v49 }
 0x446   :  { %v1618_v16 = vpop.permute.xlu0 %1617 }
 0x447   :  { %1656 = vst.msk [vmem:[%s3100_s4 + $0x28] sm:$0xf] %vm1645_vm3, %v1618_v16 }
 0x448   :  { %v1600_v0 = vpop.permute.xlu1 %1599 }
 0x449   :  { %1647 = vst.msk [vmem:[%s3100_s4 + $0x4] sm:$0xf] %vm1645_vm3, %v1600_v0 }
 0x44a   :  { %v1614_v52 = vpop.permute.xlu0 %1613 }
 0x44b   :  { %1654 = vst.msk [vmem:[%s3100_s4 + $0x20] sm:$0xf] %vm1645_vm3, %v1614_v52 }
 0x44c   :  { %v1612_v17 = vpop.permute.xlu1 %1611 }
 0x44d   :  { %1653 = vst.msk [vmem:[%s3100_s4 + $0x1c] sm:$0xf] %vm1645_vm3, %v1612_v17 }
 0x450   :  { %v1622_v56 = vpop.permute.xlu0 %1621  ;;  %v1608_v5 = vpop.permute.xlu1 %1607 }
 0x451   :  { %1658 = vst.msk [vmem:[%s3100_s4 + $0x30] sm:$0xf] %vm1645_vm3, %v1622_v56  ;;  %1651 = vst.msk [vmem:[%s3100_s4 + $0x14] sm:$0xf] %vm1645_vm3, %v1608_v5 }
 0x454   :  { %v1626_v41 = vpop.permute.xlu0 %1625  ;;  %v1620_v36 = vpop.permute.xlu1 %1619 }
 0x455   :  { %1660 = vst.msk [vmem:[%s3100_s4 + $0x38] sm:$0xf] %vm1645_vm3, %v1626_v41  ;;  %1657 = vst.msk [vmem:[%s3100_s4 + $0x2c] sm:$0xf] %vm1645_vm3, %v1620_v36 }
 0x458   :  { %v1616_v15 = vpop.permute.xlu1 %1615 }
 0x459   :  { %1655 = vst.msk [vmem:[%s3100_s4 + $0x24] sm:$0xf] %vm1645_vm3, %v1616_v15 }
 0x45c   :  { %v1624_v45 = vpop.permute.xlu1 %1623 }
 0x45d   :  { %1659 = vst.msk [vmem:[%s3100_s4 + $0x34] sm:$0xf] %vm1645_vm3, %v1624_v45 }
 0x460   :  { %v1628_v39 = vpop.permute.xlu1 %1627 }
 0x461   :  { %1661 = vst.msk [vmem:[%s3100_s4 + $0x3c] sm:$0xf] %vm1645_vm3, %v1628_v39 }

// kernel: tpu_custom_call.1
= control target key start
LH: loop header
LB: loop body
LE: loop exit
PB: predicated region body
PF: predicated region fallthrough
CT: control target
= control target key end

     0   :  { %vm36_vm0 = vcmask 130048   ;;  %v2144_v3 = vmov 19   ;;  %v2145_v20 = vmov 18   ;;  %s2146_s24 = smov 112   ;;  %s2148_s7 = smov 8   ;;  %s3096_s1 = inlined_call_operand.vmem [shape: f32[16,20], index: 1, kind: input, shape index: {}]   ;;  %s3097_s0 = inlined_call_operand.vmem [shape: f32[128,16], index: 0, kind: input, shape index: {}]   ;;  %s3098_s3 = inlined_call_operand.vmem [shape: s8[1,128,128], index: 3, kind: input, shape index: {}]   ;;  %s3099_s2 = inlined_call_operand.vmem [shape: f32[1,16], index: 2, kind: input, shape index: {}]   ;;  %s3100_s4 = inlined_call_operand.vmem [shape: bf16[128,16], index: 4, kind: output, shape index: {}]  }
   0x1   :  { %v34_v0 = vld [vmem:[%s3096_s1] sm:$0xff]  ;;  %v35_v1 = vld [vmem:[%s3096_s1 + $0x8] sm:$0xff]  ;;  %1931 = vset.pattern.permute.xlu1 %v2144_v3  ;;  %v20_v6 = vld [vmem:[%s3097_s0 + $0x10] sm:$0xff]  ;;  %1932 = vset.pattern.permute.xlu0 %v2145_v20 }
   0x2   :  { %v18_v2 = vld [vmem:[%s3097_s0] sm:$0xff]  ;;  %v1922_v4 = vpack.c.bf16 %v35_v1, %v34_v0  ;;  %v19_v5 = vld [vmem:[%s3097_s0 + $0x8] sm:$0xff]  ;;  %v21_v7 = vld [vmem:[%s3097_s0 + $0x18] sm:$0xff] }
   0x3   :  { %1834 = vmatprep.mubr.msk.f32.mxu0 %vm36_vm0, %v18_v2  ;;  %v22_v8 = vld [vmem:[%s3097_s0 + $0x20] sm:$0xff]  ;;  %v23_v9 = vld [vmem:[%s3097_s0 + $0x28] sm:$0xff]  ;;  %v24_v10 = vld [vmem:[%s3097_s0 + $0x30] sm:$0xff] }
   0x4   :  { %1923 = vmatprep.subr.bf16.mxu0 %v1922_v4  ;;  %v25_v11 = vld [vmem:[%s3097_s0 + $0x38] sm:$0xff]  ;;  %v26_v12 = vld [vmem:[%s3097_s0 + $0x40] sm:$0xff]  ;;  %v27_v13 = vld [vmem:[%s3097_s0 + $0x48] sm:$0xff] }
   0x5   :  { %1925 = vmatpush3.bf16.msra.mxu0 %v1922_v4  ;;  %v28_v14 = vld [vmem:[%s3097_s0 + $0x50] sm:$0xff]  ;;  %v29_v15 = vld [vmem:[%s3097_s0 + $0x58] sm:$0xff]  ;;  %v30_v16 = vld [vmem:[%s3097_s0 + $0x60] sm:$0xff] }
   0x6   :  { %v31_v17 = vld [vmem:[%s3097_s0 + $0x68] sm:$0xff]  ;;  %v32_v18 = vld [vmem:[%s3097_s0 + $0x70] sm:$0xff]  ;;  %v33_v19 = vld [vmem:[%s3097_s0 + $0x78] sm:$0xff]  ;;  %s2147_s0 = smov 120  }
   0x8   :  { %1835 = vmatmul.mubr.msk.f32.vlgmr.msra.gmra.mrb[0].mxu0 %vm36_vm0, %v19_v5 }
   0x9   :  { %1837 = vmatprep.mubr.msk.f32.mxu0 %vm36_vm0, %v20_v6 }
   0xc   :  { %1838 = vmatmul.mubr.msk.f32.gmra.mrb[2].mxu0 %vm36_vm0, %v21_v7 }
   0xd   :  { %1840 = vmatprep.mubr.msk.f32.mxu0 %vm36_vm0, %v22_v8 }
  0x10   :  { %1841 = vmatmul.mubr.msk.f32.gmra.mrb[4].mxu0 %vm36_vm0, %v23_v9 }
  0x11   :  { %1843 = vmatprep.mubr.msk.f32.mxu0 %vm36_vm0, %v24_v10 }
  0x14   :  { %1844 = vmatmul.mubr.msk.f32.gmra.mrb[6].mxu0 %vm36_vm0, %v25_v11 }
  0x15   :  { %1846 = vmatprep.mubr.msk.f32.mxu0 %vm36_vm0, %v26_v12 }
  0x18   :  { %1847 = vmatmul.mubr.msk.f32.gmra.mrb[8].mxu0 %vm36_vm0, %v27_v13 }
  0x19   :  { %1849 = vmatprep.mubr.msk.f32.mxu0 %vm36_vm0, %v28_v14 }
  0x1c   :  { %1850 = vmatmul.mubr.msk.f32.gmra.mrb[10].mxu0 %vm36_vm0, %v29_v15 }
  0x1d   :  { %1852 = vmatprep.mubr.msk.f32.mxu0 %vm36_vm0, %v30_v16 }
  0x20   :  { %1853 = vmatmul.mubr.msk.f32.gmra.mrb[12].mxu0 %vm36_vm0, %v31_v17 }
  0x21   :  { %1855 = vmatprep.mubr.msk.f32.mxu0 %vm36_vm0, %v32_v18 }
  0x24   :  { %1856 = vmatmul.mubr.msk.f32.gmra.mrb[14].mxu0 %vm36_vm0, %v33_v19 }
  0xdb   :  { %v1836_v21 = vpop.f32.mrb[0].mxu0 }
  0xdc   :  { %988 = vperm.xlu1 %1931, %v1836_v21   ;;  %256 = vrot.lane.b32.xlu0 %v1836_v21, %s2146_s24  ;;  %v151_v22 = vpop.f32.mrb[1].mxu0 }
  0xdd   :  { %v2247_v23 = vpack.c.bf16 %v1836_v21, %v151_v22 }
  0xdf   :  { %v1839_v24 = vpop.f32.mrb[2].mxu0  ;;  %1858 = vmatprep.subr.bf16.mxu1 %v2247_v23 }
  0xe0   :  { %375 = vperm.xlu0 %1932, %v1836_v21   ;;  %1859 = vmatpush3.bf16.msra.mxu1 %v2247_v23  ;;  %v161_v25 = vpop.f32.mrb[3].mxu0 }
  0xe1   :  { %260 = vrot.lane.b32.xlu1 %v1839_v24, %s2146_s24  ;;  %v2252_v26 = vpack.c.bf16 %v1839_v24, %v161_v25 }
  0xe3   :  { %v1842_v27 = vpop.f32.mrb[4].mxu0  ;;  %1860 = vmatprep.subr.bf16.mxu1 %v2252_v26 }
  0xe4   :  { %254 = vrot.lane.b32.xlu0 %v151_v22, %s2146_s24  ;;  %v171_v28 = vpop.f32.mrb[5].mxu0  ;;  %1861 = vmatpush3.bf16.msra.mxu1 %v2252_v26 }
  0xe5   :  { %258 = vrot.lane.b32.xlu1 %v161_v25, %s2146_s24  ;;  %1933 = vset.pattern.permute.xlu0 %v2144_v3  ;;  %v2259_v29 = vpack.c.bf16 %v1842_v27, %v171_v28 }
  0xe7   :  { %v1845_v30 = vpop.f32.mrb[6].mxu0  ;;  %1862 = vmatprep.subr.bf16.mxu1 %v2259_v29 }
  0xe8   :  { %984 = vperm.xlu0 %1933, %v151_v22   ;;  %v181_v31 = vpop.f32.mrb[7].mxu0  ;;  %1863 = vmatpush3.bf16.msra.mxu1 %v2259_v29 }
  0xe9   :  { %992 = vperm.xlu1 %1931, %v161_v25   ;;  %v233_v32 = vpack.c.bf16 %v1845_v30, %v181_v31 }
  0xeb   :  { %v1848_v33 = vpop.f32.mrb[8].mxu0  ;;  %1864 = vmatprep.subr.bf16.mxu1 %v233_v32 }
  0xec   :  { %1934 = vset.pattern.permute.xlu0 %v2145_v20  ;;  %v191_v34 = vpop.f32.mrb[9].mxu0  ;;  %1865 = vmatpush3.bf16.msra.mxu1 %v233_v32 }
  0xed   :  { %264 = vrot.lane.b32.xlu1 %v1842_v27, %s2146_s24  ;;  %371 = vperm.xlu0 %1934, %v151_v22   ;;  %v234_v35 = vpack.c.bf16 %v1848_v33, %v191_v34 }
  0xef   :  { %v2265_v36 = vpop.f32.mrb[10].mxu0  ;;  %1866 = vmatprep.subr.bf16.mxu1 %v234_v35 }
  0xf0   :  { %v2267_v37 = vpop.f32.mrb[11].mxu0  ;;  %1867 = vmatpush3.bf16.msra.mxu1 %v234_v35 }
  0xf1   :  { %1000 = vperm.xlu1 %1931, %v171_v28   ;;  %1935 = vset.pattern.permute.xlu0 %v2144_v3  ;;  %v2272_v38 = vpack.c.bf16 %v2265_v36, %v2267_v37 }
  0xf2   :  { %996 = vperm.xlu0 %1935, %v1839_v24  }
  0xf3   :  { %v1854_v39 = vpop.f32.mrb[12].mxu0  ;;  %1868 = vmatprep.subr.bf16.mxu1 %v2272_v38 }
  0xf4   :  { %v211_v40 = vpop.f32.mrb[13].mxu0  ;;  %1869 = vmatpush3.bf16.msra.mxu1 %v2272_v38 }
  0xf5   :  { %268 = vrot.lane.b32.xlu1 %v1845_v30, %s2146_s24  ;;  %v2277_v41 = vpack.c.bf16 %v1854_v39, %v211_v40 }
  0xf6   :  { %1936 = vset.pattern.permute.xlu0 %v2145_v20 }
  0xf7   :  { %383 = vperm.xlu0 %1936, %v1839_v24   ;;  %v1857_v42 = vpop.f32.mrb[14].mxu0  ;;  %1870 = vmatprep.subr.bf16.mxu1 %v2277_v41 }
  0xf8   :  { %v221_v43 = vpop.f32.mrb[15].mxu0  ;;  %1871 = vmatpush3.bf16.msra.mxu1 %v2277_v41 }
  0xf9   :  { %1008 = vperm.xlu1 %1931, %v181_v31   ;;  %v2282_v44 = vpack.c.bf16 %v1857_v42, %v221_v43 }
  0xfb   :  { %379 = vperm.xlu0 %1936, %v161_v25   ;;  %1872 = vmatprep.subr.bf16.mxu1 %v2282_v44 }
  0xfc   :  { %1873 = vmatpush3.bf16.msra.mxu1 %v2282_v44 }
  0xfd   :  { %272 = vrot.lane.b32.xlu1 %v1848_v33, %s2146_s24 }
  0xfe   :  { %1942 = vset.pattern.permute.xlu1 %v2145_v20 }
  0xff   :  { %1937 = vset.pattern.permute.xlu0 %v2144_v3 }
 0x100   :  { %1004 = vperm.xlu0 %1937, %v1842_v27  }
 0x101   :  { %407 = vperm.xlu1 %1942, %v1848_v33  }
 0x104   :  { %1938 = vset.pattern.permute.xlu0 %v2145_v20 }
 0x105   :  { %1943 = vset.pattern.permute.xlu1 %v2144_v3  ;;  %391 = vperm.xlu0 %1938, %v1842_v27  }
 0x106   :  { %1016 = vperm.xlu1 %1943, %v191_v34  }
 0x109   :  { %262 = vrot.lane.b32.xlu0 %v171_v28, %s2146_s24 }
 0x10a   :  { %276 = vrot.lane.b32.xlu1 %v2265_v36, %s2146_s24 }
 0x10d   :  { %387 = vperm.xlu0 %1938, %v171_v28  }
 0x10e   :  { %1024 = vperm.xlu1 %1943, %v2267_v37  }
 0x111   :  { %1939 = vset.pattern.permute.xlu0 %v2144_v3 }
 0x112   :  { %280 = vrot.lane.b32.xlu1 %v1854_v39, %s2146_s24  ;;  %1012 = vperm.xlu0 %1939, %v1845_v30  }
 0x116   :  { %1032 = vperm.xlu1 %1943, %v211_v40   ;;  %1940 = vset.pattern.permute.xlu0 %v2145_v20 }
 0x117   :  { %399 = vperm.xlu0 %1940, %v1845_v30  }
 0x11a   :  { %284 = vrot.lane.b32.xlu1 %v1857_v42, %s2146_s24 }
 0x11b   :  { %266 = vrot.lane.b32.xlu0 %v181_v31, %s2146_s24  ;;  %1947 = vset.pattern.permute.xlu1 %v2145_v20 }
 0x11e   :  { %423 = vperm.xlu1 %1947, %v1854_v39  }
 0x11f   :  { %395 = vperm.xlu0 %1940, %v181_v31  }
 0x122   :  { %1297 = vrot.lane.b32.xlu1 %v233_v32, %s2147_s0 }
 0x123   :  { %1941 = vset.pattern.permute.xlu0 %v2144_v3  ;;  %1948 = vset.pattern.permute.xlu1 %v2144_v3 }
 0x124   :  { %1020 = vperm.xlu0 %1941, %v1848_v33   ;;  %v434_v33 = vlaneseq }
 0x126   :  { %1299 = vrot.lane.b32.xlu1 %v234_v35, %s2147_s0  ;;  %v435_v35 = vshrl.u32 %v434_v33, 7 }
 0x128   :  { %270 = vrot.lane.b32.xlu0 %v191_v34, %s2146_s24 }
 0x129   :  { %1944 = vset.pattern.permute.xlu0 %v2145_v20 }
 0x12a   :  { %1040 = vperm.xlu1 %1948, %v221_v43  }
 0x12c   :  { %403 = vperm.xlu0 %1944, %v191_v34  }
 0x12e   :  { %1949 = vset.pattern.permute.xlu1 %v2145_v20 }
 0x12f   :  { %427 = vperm.xlu1 %1949, %v221_v43  }
 0x130   :  { %1945 = vset.pattern.permute.xlu0 %v2144_v3 }
 0x131   :  { %1028 = vperm.xlu0 %1945, %v2265_v36  }
 0x135   :  { %274 = vrot.lane.b32.xlu0 %v2267_v37, %s2146_s24 }
 0x139   :  { %1036 = vperm.xlu0 %1945, %v1854_v39  }
 0x13d   :  { %278 = vrot.lane.b32.xlu0 %v211_v40, %s2146_s24 }
 0x141   :  { %1044 = vperm.xlu0 %1945, %v1857_v42  }
 0x145   :  { %282 = vrot.lane.b32.xlu0 %v221_v43, %s2146_s24 }
 0x146   :  { %1946 = vset.pattern.permute.xlu0 %v2145_v20 }
 0x149   :  { %1291 = vrot.lane.b32.xlu0 %v2247_v23, %s2147_s0 }
 0x14d   :  { %411 = vperm.xlu0 %1946, %v2267_v37   ;;  %v1049_v37 = vsub.s32 1, %v435_v35 }
 0x14e   :  { %v257_v45 = vpop.permute.xlu0 %256 }
 0x151   :  { %415 = vperm.xlu0 %1946, %v2265_v36  }
 0x155   :  { %1293 = vrot.lane.b32.xlu0 %v2252_v26, %s2147_s0 }
 0x159   :  { %419 = vperm.xlu0 %1946, %v211_v40  }
 0x15b   :  { %v2323_v46 = vpop.permute.xlu1 %988 }
 0x15d   :  { %1295 = vrot.lane.b32.xlu0 %v2259_v29, %s2147_s0 }
 0x15f   :  { %v2325_v47 = vpop.permute.xlu0 %375  ;;  %v261_v49 = vpop.permute.xlu1 %260 }
 0x161   :  { %431 = vperm.xlu0 %1946, %v1857_v42  }
 0x163   :  { %v255_v48 = vpop.permute.xlu0 %254  ;;  %v259_v51 = vpop.permute.xlu1 %258 }
 0x164   :  { %302 = vxpose.xlu1.b32.start [1/16] (narrow) %v255_v48, 8 }
 0x165   :  { %1301 = vrot.lane.b32.xlu0 %v2272_v38, %s2147_s0 }
 0x166   :  { %1950 = vset.pattern.permute.xlu0 %v2144_v3 }
 0x167   :  { %v2330_v50 = vpop.permute.xlu0 %984 }
 0x168   :  { %303 = vxpose.xlu1.b32.cont [2/16] (narrow) %v257_v45, 8  ;;  %v2342_v57 = vpop.permute.xlu1 %992 }
 0x16c   :  { %v2332_v52 = vpop.permute.xlu0 %371  ;;  %304 = vxpose.xlu1.b32.cont [3/16] (narrow) %v259_v51, 8  ;;  %v265_v59 = vpop.permute.xlu1 %264 }
 0x170   :  { %305 = vxpose.xlu1.b32.cont [4/16] (narrow) %v261_v49, 8  ;;  %v2346_v61 = vpop.permute.xlu1 %1000 }
 0x171   :  { %v2334_v53 = vpop.permute.xlu0 %996 }
 0x174   :  { %v269_v0 = vpop.permute.xlu1 %268 }
 0x176   :  { %v2336_v54 = vpop.permute.xlu0 %383 }
 0x178   :  { %v2354_v2 = vpop.permute.xlu1 %1008 }
 0x17a   :  { %v2338_v55 = vpop.permute.xlu0 %379 }
 0x17c   :  { %v273_v4 = vpop.permute.xlu1 %272 }
 0x17f   :  { %v2340_v56 = vpop.permute.xlu0 %1004 }
 0x180   :  { %v2358_v7 = vpop.permute.xlu1 %407 }
 0x184   :  { %v2344_v58 = vpop.permute.xlu0 %391 }
 0x185   :  { %v2360_v9 = vpop.permute.xlu1 %1016 }
 0x188   :  { %v263_v60 = vpop.permute.xlu0 %262 }
 0x189   :  { %306 = vxpose.xlu1.b32.cont [5/16] (narrow) %v263_v60, 8  ;;  %v277_v11 = vpop.permute.xlu1 %276 }
 0x18c   :  { %v2348_v62 = vpop.permute.xlu0 %387 }
 0x18d   :  { %307 = vxpose.xlu1.b32.cont [6/16] (narrow) %v265_v59, 8  ;;  %v2366_v14 = vpop.permute.xlu1 %1024 }
 0x191   :  { %v2350_v63 = vpop.permute.xlu0 %1012  ;;  %v281_v16 = vpop.permute.xlu1 %280 }
 0x195   :  { %v1033_v19 = vpop.permute.xlu1 %1032 }
 0x196   :  { %v2352_v1 = vpop.permute.xlu0 %399 }
 0x199   :  { %v285_v21 = vpop.permute.xlu1 %284 }
 0x19a   :  { %v267_v3 = vpop.permute.xlu0 %266 }
 0x19b   :  { %308 = vxpose.xlu1.b32.cont [7/16] (narrow) %v267_v3, 8 }
 0x19d   :  { %v2376_v26 = vpop.permute.xlu1 %423 }
 0x19e   :  { %v2356_v5 = vpop.permute.xlu0 %395 }
 0x19f   :  { %309 = vxpose.xlu1.b32.cont [8/16] (narrow) %v269_v0, 8 }
 0x1a1   :  { %v1298_v28 = vpop.permute.xlu1 %1297 }
 0x1a3   :  { %v1021_v6 = vpop.permute.xlu0 %1020 }
 0x1a5   :  { %v1300_v31 = vpop.permute.xlu1 %1299 }
 0x1a7   :  { %v271_v8 = vpop.permute.xlu0 %270 }
 0x1a8   :  { %310 = vxpose.xlu1.b32.cont [9/16] (narrow) %v271_v8, 8 }
 0x1a9   :  { %v1041_v34 = vpop.permute.xlu1 %1040 }
 0x1ab   :  { %v2362_v10 = vpop.permute.xlu0 %403 }
 0x1ac   :  { %311 = vxpose.xlu1.b32.cont [10/16] (narrow) %v273_v4, 8 }
 0x1ae   :  { %v428_v36 = vpop.permute.xlu1 %427 }
 0x1b0   :  { %v2364_v12 = vpop.permute.xlu0 %1028 }
 0x1b4   :  { %v275_v13 = vpop.permute.xlu0 %274 }
 0x1b5   :  { %312 = vxpose.xlu1.b32.cont [11/16] (narrow) %v275_v13, 8 }
 0x1b8   :  { %v2368_v15 = vpop.permute.xlu0 %1036 }
 0x1b9   :  { %313 = vxpose.xlu1.b32.cont [12/16] (narrow) %v277_v11, 8 }
 0x1bc   :  { %v279_v17 = vpop.permute.xlu0 %278 }
 0x1bd   :  { %314 = vxpose.xlu1.b32.cont [13/16] (narrow) %v279_v17, 8 }
 0x1c0   :  { %v2370_v18 = vpop.permute.xlu0 %1044 }
 0x1c1   :  { %315 = vxpose.xlu1.b32.cont [14/16] (narrow) %v281_v16, 8 }
 0x1c4   :  { %v283_v20 = vpop.permute.xlu0 %282 }
 0x1c5   :  { %316 = vxpose.xlu1.b32.cont [15/16] (narrow) %v283_v20, 8 }
 0x1c8   :  { %v1292_v22 = vpop.permute.xlu0 %1291 }
 0x1c9   :  { %317 = vxpose.xlu1.b32.end [16/16] (narrow) %v285_v21, 8  ;;  %1890 = vmatprep.subr.bf16.mxu0 %v1292_v22 }
 0x1ca   :  { %1891 = vmatpush3.bf16.msra.mxu0 %v1292_v22 }
 0x1cc   :  { %v2372_v23 = vpop.permute.xlu0 %411 }
 0x1d0   :  { %v2374_v24 = vpop.permute.xlu0 %415 }
 0x1d4   :  { %v1294_v25 = vpop.permute.xlu0 %1293 }
 0x1d5   :  { %1892 = vmatprep.subr.bf16.mxu0 %v1294_v25 }
 0x1d6   :  { %1893 = vmatpush3.bf16.msra.mxu0 %v1294_v25 }
 0x1d8   :  { %v2378_v27 = vpop.permute.xlu0 %419 }
 0x1dc   :  { %v1296_v29 = vpop.permute.xlu0 %1295 }
 0x1dd   :  { %1894 = vmatprep.subr.bf16.mxu0 %v1296_v29 }
 0x1de   :  { %1895 = vmatpush3.bf16.msra.mxu0 %v1296_v29 }
 0x1df   :  { %1896 = vmatprep.subr.bf16.mxu0 %v1298_v28 }
 0x1e0   :  { %v2380_v30 = vpop.permute.xlu0 %431 }
 0x1e2   :  { %1897 = vmatpush3.bf16.msra.mxu0 %v1298_v28 }
 0x1e3   :  { %1898 = vmatprep.subr.bf16.mxu0 %v1300_v31 }
 0x1e4   :  { %v1302_v32 = vpop.permute.xlu0 %1301 }
 0x1e6   :  { %1899 = vmatpush3.bf16.msra.mxu0 %v1300_v31 }
 0x1e7   :  { %1900 = vmatprep.subr.bf16.mxu0 %v1302_v32 }
 0x1ea   :  { %1901 = vmatpush3.bf16.msra.mxu0 %v1302_v32 }
 0x20d   :  { %v318_v38 = vpop.trf.xlu1 }
 0x20e   :  { %v1050_v39 = vrot.slane %v318_v38, %v1049_v37 }
 0x210   :  { %v1056_v40 = vadd.f32 %v1050_v39, %v2340_v56  ;;  %v1051_v42 = vadd.f32 %v1050_v39, %v2330_v50  ;;  %v1060_v43 = vadd.f32 %v1050_v39, %v1021_v6  ;;  %v1052_v45 = vadd.f32 %v1050_v39, %v2323_v46 }
 0x211   :  { %v1063_v51 = vadd.f32 %v1050_v39, %v1033_v19  ;;  %v1053_v59 = vadd.f32 %v1050_v39, %v2342_v57  ;;  %v436_v56 = vsub.s32 0, %v435_v35  ;;  %v1065_v50 = vadd.f32 %v1050_v39, %v1041_v34 }
 0x212   :  { %v1072_v48 = vmul.f32 0.2, %v1056_v40  ;;  %v1067_v49 = vmul.f32 0.2, %v1051_v42  ;;  %v1076_v3 = vmul.f32 0.2, %v1060_v43  ;;  %v1054_v6 = vadd.f32 %v1050_v39, %v2334_v53 }
 0x213   :  { %v1068_v4 = vmul.f32 0.2, %v1052_v45  ;;  %v1079_v11 = vmul.f32 0.2, %v1063_v51  ;;  %v1069_v57 = vmul.f32 0.2, %v1053_v59  ;;  %v2399_v13 = vrot.slane %v318_v38, %v436_v56 }
 0x214   :  { %v2386_v60 = vmax.f32 %v1056_v40, %v1072_v48  ;;  %v2388_v0 = vmax.f32 %v1051_v42, %v1067_v49  ;;  %v2393_v46 = vmax.f32 %v1060_v43, %v1076_v3  ;;  %v1055_v16 = vadd.f32 %v1050_v39, %v2346_v61 }
 0x215   :  { %v2395_v8 = vmax.f32 %v1052_v45, %v1068_v4  ;;  %v2402_v17 = vmax.f32 %v1063_v51, %v1079_v11  ;;  %v2404_v19 = vmax.f32 %v1053_v59, %v1069_v57  ;;  %v1081_v20 = vmul.f32 0.2, %v1065_v50 }
 0x216   :  { %1109 = vmax.xlane.f32.xlu1 %v2386_v60  ;;  %1099 = vmax.xlane.f32.xlu0 %v2388_v0  ;;  %v1070_v53 = vmul.f32 0.2, %v1054_v6  ;;  %v2409_v21 = vadd.f32 %v2399_v13, %v428_v36  ;;  %v1071_v28 = vmul.f32 0.2, %v1055_v16  ;;  %v1057_v61 = vadd.f32 %v1050_v39, %v2354_v2 }
 0x217   :  { %v2411_v22 = vmax.f32 %v1065_v50, %v1081_v20  ;;  %v1058_v32 = vadd.f32 %v1050_v39, %v2350_v63  ;;  %v1059_v35 = vadd.f32 %v1050_v39, %v2360_v9  ;;  %v1061_v37 = vadd.f32 %v1050_v39, %v2366_v14 }
 0x218   :  { %v2413_v25 = vmax.f32 %v1054_v6, %v1070_v53  ;;  %v2418_v29 = vmax.f32 %v1055_v16, %v1071_v28  ;;  %v1073_v31 = vmul.f32 0.2, %v1057_v61  ;;  %v1062_v63 = vadd.f32 %v1050_v39, %v2364_v12 }
 0x219   :  { %v1074_v34 = vmul.f32 0.2, %v1058_v32  ;;  %v1075_v2 = vmul.f32 0.2, %v1059_v35  ;;  %v1077_v40 = vmul.f32 0.2, %v1061_v37  ;;  %v1064_v43 = vadd.f32 %v1050_v39, %v2368_v15 }
 0x21a   :  { %1117 = vmax.xlane.f32.xlu1 %v2393_v46  ;;  %1101 = vmax.xlane.f32.xlu0 %v2395_v8  ;;  %v2422_v33 = vmax.f32 %v1057_v61, %v1073_v31  ;;  %v1078_v42 = vmul.f32 0.2, %v1062_v63  ;;  %v1066_v48 = vadd.f32 %v1050_v39, %v2370_v18  ;;  %v438_v15 = vadd.f32 %v2399_v13, %v2332_v52 }
 0x21b   :  { %v2426_v36 = vmax.f32 %v1058_v32, %v1074_v34  ;;  %v2430_v38 = vmax.f32 %v1059_v35, %v1075_v2  ;;  %v2436_v9 = vmax.f32 %v1061_v37, %v1077_v40  ;;  %v1080_v45 = vmul.f32 0.2, %v1064_v43 }
 0x21c   :  { %v2440_v14 = vmax.f32 %v1062_v63, %v1078_v42  ;;  %v1082_v49 = vmul.f32 0.2, %v1066_v48  ;;  %v454_v51 = vmul.f32 0.2, %v438_v15  ;;  %v440_v59 = vadd.f32 %v2399_v13, %v2338_v55 }
 0x21d   :  { %v2444_v12 = vmax.f32 %v1064_v43, %v1080_v45  ;;  %v442_v39 = vadd.f32 %v2399_v13, %v2348_v62  ;;  %v444_v52 = vadd.f32 %v2399_v13, %v2356_v5  ;;  %v446_v6 = vadd.f32 %v2399_v13, %v2362_v10 }
 0x21e   :  { %1123 = vmax.xlane.f32.xlu1 %v2402_v17  ;;  %1103 = vmax.xlane.f32.xlu0 %v2404_v19  ;;  %v2454_v3 = vmax.f32 %v438_v15, %v454_v51  ;;  %v456_v18 = vmul.f32 0.2, %v440_v59  ;;  %v450_v16 = vadd.f32 %v2399_v13, %v2378_v27  ;;  %v468_v28 = vmul.f32 0.2, %v2409_v21 }
 0x21f   :  { %v458_v56 = vmul.f32 0.2, %v442_v39  ;;  %v460_v50 = vmul.f32 0.2, %v444_v52  ;;  %v462_v11 = vmul.f32 0.2, %v446_v6  ;;  %v441_v31 = vadd.f32 %v2399_v13, %v2336_v54 }
 0x220   :  { %v2461_v4 = vmax.f32 %v440_v59, %v456_v18  ;;  %v466_v10 = vmul.f32 0.2, %v450_v16  ;;  %v2491_v61 = vmax.f32 %v2409_v21, %v468_v28  ;;  %v443_v35 = vadd.f32 %v2399_v13, %v2344_v58 }
 0x221   :  { %v2466_v55 = vmax.f32 %v442_v39, %v458_v56  ;;  %v2471_v62 = vmax.f32 %v444_v52, %v460_v50  ;;  %v2476_v57 = vmax.f32 %v446_v6, %v462_v11  ;;  %v457_v34 = vmul.f32 0.2, %v441_v31 }
 0x222   :  { %1127 = vmax.xlane.f32.xlu1 %v2411_v22  ;;  %1105 = vmax.xlane.f32.xlu0 %v2413_v25  ;;  %v2484_v53 = vmax.f32 %v450_v16, %v466_v10  ;;  %v459_v2 = vmul.f32 0.2, %v443_v35  ;;  %v445_v21 = vadd.f32 %v2399_v13, %v2352_v1  ;;  %v447_v40 = vadd.f32 %v2399_v13, %v2358_v7 }
 0x223   :  { %v449_v42 = vadd.f32 %v2399_v13, %v2374_v24  ;;  %v451_v45 = vadd.f32 %v2399_v13, %v2376_v26 }
 0x224   :  { %v2506_v37 = vmax.f32 %v443_v35, %v459_v2  ;;  %v461_v54 = vmul.f32 0.2, %v445_v21  ;;  %v463_v58 = vmul.f32 0.2, %v447_v40 }
 0x225   :  { %v465_v1 = vmul.f32 0.2, %v449_v42  ;;  %v467_v7 = vmul.f32 0.2, %v451_v45 }
 0x226   :  { %1107 = vmax.xlane.f32.xlu0 %v2418_v29  ;;  %v2511_v63 = vmax.f32 %v445_v21, %v461_v54  ;;  %v2516_v43 = vmax.f32 %v447_v40, %v463_v58 }
 0x227   :  { %v2526_v15 = vmax.f32 %v451_v45, %v467_v7 }
 0x22a   :  { %1111 = vmax.xlane.f32.xlu0 %v2422_v33 }
 0x22e   :  { %1113 = vmax.xlane.f32.xlu0 %v2426_v36 }
 0x232   :  { %1115 = vmax.xlane.f32.xlu0 %v2430_v38 }
 0x233   :  { %1303 = vrot.lane.b32.xlu1 %v2277_v41, %s2147_s0  ;;  %v2447_v41 = vmax.f32 %v1066_v48, %v1082_v49  ;;  %v2521_v48 = vmax.f32 %v449_v42, %v465_v1  ;;  %v453_v49 = vadd.f32 %v2399_v13, %v2380_v30 }
 0x235   :  { %v469_v24 = vmul.f32 0.2, %v453_v49 }
 0x236   :  { %1119 = vmax.xlane.f32.xlu0 %v2436_v9 }
 0x237   :  { %v2529_v51 = vmax.f32 %v453_v49, %v469_v24  ;;  %v335_v49 = vld [vmem:[%s3098_s3 + $0x8] sm:$0xff] }
 0x23a   :  { %1121 = vmax.xlane.f32.xlu0 %v2440_v14 }
 0x23e   :  { %1125 = vmax.xlane.f32.xlu0 %v2444_v12 }
 0x242   :  { %1129 = vmax.xlane.f32.xlu0 %v2447_v41 }
 0x257   :  { %486 = vmax.xlane.f32.xlu1 %v2454_v3 }
 0x258   :  { %1305 = vrot.lane.b32.xlu0 %v2282_v44, %s2147_s0  ;;  %v448_v44 = vadd.f32 %v2399_v13, %v2372_v23  ;;  %v439_v23 = vadd.f32 %v2399_v13, %v2325_v47  ;;  %v2501_v47 = vmax.f32 %v441_v31, %v457_v34  ;;  %v334_v13 = vld [vmem:[%s3098_s3] sm:$0xff] }
 0x259   :  { %v340_v40 = vunpack.c.2.s8 %v334_v13  ;;  %v341_v1 = vunpack.c.3.s8 %v334_v13 }
 0x25a   :  { %v464_v5 = vmul.f32 0.2, %v448_v44  ;;  %v455_v27 = vmul.f32 0.2, %v439_v23 }
 0x25b   :  { %490 = vmax.xlane.f32.xlu1 %v2461_v4 }
 0x25c   :  { %v2481_v20 = vmax.f32 %v448_v44, %v464_v5  ;;  %v2496_v32 = vmax.f32 %v439_v23, %v455_v27  ;;  %v338_v5 = vunpack.c.0.s8 %v334_v13  ;;  %v339_v23 = vunpack.c.1.s8 %v334_v13 }
 0x25e   :  { %v2544_v27 = vcvt.s32.f32 %v338_v5  ;;  %v2547_v54 = vcvt.s32.f32 %v339_v23 }
 0x25f   :  { %494 = vmax.xlane.f32.xlu1 %v2466_v55 }
 0x263   :  { %498 = vmax.xlane.f32.xlu1 %v2471_v62 }
 0x267   :  { %502 = vmax.xlane.f32.xlu1 %v2476_v57 }
 0x26b   :  { %506 = vmax.xlane.f32.xlu1 %v2481_v20 }
 0x26f   :  { %510 = vmax.xlane.f32.xlu1 %v2484_v53 }
 0x273   :  { %514 = vmax.xlane.f32.xlu1 %v2491_v61 }
 0x277   :  { %488 = vmax.xlane.f32.xlu0 %v2496_v32 }
 0x27b   :  { %492 = vmax.xlane.f32.xlu0 %v2501_v47 }
 0x27f   :  { %496 = vmax.xlane.f32.xlu0 %v2506_v37 }
 0x283   :  { %500 = vmax.xlane.f32.xlu0 %v2511_v63 }
 0x287   :  { %504 = vmax.xlane.f32.xlu0 %v2516_v43 }
 0x28b   :  { %508 = vmax.xlane.f32.xlu0 %v2521_v48 }
 0x28f   :  { %512 = vmax.xlane.f32.xlu0 %v2526_v15 }
 0x293   :  { %516 = vmax.xlane.f32.xlu0 %v2529_v51 }
 0x2a3   :  { %v1110_v26 = vpop.xlane.xlu1 %1109  ;;  %v1100_v59 = vpop.xlane.xlu0 %1099 }
 0x2a4   :  { %v1131_v18 = vsub.f32 %v2388_v0, %v1100_v59  ;;  %v1136_v0 = vsub.f32 %v2386_v60, %v1110_v26 }
 0x2a6   :  { %v1147_v39 = vmul.f32 1.442695, %v1131_v18  ;;  %v1157_v35 = vmul.f32 1.442695, %v1136_v0 }
 0x2a7   :  { %v1118_v56 = vpop.xlane.xlu1 %1117  ;;  %v1102_v52 = vpop.xlane.xlu0 %1101 }
 0x2a8   :  { %v1132_v30 = vsub.f32 %v2395_v8, %v1102_v52  ;;  %1951 = vpow2.f32 %v1147_v39  ;;  %v1140_v24 = vsub.f32 %v2393_v46, %v1118_v56  ;;  %v2558_v52 = vcvt.s32.f32 %v341_v1 }
 0x2aa   :  { %v1149_v50 = vmul.f32 1.442695, %v1132_v30  ;;  %v342_v30 = vunpack.c.0.s8 %v335_v49 }
 0x2ab   :  { %v2537_v6 = vpop.xlane.xlu1 %1123  ;;  %v1104_v11 = vpop.xlane.xlu0 %1103 }
 0x2ac   :  { %v1133_v44 = vsub.f32 %v2404_v19, %v1104_v11  ;;  %1953 = vpow2.f32 %v1149_v50  ;;  %v343_v50 = vunpack.c.1.s8 %v335_v49  ;;  %v1165_v11 = vmul.f32 1.442695, %v1140_v24 }
 0x2ad   :  { %v2565_v5 = vcvt.s32.f32 %v342_v30 }
 0x2ae   :  { %v1151_v16 = vmul.f32 1.442695, %v1133_v44 }
 0x2af   :  { %v2541_v10 = vpop.xlane.xlu1 %1127  ;;  %v1106_v28 = vpop.xlane.xlu0 %1105 }
 0x2b0   :  { %v1134_v8 = vsub.f32 %v2413_v25, %v1106_v28  ;;  %1955 = vpow2.f32 %v1151_v16  ;;  %v344_v16 = vunpack.c.2.s8 %v335_v49 }
 0x2b2   :  { %v1153_v31 = vmul.f32 1.442695, %v1134_v8  ;;  %v1952_v34 = vpop.eup %1951 }
 0x2b3   :  { %v1304_v2 = vpop.permute.xlu1 %1303  ;;  %v1108_v21 = vpop.xlane.xlu0 %1107  ;;  %v1179_v60 = vmul.f32 %v1952_v34, %v2544_v27 }
 0x2b4   :  { %v1135_v19 = vsub.f32 %v2418_v29, %v1108_v21  ;;  %1902 = vmatprep.subr.bf16.mxu0 %v1304_v2  ;;  %1957 = vpow2.f32 %v1153_v31  ;;  %v2552_v29 = vcvt.s32.f32 %v340_v40  ;;  %v1143_v31 = vsub.f32 %v2402_v17, %v2537_v6  ;;  %v336_v17 = vld [vmem:[%s3098_s3 + $0x10] sm:$0xff] }
 0x2b5   :  { %1903 = vmatpush3.bf16.msra.mxu0 %v1304_v2  ;;  %1195 = vadd.xlane.f32.xlu1 %v1179_v60  ;;  %1959 = vpow2.f32 %v1157_v35  ;;  %v345_v21 = vunpack.c.3.s8 %v335_v49  ;;  %v348_v30 = vunpack.c.2.s8 %v336_v17 }
 0x2b6   :  { %v1155_v25 = vmul.f32 1.442695, %v1135_v19  ;;  %v1954_v58 = vpop.eup %1953  ;;  %v2579_v19 = vcvt.s32.f32 %v344_v16  ;;  %v1171_v40 = vmul.f32 1.442695, %v1143_v31 }
 0x2b7   :  { %v1112_v42 = vpop.xlane.xlu0 %1111  ;;  %v1180_v45 = vmul.f32 %v1954_v58, %v2547_v54  ;;  %v2592_v1 = vcvt.s32.f32 %v345_v21 }
 0x2b8   :  { %1961 = vpow2.f32 %v1155_v25  ;;  %v1137_v7 = vsub.f32 %v2422_v33, %v1112_v42  ;;  %v1145_v25 = vsub.f32 %v2411_v22, %v2541_v10 }
 0x2b9   :  { %v1275_v26 = vpack.c.bf16 %v1180_v45, %v1179_v60  ;;  %1197 = vadd.xlane.f32.xlu0 %v1180_v45  ;;  %v346_v45 = vunpack.c.0.s8 %v336_v17 }
 0x2ba   :  { %v1159_v59 = vmul.f32 1.442695, %v1137_v7  ;;  %v1956_v18 = vpop.eup %1955  ;;  %v347_v7 = vunpack.c.1.s8 %v336_v17 }
 0x2bb   :  { %v1114_v39 = vpop.xlane.xlu0 %1113  ;;  %1906 = vmatprep.mubr.bf16.mxu0 %v1275_v26  ;;  %v2562_v13 = vmul.f32 %v1956_v18, %v2552_v29  ;;  %v1175_v26 = vmul.f32 1.442695, %v1145_v25  ;;  %v2600_v18 = vcvt.s32.f32 %v346_v45 }
 0x2bc   :  { %1963 = vpow2.f32 %v1159_v59  ;;  %v1138_v33 = vsub.f32 %v2426_v36, %v1114_v39  ;;  %v2571_v36 = vcvt.s32.f32 %v343_v50  ;;  %v2602_v39 = vcvt.s32.f32 %v347_v7 }
 0x2bd   :  { %1199 = vadd.xlane.f32.xlu1 %v2562_v13 }
 0x2be   :  { %v1161_v44 = vmul.f32 1.442695, %v1138_v33  ;;  %v1958_v46 = vpop.eup %1957  ;;  %v337_v33 = vld [vmem:[%s3098_s3 + $0x18] sm:$0xff] }
 0x2bf   :  { %v1116_v56 = vpop.xlane.xlu0 %1115  ;;  %v2568_v0 = vmul.f32 %v1958_v46, %v2558_v52  ;;  %v1960_v8 = vpop.eup %1959  ;;  %v350_v46 = vunpack.c.0.s8 %v337_v33 }
 0x2c0   :  { %1965 = vpow2.f32 %v1161_v44  ;;  %v1139_v28 = vsub.f32 %v2430_v38, %v1116_v56  ;;  %v2583_v60 = vmul.f32 %v1960_v8, %v2571_v36  ;;  %v349_v8 = vunpack.c.3.s8 %v336_v17 }
 0x2c1   :  { %1967 = vpow2.f32 %v1165_v11  ;;  %1201 = vadd.xlane.f32.xlu0 %v2568_v0  ;;  %v2616_v25 = vcvt.s32.f32 %v350_v46 }
 0x2c2   :  { %v1962_v23 = vpop.eup %1961  ;;  %v1163_v34 = vmul.f32 1.442695, %v1139_v28 }
 0x2c3   :  { %v1120_v35 = vpop.xlane.xlu0 %1119  ;;  %v2577_v2 = vmul.f32 %v1962_v23, %v2565_v5  ;;  %v2610_v23 = vcvt.s32.f32 %v348_v30 }
 0x2c4   :  { %1969 = vpow2.f32 %v1163_v34  ;;  %v1141_v38 = vsub.f32 %v2436_v9, %v1120_v35  ;;  %v352_v35 = vunpack.c.2.s8 %v337_v33 }
 0x2c5   :  { %1203 = vadd.xlane.f32.xlu1 %v2577_v2  ;;  %1205 = vadd.xlane.f32.xlu0 %v2583_v60 }
 0x2c6   :  { %v1964_v6 = vpop.eup %1963  ;;  %v1167_v58 = vmul.f32 1.442695, %v1141_v38  ;;  %v2613_v38 = vcvt.s32.f32 %v349_v8  ;;  %v2638_v8 = vld [vmem:[%s3099_s2] ss:$0 sm:$0xff] }
 0x2c7   :  { %v1122_v42 = vpop.xlane.xlu0 %1121  ;;  %v2595_v9 = vmul.f32 %v1964_v6, %v2579_v19 }
 0x2c8   :  { %1971 = vpow2.f32 %v1167_v58  ;;  %v1142_v49 = vsub.f32 %v2440_v14, %v1122_v42  ;;  %v2620_v42 = vcvt.s32.f32 %v352_v35 }
 0x2c9   :  { %1207 = vadd.xlane.f32.xlu1 %v2595_v9  ;;  %1973 = vpow2.f32 %v1171_v40  ;;  %v351_v40 = vunpack.c.1.s8 %v337_v33 }
 0x2ca   :  { %v1966_v24 = vpop.eup %1965  ;;  %v1169_v22 = vmul.f32 1.442695, %v1142_v49 }
 0x2cb   :  { %v1186_v10 = vmul.f32 %v1966_v24, %v2592_v1  ;;  %v1126_v59 = vpop.xlane.xlu0 %1125  ;;  %v1968_v50 = vpop.eup %1967  ;;  %v2623_v7 = vcvt.s32.f32 %v351_v40  ;;  %v353_v24 = vunpack.c.3.s8 %v337_v33 }
 0x2cc   :  { %1975 = vpow2.f32 %v1169_v22  ;;  %v1144_v14 = vsub.f32 %v2444_v12, %v1126_v59  ;;  %v1188_v28 = vmul.f32 %v1968_v50, %v2602_v39  ;;  %v1277_v22 = vpack.c.bf16 %v2583_v60, %v2577_v2 }
 0x2cd   :  { %1209 = vadd.xlane.f32.xlu0 %v1186_v10  ;;  %1977 = vpow2.f32 %v1175_v26  ;;  %v1278_v33 = vpack.c.bf16 %v1186_v10, %v2595_v9 }
 0x2ce   :  { %v1970_v11 = vpop.eup %1969  ;;  %v1173_v44 = vmul.f32 1.442695, %v1144_v14 }
 0x2cf   :  { %v1130_v56 = vpop.xlane.xlu0 %1129  ;;  %v1187_v16 = vmul.f32 %v1970_v11, %v2600_v18 }
 0x2d0   :  { %1979 = vpow2.f32 %v1173_v44  ;;  %v1146_v31 = vsub.f32 %v2447_v41, %v1130_v56  ;;  %v1276_v41 = vpack.c.bf16 %v2568_v0, %v2562_v13  ;;  %v2629_v0 = vcvt.s32.f32 %v353_v24 }
 0x2d1   :  { %1211 = vadd.xlane.f32.xlu1 %v1187_v16  ;;  %1213 = vadd.xlane.f32.xlu0 %v1188_v28  ;;  %v1279_v14 = vpack.c.bf16 %v1188_v28, %v1187_v16 }
 0x2d2   :  { %v1972_v34 = vpop.eup %1971  ;;  %v1177_v12 = vmul.f32 1.442695, %v1146_v31 }
 0x2d3   :  { %v1306_v21 = vpop.permute.xlu0 %1305  ;;  %v1189_v6 = vmul.f32 %v1972_v34, %v2610_v23  ;;  %v1974_v58 = vpop.eup %1973 }
 0x2d4   :  { %1981 = vpow2.f32 %v1177_v12  ;;  %1904 = vmatprep.subr.bf16.mxu0 %v1306_v21  ;;  %v1191_v49 = vmul.f32 %v1974_v58, %v2616_v25 }
 0x2d5   :  { %1215 = vadd.xlane.f32.xlu1 %v1189_v6  ;;  %1905 = vmatpush3.bf16.msra.mxu0 %v1306_v21 }
 0x2d6   :  { %v1976_v17 = vpop.eup %1975 }
 0x2d7   :  { %v1190_v45 = vmul.f32 %v1976_v17, %v2613_v38  ;;  %v1978_v26 = vpop.eup %1977 }
 0x2d8   :  { %1907 = vmatmul.mubr.bf16.vlgmr.msra.gmra.mrb[16].mxu0 %v1276_v41  ;;  %v1193_v30 = vmul.f32 %v1978_v26, %v2620_v42 }
 0x2d9   :  { %1219 = vadd.xlane.f32.xlu1 %v1191_v49  ;;  %1217 = vadd.xlane.f32.xlu0 %v1190_v45  ;;  %v1280_v44 = vpack.c.bf16 %v1190_v45, %v1189_v6 }
 0x2da   :  { %v1980_v59 = vpop.eup %1979  ;;  %1910 = vmatprep.mubr.bf16.mxu0 %v1277_v22 }
 0x2db   :  { %v1192_v13 = vmul.f32 %v1980_v59, %v2623_v7 }
 0x2dd   :  { %1223 = vadd.xlane.f32.xlu1 %v1193_v30  ;;  %1221 = vadd.xlane.f32.xlu0 %v1192_v13  ;;  %v1281_v46 = vpack.c.bf16 %v1192_v13, %v1191_v49 }
 0x2de   :  { %v1982_v50 = vpop.eup %1981 }
 0x2df   :  { %v1194_v11 = vmul.f32 %v1982_v50, %v2629_v0 }
 0x2e0   :  { %1911 = vmatmul.mubr.bf16.gmra.mrb[20].mxu0 %v1278_v33 }
 0x2e1   :  { %1225 = vadd.xlane.f32.xlu0 %v1194_v11  ;;  %1914 = vmatprep.mubr.bf16.mxu0 %v1279_v14  ;;  %v1282_v9 = vpack.c.bf16 %v1194_v11, %v1193_v30 }
 0x2e4   :  { %v487_v2 = vpop.xlane.xlu1 %486 }
 0x2e5   :  { %v518_v60 = vsub.f32 %v2454_v3, %v487_v2 }
 0x2e7   :  { %v534_v56 = vmul.f32 1.442695, %v518_v60 }
 0x2e8   :  { %1915 = vmatmul.mubr.bf16.gmra.mrb[24].mxu0 %v1280_v44  ;;  %v491_v16 = vpop.xlane.xlu1 %490 }
 0x2e9   :  { %1983 = vpow2.f32 %v534_v56  ;;  %1918 = vmatprep.mubr.bf16.mxu0 %v1281_v46  ;;  %v520_v34 = vsub.f32 %v2461_v4, %v491_v16 }
 0x2eb   :  { %v538_v6 = vmul.f32 1.442695, %v520_v34 }
 0x2ec   :  { %v495_v28 = vpop.xlane.xlu1 %494 }
 0x2ed   :  { %v522_v40 = vsub.f32 %v2466_v55, %v495_v28 }
 0x2ee   :  { %1434 = vrot.lane.b32.xlu1 %v2638_v8, %s2147_s0 }
 0x2ef   :  { %v542_v45 = vmul.f32 1.442695, %v522_v40 }
 0x2f0   :  { %1919 = vmatmul.mubr.bf16.gmra.mrb[28].mxu0 %v1282_v9  ;;  %v499_v31 = vpop.xlane.xlu1 %498 }
 0x2f3   :  { %v1984_v10 = vpop.eup %1983 }
 0x2f4   :  { %v566_v3 = vmul.f32 %v1984_v10, %v2544_v27  ;;  %v503_v21 = vpop.xlane.xlu1 %502  ;;  %v524_v27 = vsub.f32 %v2471_v62, %v499_v31 }
 0x2f5   :  { %v526_v22 = vsub.f32 %v2476_v57, %v503_v21 }
 0x2f6   :  { %582 = vadd.xlane.f32.xlu0 %v566_v3 }
 0x2f7   :  { %v550_v50 = vmul.f32 1.442695, %v526_v22 }
 0x2f8   :  { %v507_v24 = vpop.xlane.xlu1 %506 }
 0x2f9   :  { %v528_v62 = vsub.f32 %v2481_v20, %v507_v24 }
 0x2fb   :  { %v554_v44 = vmul.f32 1.442695, %v528_v62 }
 0x304   :  { %v489_v12 = vpop.xlane.xlu0 %488 }
 0x305   :  { %v519_v35 = vsub.f32 %v2496_v32, %v489_v12  ;;  %v546_v32 = vmul.f32 1.442695, %v524_v27 }
 0x307   :  { %v536_v58 = vmul.f32 1.442695, %v519_v35 }
 0x308   :  { %v493_v17 = vpop.xlane.xlu0 %492 }
 0x309   :  { %1985 = vpow2.f32 %v536_v58  ;;  %v521_v41 = vsub.f32 %v2501_v47, %v493_v17  ;;  %v511_v47 = vpop.xlane.xlu1 %510 }
 0x30a   :  { %1987 = vpow2.f32 %v538_v6 }
 0x30b   :  { %v540_v49 = vmul.f32 1.442695, %v521_v41 }
 0x30c   :  { %v497_v26 = vpop.xlane.xlu0 %496 }
 0x30d   :  { %1989 = vpow2.f32 %v540_v49  ;;  %v523_v4 = vsub.f32 %v2506_v37, %v497_v26  ;;  %v515_v56 = vpop.xlane.xlu1 %514 }
 0x30e   :  { %1991 = vpow2.f32 %v542_v45  ;;  %v532_v31 = vsub.f32 %v2491_v61, %v515_v56 }
 0x30f   :  { %v544_v55 = vmul.f32 1.442695, %v523_v4 }
 0x310   :  { %v501_v59 = vpop.xlane.xlu0 %500  ;;  %v562_v6 = vmul.f32 1.442695, %v532_v31 }
 0x311   :  { %1993 = vpow2.f32 %v544_v55  ;;  %v525_v13 = vsub.f32 %v2511_v63, %v501_v59  ;;  %v530_v63 = vsub.f32 %v2484_v53, %v511_v47 }
 0x312   :  { %1995 = vpow2.f32 %v546_v32 }
 0x313   :  { %v1986_v30 = vpop.eup %1985  ;;  %v548_v33 = vmul.f32 1.442695, %v525_v13  ;;  %v558_v28 = vmul.f32 1.442695, %v530_v63 }
 0x314   :  { %v505_v14 = vpop.xlane.xlu0 %504  ;;  %v567_v11 = vmul.f32 %v1986_v30, %v2547_v54  ;;  %v1988_v37 = vpop.eup %1987 }
 0x315   :  { %1997 = vpow2.f32 %v548_v33  ;;  %v527_v2 = vsub.f32 %v2516_v43, %v505_v14  ;;  %v568_v20 = vmul.f32 %v1988_v37, %v2552_v29 }
 0x316   :  { %584 = vadd.xlane.f32.xlu0 %v567_v11  ;;  %v662_v57 = vpack.c.bf16 %v567_v11, %v566_v3  ;;  %1999 = vpow2.f32 %v550_v50 }
 0x317   :  { %v1990_v60 = vpop.eup %1989  ;;  %v552_v46 = vmul.f32 1.442695, %v527_v2 }
 0x318   :  { %1874 = vmatprep.mubr.bf16.mxu1 %v662_v57  ;;  %v509_v9 = vpop.xlane.xlu0 %508  ;;  %v569_v10 = vmul.f32 %v1990_v60, %v2558_v52  ;;  %v1992_v54 = vpop.eup %1991 }
 0x319   :  { %2001 = vpow2.f32 %v552_v46  ;;  %v529_v16 = vsub.f32 %v2521_v48, %v509_v9  ;;  %v570_v12 = vmul.f32 %v1992_v54, %v2565_v5 }
 0x31a   :  { %586 = vadd.xlane.f32.xlu0 %v568_v20  ;;  %v663_v43 = vpack.c.bf16 %v569_v10, %v568_v20  ;;  %2003 = vpow2.f32 %v554_v44 }
 0x31b   :  { %v1994_v3 = vpop.eup %1993  ;;  %v556_v53 = vmul.f32 1.442695, %v529_v16 }
 0x31c   :  { %v513_v34 = vpop.xlane.xlu0 %512  ;;  %1875 = vmatmul.mubr.bf16.vlgmr.msra.gmra.mrb[0].mxu1 %v663_v43  ;;  %v571_v29 = vmul.f32 %v1994_v3, %v2571_v36  ;;  %v1996_v35 = vpop.eup %1995 }
 0x31d   :  { %2005 = vpow2.f32 %v556_v53  ;;  %v531_v52 = vsub.f32 %v2526_v15, %v513_v34  ;;  %v572_v61 = vmul.f32 %v1996_v35, %v2579_v19 }
 0x31e   :  { %588 = vadd.xlane.f32.xlu0 %v569_v10  ;;  %592 = vadd.xlane.f32.xlu1 %v571_v29  ;;  %v664_v48 = vpack.c.bf16 %v571_v29, %v570_v12  ;;  %2007 = vpow2.f32 %v558_v28 }
 0x31f   :  { %v1998_v21 = vpop.eup %1997  ;;  %v560_v40 = vmul.f32 1.442695, %v531_v52 }
 0x320   :  { %v517_v58 = vpop.xlane.xlu0 %516  ;;  %1878 = vmatprep.mubr.bf16.mxu1 %v664_v48  ;;  %v573_v17 = vmul.f32 %v1998_v21, %v2592_v1  ;;  %v2000_v5 = vpop.eup %1999 }
 0x321   :  { %2009 = vpow2.f32 %v560_v40  ;;  %v533_v36 = vsub.f32 %v2529_v51, %v517_v58  ;;  %v574_v27 = vmul.f32 %v2000_v5, %v2600_v18 }
 0x322   :  { %590 = vadd.xlane.f32.xlu0 %v570_v12  ;;  %v665_v41 = vpack.c.bf16 %v573_v17, %v572_v61  ;;  %2011 = vpow2.f32 %v562_v6 }
 0x323   :  { %v2002_v15 = vpop.eup %2001  ;;  %v564_v45 = vmul.f32 1.442695, %v533_v36 }
 0x324   :  { %1879 = vmatmul.mubr.bf16.gmra.mrb[4].mxu1 %v665_v41  ;;  %v575_v49 = vmul.f32 %v2002_v15, %v2602_v39  ;;  %v2004_v24 = vpop.eup %2003 }
 0x325   :  { %2013 = vpow2.f32 %v564_v45  ;;  %v576_v1 = vmul.f32 %v2004_v24, %v2610_v23 }
 0x326   :  { %594 = vadd.xlane.f32.xlu0 %v572_v61  ;;  %v666_v19 = vpack.c.bf16 %v575_v49, %v574_v27 }
 0x327   :  { %v2006_v26 = vpop.eup %2005 }
 0x328   :  { %1882 = vmatprep.mubr.bf16.mxu1 %v666_v19  ;;  %v577_v51 = vmul.f32 %v2006_v26, %v2613_v38  ;;  %v2008_v4 = vpop.eup %2007 }
 0x329   :  { %v578_v55 = vmul.f32 %v2008_v4, %v2616_v25 }
 0x32a   :  { %596 = vadd.xlane.f32.xlu0 %v573_v17  ;;  %v667_v32 = vpack.c.bf16 %v577_v51, %v576_v1 }
 0x32b   :  { %v2010_v22 = vpop.eup %2009 }
 0x32c   :  { %1883 = vmatmul.mubr.bf16.gmra.mrb[8].mxu1 %v667_v32  ;;  %v579_v18 = vmul.f32 %v2010_v22, %v2623_v7  ;;  %v2012_v39 = vpop.eup %2011 }
 0x32d   :  { %v580_v47 = vmul.f32 %v2012_v39, %v2620_v42 }
 0x32e   :  { %598 = vadd.xlane.f32.xlu0 %v574_v27  ;;  %v668_v59 = vpack.c.bf16 %v579_v18, %v578_v55 }
 0x32f   :  { %v2014_v13 = vpop.eup %2013 }
 0x330   :  { %1886 = vmatprep.mubr.bf16.mxu1 %v668_v59  ;;  %v581_v23 = vmul.f32 %v2014_v13, %v2629_v0 }
 0x332   :  { %600 = vadd.xlane.f32.xlu0 %v575_v49  ;;  %612 = vadd.xlane.f32.xlu1 %v581_v23  ;;  %v669_v38 = vpack.c.bf16 %v581_v23, %v580_v47 }
 0x334   :  { %1887 = vmatmul.mubr.bf16.gmra.mrb[12].mxu1 %v669_v38 }
 0x336   :  { %602 = vadd.xlane.f32.xlu0 %v576_v1 }
 0x33a   :  { %604 = vadd.xlane.f32.xlu0 %v577_v51 }
 0x33e   :  { %606 = vadd.xlane.f32.xlu0 %v578_v55 }
 0x342   :  { %608 = vadd.xlane.f32.xlu0 %v579_v18  ;;  %v1196_v7 = vpop.xlane.xlu1 %1195 }
 0x343   :  { %vm1227_vm2 = vcmp.gt.f32.partialorder %v1196_v7, 0.0 }
 0x344   :  { %v1243_v60 = vsel %vm1227_vm2, %v1196_v7, 1.0 }
 0x346   :  { %610 = vadd.xlane.f32.xlu0 %v580_v47  ;;  %v1198_v25 = vpop.xlane.xlu0 %1197 }
 0x347   :  { %vm1228_vm6 = vcmp.gt.f32.partialorder %v1198_v25, 0.0 }
 0x348   :  { %v1244_v10 = vsel %vm1228_vm6, %v1198_v25, 1.0 }
 0x34a   :  { %v1200_v50 = vpop.xlane.xlu1 %1199 }
 0x34b   :  { %vm1229_vm1 = vcmp.gt.f32.partialorder %v1200_v50, 0.0 }
 0x34c   :  { %v1245_v57 = vsel %vm1229_vm1, %v1200_v50, 1.0 }
 0x34d   :  { %2015 = vrcp.f32 %v1245_v57 }
 0x34e   :  { %v1202_v30 = vpop.xlane.xlu0 %1201  ;;  %2017 = vrcp.f32 %v1243_v60 }
 0x34f   :  { %vm1230_vm3 = vcmp.gt.f32.partialorder %v1202_v30, 0.0 }
 0x350   :  { %v1246_v46 = vsel %vm1230_vm3, %v1202_v30, 1.0 }
 0x351   :  { %2019 = vrcp.f32 %v1246_v46 }
 0x352   :  { %v1206_v62 = vpop.xlane.xlu0 %1205  ;;  %v1204_v33 = vpop.xlane.xlu1 %1203 }
 0x353   :  { %vm1231_vm5 = vcmp.gt.f32.partialorder %v1204_v33, 0.0  ;;  %vm1232_vm8 = vcmp.gt.f32.partialorder %v1206_v62, 0.0 }
 0x354   :  { %v1247_v20 = vsel %vm1231_vm5, %v1204_v33, 1.0  ;;  %v1248_v53 = vsel %vm1232_vm8, %v1206_v62, 1.0 }
 0x356   :  { %v1208_v11 = vpop.xlane.xlu1 %1207 }
 0x357   :  { %vm1233_vm4 = vcmp.gt.f32.partialorder %v1208_v11, 0.0  ;;  %v2016_v3 = vpop.eup %2015 }
 0x358   :  { %v1249_v9 = vsel %vm1233_vm4, %v1208_v11, 1.0  ;;  %v2018_v31 = vpop.eup %2017 }
 0x359   :  { %2021 = vrcp.f32 %v1249_v9 }
 0x35a   :  { %v1210_v14 = vpop.xlane.xlu0 %1209  ;;  %2023 = vrcp.f32 %v1247_v20 }
 0x35b   :  { %vm1234_vm7 = vcmp.gt.f32.partialorder %v1210_v14, 0.0  ;;  %2025 = vrcp.f32 %v1244_v10  ;;  %v2020_v17 = vpop.eup %2019 }
 0x35c   :  { %v1250_v43 = vsel %vm1234_vm7, %v1210_v14, 1.0 }
 0x35d   :  { %2027 = vrcp.f32 %v1250_v43 }
 0x35e   :  { %v1214_v42 = vpop.xlane.xlu0 %1213  ;;  %v1212_v37 = vpop.xlane.xlu1 %1211  ;;  %2029 = vrcp.f32 %v1248_v53 }
 0x35f   :  { %vm1235_vm10 = vcmp.gt.f32.partialorder %v1212_v37, 0.0  ;;  %vm1236_vm12 = vcmp.gt.f32.partialorder %v1214_v42, 0.0 }
 0x360   :  { %v1251_v58 = vsel %vm1235_vm10, %v1212_v37, 1.0  ;;  %v1252_v27 = vsel %vm1236_vm12, %v1214_v42, 1.0 }
 0x362   :  { %v1216_v2 = vpop.xlane.xlu1 %1215 }
 0x363   :  { %vm1237_vm9 = vcmp.gt.f32.partialorder %v1216_v2, 0.0  ;;  %v2022_v45 = vpop.eup %2021 }
 0x364   :  { %v1253_v35 = vsel %vm1237_vm9, %v1216_v2, 1.0  ;;  %v2024_v26 = vpop.eup %2023 }
 0x365   :  { %2031 = vrcp.f32 %v1253_v35  ;;  %v2026_v4 = vpop.eup %2025 }
 0x366   :  { %v1218_v0 = vpop.xlane.xlu0 %1217  ;;  %v2675_v63 = vpop.xlane.xlu1 %1219  ;;  %2033 = vrcp.f32 %v1251_v58 }
 0x367   :  { %vm1238_vm11 = vcmp.gt.f32.partialorder %v1218_v0, 0.0  ;;  %vm1239_vm13 = vcmp.gt.f32.partialorder %v2675_v63, 0.0  ;;  %v2028_v47 = vpop.eup %2027 }
 0x368   :  { %v1254_v5 = vsel %vm1238_vm11, %v1218_v0, 1.0  ;;  %v1255_v25 = vsel %vm1239_vm13, %v2675_v63, 1.0  ;;  %v2030_v50 = vpop.eup %2029 }
 0x369   :  { %2035 = vrcp.f32 %v1254_v5 }
 0x36a   :  { %v2673_v44 = vpop.xlane.xlu0 %1221  ;;  %v1224_v54 = vpop.xlane.xlu1 %1223 }
 0x36b   :  { %vm1241_vm14 = vcmp.gt.f32.partialorder %v1224_v54, 0.0  ;;  %vm1240_vm15 = vcmp.gt.f32.partialorder %v2673_v44, 0.0 }
 0x36c   :  { %v1257_v23 = vsel %vm1241_vm14, %v1224_v54, 1.0  ;;  %v1256_v20 = vsel %vm1240_vm15, %v2673_v44, 1.0 }
 0x36e   :  { %v2677_v56 = vpop.xlane.xlu0 %1225  ;;  %v2681_v34 = vpop.permute.xlu1 %1434 }
 0x36f   :  { %v2032_v11 = vpop.eup %2031  ;;  %vm1242_vm0 = vcmp.gt.f32.partialorder %v2677_v56, 0.0 }
 0x370   :  { %v2034_v60 = vpop.eup %2033 }
 0x383   :  { %v2679_v16 = vpop.xlane.xlu0 %582 }
 0x384   :  { %vm614_vm14 = vcmp.gt.f32.partialorder %v2679_v16, 0.0 }
 0x3a3   :  { %v2683_v52 = vpop.xlane.xlu0 %584 }
 0x3a7   :  { %v2693_v49 = vpop.xlane.xlu0 %586 }
 0x3a8   :  { %vm616_vm13 = vcmp.gt.f32.partialorder %v2693_v49, 0.0 }
 0x3ab   :  { %v1908_v28 = vpop.f32.mrb[16].mxu0  ;;  %v2709_v62 = vpop.xlane.xlu0 %588 }
 0x3ac   :  { %v1414_v12 = vmul.f32 %v2016_v3, %v1908_v28  ;;  %v1349_v29 = vpop.f32.mrb[17].mxu0  ;;  %v2036_v3 = vpop.eup %2035 }
 0x3ad   :  { %v1412_v48 = vmul.f32 %v2018_v31, %v1349_v29  ;;  %v1909_v21 = vpop.f32.mrb[18].mxu0  ;;  %v1258_v29 = vsel %vm1242_vm0, %v2677_v56, 1.0  ;;  %vm617_vm0 = vcmp.gt.f32.partialorder %v2709_v62, 0.0 }
 0x3ae   :  { %v2686_v6 = vadd.f32 %v2681_v34, %v1414_v12  ;;  %v1352_v40 = vpop.f32.mrb[19].mxu0  ;;  %v1415_v15 = vmul.f32 %v2020_v17, %v1909_v21 }
 0x3af   :  { %v2689_v61 = vadd.f32 %v2681_v34, %v1412_v48  ;;  %v1413_v39 = vmul.f32 %v2026_v4, %v1352_v40  ;;  %v2727_v35 = vpop.xlane.xlu0 %590 }
 0x3b0   :  { %v1471_v36 = vmin.f32 %v2686_v6, 0.0  ;;  %v2697_v22 = vadd.f32 %v2681_v34, %v1415_v15  ;;  %vm1455_vm3 = vcmp.gt.f32.partialorder %v2686_v6, 0.0 }
 0x3b1   :  { %v1469_v41 = vmin.f32 %v2689_v61, 0.0  ;;  %v2715_v42 = vadd.f32 %v2681_v34, %v1413_v39  ;;  %vm1453_vm1 = vcmp.gt.f32.partialorder %v2689_v61, 0.0 }
 0x3b2   :  { %v1489_v32 = vmul.f32 1.442695, %v1471_v36  ;;  %v1472_v33 = vmin.f32 %v2697_v22, 0.0  ;;  %vm1456_vm5 = vcmp.gt.f32.partialorder %v2697_v22, 0.0 }
 0x3b3   :  { %v1485_v24 = vmul.f32 1.442695, %v1469_v41  ;;  %v1912_v19 = vpop.f32.mrb[20].mxu0  ;;  %v1470_v28 = vmin.f32 %v2715_v42, 0.0  ;;  %v2744_v39 = vpop.xlane.xlu0 %594  ;;  %vm1454_vm8 = vcmp.gt.f32.partialorder %v2715_v42, 0.0 }
 0x3b4   :  { %v1418_v1 = vmul.f32 %v2022_v45, %v1912_v19  ;;  %v1365_v51 = vpop.f32.mrb[21].mxu0  ;;  %v1491_v10 = vmul.f32 1.442695, %v1472_v33 }
 0x3b5   :  { %2037 = vpow2.f32 %v1485_v24  ;;  %v1416_v55 = vmul.f32 %v2024_v26, %v1365_v51  ;;  %v1913_v18 = vpop.f32.mrb[22].mxu0  ;;  %v1487_v41 = vmul.f32 1.442695, %v1470_v28 }
 0x3b6   :  { %v2700_v59 = vadd.f32 %v2681_v34, %v1418_v1  ;;  %v1368_v13 = vpop.f32.mrb[23].mxu0  ;;  %2039 = vrcp.f32 %v1252_v27  ;;  %v1419_v30 = vmul.f32 %v2028_v47, %v1913_v18 }
 0x3b7   :  { %v2703_v38 = vadd.f32 %v2681_v34, %v1416_v55  ;;  %2041 = vpow2.f32 %v1489_v32  ;;  %v1417_v2 = vmul.f32 %v2030_v50, %v1368_v13 }
 0x3b8   :  { %v1475_v7 = vmin.f32 %v2700_v59, 0.0  ;;  %2043 = vrcp.f32 %v1257_v23  ;;  %v2719_v63 = vadd.f32 %v2681_v34, %v1419_v30  ;;  %vm1459_vm2 = vcmp.gt.f32.partialorder %v2700_v59, 0.0 }
 0x3b9   :  { %v1473_v14 = vmin.f32 %v2703_v38, 0.0  ;;  %2045 = vrcp.f32 %v1255_v25  ;;  %v2730_v48 = vadd.f32 %v2681_v34, %v1417_v2  ;;  %vm1457_vm4 = vcmp.gt.f32.partialorder %v2703_v38, 0.0 }
 0x3ba   :  { %v1497_v37 = vmul.f32 1.442695, %v1475_v7  ;;  %v1476_v58 = vmin.f32 %v2719_v63, 0.0  ;;  %vm1460_vm9 = vcmp.gt.f32.partialorder %v2719_v63, 0.0 }
 0x3bb   :  { %v1493_v0 = vmul.f32 1.442695, %v1473_v14  ;;  %v1916_v57 = vpop.f32.mrb[24].mxu0  ;;  %v1474_v24 = vmin.f32 %v2730_v48, 0.0  ;;  %vm1458_vm10 = vcmp.gt.f32.partialorder %v2730_v48, 0.0 }
 0x3bc   :  { %2047 = vpow2.f32 %v1497_v37  ;;  %v1422_v46 = vmul.f32 %v2032_v11, %v1916_v57  ;;  %v1381_v9 = vpop.f32.mrb[25].mxu0  ;;  %v1499_v4 = vmul.f32 1.442695, %v1476_v58 }
 0x3bd   :  { %2049 = vpow2.f32 %v1493_v0  ;;  %v1420_v54 = vmul.f32 %v2034_v60, %v1381_v9  ;;  %v1917_v43 = vpop.f32.mrb[26].mxu0  ;;  %v1495_v33 = vmul.f32 1.442695, %v1474_v24 }
 0x3be   :  { %v2724_v31 = vadd.f32 %v2681_v34, %v1422_v46  ;;  %v1384_v53 = vpop.f32.mrb[27].mxu0  ;;  %v1423_v21 = vmul.f32 %v2036_v3, %v1917_v43  ;;  %2051 = vrcp.f32 %v1256_v20  ;;  %v2764_v43 = vpop.xlane.xlu0 %596 }
 0x3bf   :  { %v2038_v12 = vpop.eup %2037  ;;  %v2733_v44 = vadd.f32 %v2681_v34, %v1420_v54  ;;  %2053 = vpow2.f32 %v1491_v10 }
 0x3c0   :  { %v1716_v40 = vadd.f32 -1.0, %v2038_v12  ;;  %v1479_v17 = vmin.f32 %v2724_v31, 0.0  ;;  %v2040_v5 = vpop.eup %2039  ;;  %2055 = vrcp.f32 %v1258_v29  ;;  %v2742_v26 = vadd.f32 %v2681_v34, %v1423_v21 }
 0x3c1   :  { %v1477_v56 = vmin.f32 %v2733_v44, 0.0  ;;  %v2042_v45 = vpop.eup %2041  ;;  %v1421_v32 = vmul.f32 %v2040_v5, %v1384_v53  ;;  %vm1463_vm6 = vcmp.gt.f32.partialorder %v2724_v31, 0.0  ;;  %vm1461_vm7 = vcmp.gt.f32.partialorder %v2733_v44, 0.0 }
 0x3c2   :  { %v1533_v36 = vsel %vm1453_vm1, %v2689_v61, %v1716_v40  ;;  %v1505_v15 = vmul.f32 1.442695, %v1479_v17  ;;  %v2044_v51 = vpop.eup %2043  ;;  %v1718_v25 = vadd.f32 -1.0, %v2042_v45  ;;  %v1480_v14 = vmin.f32 %v2742_v26, 0.0 }
 0x3c3   :  { %v1764_v27 = vpack.c.bf16 %v1533_v36, %v1533_v36  ;;  %v1501_v19 = vmul.f32 1.442695, %v1477_v56  ;;  %v1920_v1 = vpop.f32.mrb[28].mxu0  ;;  %v2046_v18 = vpop.eup %2045  ;;  %v2753_v0 = vadd.f32 %v2681_v34, %v1421_v32  ;;  %vm1464_vm15 = vcmp.gt.f32.partialorder %v2742_v26, 0.0 }
 0x3c4   :  { %2057 = vpow2.f32 %v1505_v15  ;;  %v1397_v55 = vpop.f32.mrb[29].mxu0  ;;  %v1426_v61 = vmul.f32 %v2044_v51, %v1920_v1  ;;  %v1535_v20 = vsel %vm1455_vm3, %v2686_v6, %v1718_v25  ;;  %v1507_v3 = vmul.f32 1.442695, %v1480_v14 }
 0x3c5   :  { %2059 = vpow2.f32 %v1501_v19  ;;  %v1921_v13 = vpop.f32.mrb[30].mxu0  ;;  %1597 = vrot.lane.b32.xlu0 %v1764_v27, %s2148_s7  ;;  %v1424_v23 = vmul.f32 %v2046_v18, %v1397_v55  ;;  %v1766_v29 = vpack.c.bf16 %v1535_v20, %v1535_v20  ;;  %v2780_v19 = vpop.xlane.xlu0 %598  ;;  %vm615_vm1 = vcmp.gt.f32.partialorder %v2683_v52, 0.0 }
 0x3c6   :  { %v2048_v47 = vpop.eup %2047  ;;  %2061 = vpow2.f32 %v1487_v41  ;;  %v1400_v7 = vpop.f32.mrb[31].mxu0  ;;  %v2750_v11 = vadd.f32 %v2681_v34, %v1426_v61 }
 0x3c7   :  { %v2050_v30 = vpop.eup %2049  ;;  %v1722_v50 = vadd.f32 -1.0, %v2048_v47  ;;  %2063 = vpow2.f32 %v1499_v4  ;;  %v2756_v2 = vadd.f32 %v2681_v34, %v1424_v23  ;;  %1601 = vrot.lane.b32.xlu1 %v1766_v29, %s2148_s7 }
 0x3c8   :  { %v1720_v37 = vadd.f32 -1.0, %v2050_v30  ;;  %v2052_v60 = vpop.eup %2051  ;;  %v1483_v9 = vmin.f32 %v2750_v11, 0.0  ;;  %2065 = vpow2.f32 %v1495_v33  ;;  %vm1467_vm12 = vcmp.gt.f32.partialorder %v2750_v11, 0.0 }
 0x3c9   :  { %v1539_v57 = vsel %vm1459_vm2, %v2700_v59, %v1722_v50  ;;  %v2054_v10 = vpop.eup %2053  ;;  %v1478_v59 = vmin.f32 %v2753_v0, 0.0  ;;  %v1481_v12 = vmin.f32 %v2756_v2, 0.0  ;;  %v1425_v40 = vmul.f32 %v2052_v60, %v1400_v7 }
 0x3ca   :  { %v1770_v46 = vpack.c.bf16 %v1539_v57, %v1539_v57  ;;  %v1537_v54 = vsel %vm1457_vm4, %v2703_v38, %v1720_v37  ;;  %v2056_v28 = vpop.eup %2055  ;;  %v1513_v53 = vmul.f32 1.442695, %v1483_v9  ;;  %v1719_v17 = vadd.f32 -1.0, %v2054_v10 }
 0x3cb   :  { %v1427_v21 = vmul.f32 %v2056_v28, %v1921_v13  ;;  %v1768_v58 = vpack.c.bf16 %v1537_v54, %v1537_v54  ;;  %v1509_v38 = vmul.f32 1.442695, %v1481_v12  ;;  %v2773_v36 = vadd.f32 %v2681_v34, %v1425_v40 }
 0x3cc   :  { %1609 = vrot.lane.b32.xlu0 %v1770_v46, %s2148_s7  ;;  %2067 = vpow2.f32 %v1513_v53  ;;  %v1503_v45 = vmul.f32 1.442695, %v1478_v59  ;;  %v1536_v1 = vsel %vm1456_vm5, %v2697_v22, %v1719_v17  ;;  %v2792_v22 = vpop.xlane.xlu0 %600  ;;  %vm1465_vm11 = vcmp.gt.f32.partialorder %v2756_v2, 0.0 }
 0x3cd   :  { %2069 = vpow2.f32 %v1507_v3  ;;  %v2776_v27 = vadd.f32 %v2681_v34, %v1427_v21  ;;  %v1482_v32 = vmin.f32 %v2773_v36, 0.0  ;;  %v1767_v61 = vpack.c.bf16 %v1536_v1, %v1536_v1 }
 0x3ce   :  { %v2058_v6 = vpop.eup %2057  ;;  %2071 = vpow2.f32 %v1509_v38  ;;  %v632_v53 = vsel %vm616_vm13, %v2693_v49, 1.0  ;;  %v633_v40 = vsel %vm617_vm0, %v2709_v62, 1.0  ;;  %vm1462_vm2 = vcmp.gt.f32.partialorder %v2753_v0, 0.0 }
 0x3cf   :  { %v2060_v56 = vpop.eup %2059  ;;  %v1726_v5 = vadd.f32 -1.0, %v2058_v6  ;;  %2073 = vpow2.f32 %v1503_v45  ;;  %v1484_v34 = vmin.f32 %v2776_v27, 0.0  ;;  %v1511_v18 = vmul.f32 1.442695, %v1482_v32  ;;  %1603 = vrot.lane.b32.xlu1 %v1767_v61, %s2148_s7 }
 0x3d0   :  { %v2062_v41 = vpop.eup %2061  ;;  %v1724_v15 = vadd.f32 -1.0, %v2060_v56  ;;  %1605 = vrot.lane.b32.xlu0 %v1768_v58, %s2148_s7  ;;  %v2802_v20 = vpop.xlane.xlu0 %602  ;;  %vm1466_vm3 = vcmp.gt.f32.partialorder %v2773_v36, 0.0  ;;  %vm620_vm4 = vcmp.gt.f32.partialorder %v2744_v39, 0.0  ;;  %vm618_vm5 = vcmp.gt.f32.partialorder %v2727_v35, 0.0 }
 0x3d1   :  { %v1543_v24 = vsel %vm1463_vm6, %v2724_v31, %v1726_v5  ;;  %v2064_v51 = vpop.eup %2063  ;;  %v1717_v13 = vadd.f32 -1.0, %v2062_v41  ;;  %2075 = vpow2.f32 %v1511_v18  ;;  %v1515_v7 = vmul.f32 1.442695, %v1484_v34 }
 0x3d2   :  { %v1774_v4 = vpack.c.bf16 %v1543_v24, %v1543_v24  ;;  %v1541_v55 = vsel %vm1461_vm7, %v2733_v44, %v1724_v15  ;;  %v1723_v31 = vadd.f32 -1.0, %v2064_v51  ;;  %v2066_v47 = vpop.eup %2065  ;;  %vm621_vm6 = vcmp.gt.f32.partialorder %v2764_v43, 0.0 }
 0x3d3   :  { %v1772_v23 = vpack.c.bf16 %v1541_v55, %v1541_v55  ;;  %v1534_v44 = vsel %vm1454_vm8, %v2715_v42, %v1717_v13  ;;  %v1721_v14 = vadd.f32 -1.0, %v2066_v47  ;;  %2077 = vpow2.f32 %v1515_v7 }
 0x3d4   :  { %1617 = vrot.lane.b32.xlu0 %v1774_v4, %s2148_s7  ;;  %v1765_v30 = vpack.c.bf16 %v1534_v44, %v1534_v44  ;;  %v1540_v33 = vsel %vm1460_vm9, %v2719_v63, %v1723_v31  ;;  %v2818_v21 = vpop.xlane.xlu0 %604  ;;  %2079 = vrcp.f32 %v632_v53  ;;  %v636_v17 = vsel %vm620_vm4, %v2744_v39, 1.0 }
 0x3d5   :  { %v1771_v46 = vpack.c.bf16 %v1540_v33, %v1540_v33  ;;  %v1538_v42 = vsel %vm1458_vm10, %v2730_v48, %v1721_v14  ;;  %v634_v5 = vsel %vm618_vm5, %v2727_v35, 1.0  ;;  %v637_v41 = vsel %vm621_vm6, %v2764_v43, 1.0 }
 0x3d6   :  { %v2068_v25 = vpop.eup %2067  ;;  %1599 = vrot.lane.b32.xlu1 %v1765_v30, %s2148_s7  ;;  %v1769_v59 = vpack.c.bf16 %v1538_v42, %v1538_v42  ;;  %vm1468_vm8 = vcmp.gt.f32.partialorder %v2776_v27, 0.0  ;;  %vm622_vm9 = vcmp.gt.f32.partialorder %v2780_v19, 0.0  ;;  %vm624_vm10 = vcmp.gt.f32.partialorder %v2802_v20, 0.0 }
 0x3d7   :  { %v2070_v50 = vpop.eup %2069  ;;  %v1730_v57 = vadd.f32 -1.0, %v2068_v25  ;;  %v638_v32 = vsel %vm622_vm9, %v2780_v19, 1.0  ;;  %v640_v61 = vsel %vm624_vm10, %v2802_v20, 1.0 }
 0x3d8   :  { %1613 = vrot.lane.b32.xlu0 %v1772_v23, %s2148_s7  ;;  %v2072_v37 = vpop.eup %2071  ;;  %v1727_v9 = vadd.f32 -1.0, %v2070_v50 }
 0x3d9   :  { %v1728_v60 = vadd.f32 -1.0, %v2072_v37  ;;  %v2074_v63 = vpop.eup %2073  ;;  %v1547_v3 = vsel %vm1467_vm12, %v2750_v11, %v1730_v57  ;;  %v630_v11 = vsel %vm614_vm14, %v2679_v16, 1.0  ;;  %v593_v16 = vpop.xlane.xlu1 %592  ;;  %vm625_vm12 = vcmp.gt.f32.partialorder %v2818_v21, 0.0 }
 0x3da   :  { %1611 = vrot.lane.b32.xlu1 %v1771_v46, %s2148_s7  ;;  %v1544_v48 = vsel %vm1464_vm15, %v2742_v26, %v1727_v9  ;;  %v1778_v12 = vpack.c.bf16 %v1547_v3, %v1547_v3  ;;  %v631_v26 = vsel %vm615_vm1, %v2683_v52, 1.0  ;;  %2081 = vrcp.f32 %v630_v11 }
 0x3db   :  { %v1545_v10 = vsel %vm1465_vm11, %v2756_v2, %v1728_v60  ;;  %v2076_v28 = vpop.eup %2075  ;;  %v1725_v2 = vadd.f32 -1.0, %v2074_v63  ;;  %v1775_v6 = vpack.c.bf16 %v1544_v48, %v1544_v48  ;;  %2083 = vrcp.f32 %v633_v40 }
 0x3dc   :  { %v1776_v54 = vpack.c.bf16 %v1545_v10, %v1545_v10  ;;  %v1729_v29 = vadd.f32 -1.0, %v2076_v28  ;;  %2085 = vrcp.f32 %v631_v26  ;;  %vm619_vm7 = vcmp.gt.f32.partialorder %v593_v16, 0.0 }
 0x3dd   :  { %v1542_v49 = vsel %vm1462_vm2, %v2753_v0, %v1725_v2  ;;  %v2078_v58 = vpop.eup %2077  ;;  %v2831_v0 = vpop.xlane.xlu0 %606  ;;  %2087 = vrcp.f32 %v636_v17  ;;  %vm623_vm11 = vcmp.gt.f32.partialorder %v2792_v22, 0.0  ;;  %v641_v25 = vsel %vm625_vm12, %v2818_v21, 1.0 }
 0x3de   :  { %1621 = vrot.lane.b32.xlu0 %v1776_v54, %s2148_s7  ;;  %1607 = vrot.lane.b32.xlu1 %v1769_v59, %s2148_s7  ;;  %v1546_v62 = vsel %vm1466_vm3, %v2773_v36, %v1729_v29  ;;  %v1773_v38 = vpack.c.bf16 %v1542_v49, %v1542_v49  ;;  %v1731_v52 = vadd.f32 -1.0, %v2078_v58  ;;  %v635_v36 = vsel %vm619_vm7, %v593_v16, 1.0  ;;  %v2080_v45 = vpop.eup %2079  ;;  %v613_v43 = vpop.xlane.xlu1 %612 }
 0x3df   :  { %v1777_v56 = vpack.c.bf16 %v1546_v62, %v1546_v62  ;;  %2089 = vrcp.f32 %v634_v5  ;;  %vm629_vm13 = vcmp.gt.f32.partialorder %v613_v43, 0.0  ;;  %v639_v19 = vsel %vm623_vm11, %v2792_v22, 1.0 }
 0x3e0   :  { %v1548_v15 = vsel %vm1468_vm8, %v2776_v27, %v1731_v52  ;;  %2091 = vrcp.f32 %v637_v41  ;;  %v645_v22 = vsel %vm629_vm13, %v613_v43, 1.0  ;;  %vm626_vm14 = vcmp.gt.f32.partialorder %v2831_v0, 0.0 }
 0x3e1   :  { %v2842_v39 = vpop.xlane.xlu0 %608  ;;  %2093 = vrcp.f32 %v635_v36  ;;  %v1779_v1 = vpack.c.bf16 %v1548_v15, %v1548_v15  ;;  %v642_v53 = vsel %vm626_vm14, %v2831_v0, 1.0  ;;  %vm966_vm1 = vcmask 60416  }
 0x3e2   :  { %1625 = vrot.lane.b32.xlu0 %v1778_v12, %s2148_s7  ;;  %1619 = vrot.lane.b32.xlu1 %v1775_v6, %s2148_s7  ;;  %2095 = vrcp.f32 %v638_v32  ;;  %vm627_vm0 = vcmp.gt.f32.partialorder %v2842_v39, 0.0 }
 0x3e3   :  { %2097 = vrcp.f32 %v640_v61  ;;  %v643_v26 = vsel %vm627_vm0, %v2842_v39, 1.0 }
 0x3e4   :  { %v2082_v24 = vpop.eup %2081  ;;  %2099 = vrcp.f32 %v639_v19 }
 0x3e5   :  { %v2084_v4 = vpop.eup %2083  ;;  %v611_v50 = vpop.xlane.xlu0 %610  ;;  %2101 = vrcp.f32 %v641_v25 }
 0x3e6   :  { %1615 = vrot.lane.b32.xlu1 %v1773_v38, %s2148_s7  ;;  %v2086_v18 = vpop.eup %2085  ;;  %vm628_vm15 = vcmp.gt.f32.partialorder %v611_v50, 0.0 }
 0x3e7   :  { %v2088_v60 = vpop.eup %2087  ;;  %v644_v21 = vsel %vm628_vm15, %v611_v50, 1.0 }
 0x3e9   :  { %v2090_v20 = vpop.eup %2089 }
 0x3ea   :  { %1623 = vrot.lane.b32.xlu1 %v1777_v56, %s2148_s7  ;;  %v2092_v3 = vpop.eup %2091 }
 0x3eb   :  { %v2094_v2 = vpop.eup %2093 }
 0x3ec   :  { %v2096_v38 = vpop.eup %2095 }
 0x3ed   :  { %v2098_v17 = vpop.eup %2097 }
 0x3ee   :  { %1627 = vrot.lane.b32.xlu1 %v1779_v1, %s2148_s7  ;;  %v2100_v36 = vpop.eup %2099 }
 0x3ef   :  { %v1876_v35 = vpop.f32.mrb[0].mxu1 }
 0x3f0   :  { %v769_v51 = vmul.f32 %v2080_v45, %v1876_v35  ;;  %v704_v27 = vpop.f32.mrb[1].mxu1  ;;  %v2102_v35 = vpop.eup %2101 }
 0x3f1   :  { %v767_v55 = vmul.f32 %v2082_v24, %v704_v27  ;;  %v1877_v34 = vpop.f32.mrb[2].mxu1 }
 0x3f2   :  { %v2852_v31 = vadd.f32 %v2638_v8, %v769_v51  ;;  %v770_v13 = vmul.f32 %v2084_v4, %v1877_v34  ;;  %v707_v47 = vpop.f32.mrb[3].mxu1  ;;  %v2900_v51 = vld [vmem:[%s3099_s2] ss:$0 sm:$0xff] }
 0x3f3   :  { %v2858_v23 = vadd.f32 %v2638_v8, %v767_v55  ;;  %v768_v44 = vmul.f32 %v2086_v18, %v707_v47 }
 0x3f4   :  { %v824_v7 = vmin.f32 %v2852_v31, 0.0  ;;  %v2863_v30 = vadd.f32 %v2638_v8, %v770_v13  ;;  %vm808_vm2 = vcmp.gt.f32.partialorder %v2852_v31, 0.0 }
 0x3f5   :  { %v822_v33 = vmin.f32 %v2858_v23, 0.0  ;;  %v2867_v14 = vadd.f32 %v2638_v8, %v768_v44  ;;  %vm806_vm3 = vcmp.gt.f32.partialorder %v2858_v23, 0.0 }
 0x3f6   :  { %v842_v37 = vmul.f32 1.442695, %v824_v7  ;;  %v825_v57 = vmin.f32 %v2863_v30, 0.0  ;;  %vm809_vm4 = vcmp.gt.f32.partialorder %v2863_v30, 0.0 }
 0x3f7   :  { %v838_v46 = vmul.f32 1.442695, %v822_v33  ;;  %v823_v42 = vmin.f32 %v2867_v14, 0.0  ;;  %v1880_v9 = vpop.f32.mrb[4].mxu1  ;;  %vm807_vm5 = vcmp.gt.f32.partialorder %v2867_v14, 0.0 }
 0x3f8   :  { %2103 = vpow2.f32 %v842_v37  ;;  %v844_v10 = vmul.f32 1.442695, %v825_v57  ;;  %v773_v63 = vmul.f32 %v2088_v60, %v1880_v9  ;;  %v720_v54 = vpop.f32.mrb[5].mxu1 }
 0x3f9   :  { %2105 = vpow2.f32 %v838_v46  ;;  %v840_v28 = vmul.f32 1.442695, %v823_v42  ;;  %v771_v59 = vmul.f32 %v2090_v20, %v720_v54  ;;  %v1881_v48 = vpop.f32.mrb[6].mxu1 }
 0x3fa   :  { %2107 = vpow2.f32 %v844_v10  ;;  %v2877_v12 = vadd.f32 %v2638_v8, %v773_v63  ;;  %v774_v11 = vmul.f32 %v2092_v3, %v1881_v48  ;;  %v723_v29 = vpop.f32.mrb[7].mxu1 }
 0x3fb   :  { %2109 = vpow2.f32 %v840_v28  ;;  %v2881_v40 = vadd.f32 %v2638_v8, %v771_v59  ;;  %v772_v6 = vmul.f32 %v2094_v2, %v723_v29 }
 0x3fc   :  { %2111 = vrcp.f32 %v645_v22  ;;  %v828_v49 = vmin.f32 %v2877_v12, 0.0  ;;  %v2888_v58 = vadd.f32 %v2638_v8, %v774_v11  ;;  %vm812_vm6 = vcmp.gt.f32.partialorder %v2877_v12, 0.0 }
 0x3fd   :  { %2113 = vrcp.f32 %v642_v53  ;;  %v826_v16 = vmin.f32 %v2881_v40, 0.0  ;;  %v2892_v62 = vadd.f32 %v2638_v8, %v772_v6  ;;  %vm810_vm7 = vcmp.gt.f32.partialorder %v2881_v40, 0.0 }
 0x3fe   :  { %2115 = vrcp.f32 %v644_v21  ;;  %v850_v52 = vmul.f32 1.442695, %v828_v49  ;;  %v829_v0 = vmin.f32 %v2888_v58, 0.0  ;;  %vm813_vm8 = vcmp.gt.f32.partialorder %v2888_v58, 0.0 }
 0x3ff   :  { %2117 = vrcp.f32 %v643_v26  ;;  %v846_v56 = vmul.f32 1.442695, %v826_v16  ;;  %v827_v5 = vmin.f32 %v2892_v62, 0.0  ;;  %v1884_v41 = vpop.f32.mrb[8].mxu1  ;;  %vm811_vm9 = vcmp.gt.f32.partialorder %v2892_v62, 0.0 }
 0x400   :  { %2119 = vpow2.f32 %v850_v52  ;;  %v852_v15 = vmul.f32 1.442695, %v829_v0  ;;  %v777_v45 = vmul.f32 %v2098_v17, %v1884_v41  ;;  %v736_v39 = vpop.f32.mrb[9].mxu1 }
 0x401   :  { %2121 = vpow2.f32 %v846_v56  ;;  %v848_v8 = vmul.f32 1.442695, %v827_v5  ;;  %v775_v24 = vmul.f32 %v2096_v38, %v736_v39  ;;  %v1885_v43 = vpop.f32.mrb[10].mxu1 }
 0x402   :  { %v2104_v1 = vpop.eup %2103  ;;  %2123 = vpow2.f32 %v852_v15  ;;  %v2903_v27 = vadd.f32 %v2900_v51, %v777_v45  ;;  %v778_v4 = vmul.f32 %v2102_v35, %v1885_v43  ;;  %v739_v32 = vpop.f32.mrb[11].mxu1 }
 0x403   :  { %v2106_v55 = vpop.eup %2105  ;;  %v1685_v34 = vadd.f32 -1.0, %v2104_v1  ;;  %2125 = vpow2.f32 %v848_v8  ;;  %v2907_v18 = vadd.f32 %v2900_v51, %v775_v24  ;;  %v776_v33 = vmul.f32 %v2100_v36, %v739_v32 }
 0x404   :  { %v2108_v61 = vpop.eup %2107  ;;  %v1683_v13 = vadd.f32 -1.0, %v2106_v55  ;;  %v832_v47 = vmin.f32 %v2903_v27, 0.0  ;;  %v2912_v19 = vadd.f32 %v2900_v51, %v778_v4  ;;  %vm816_vm10 = vcmp.gt.f32.partialorder %v2903_v27, 0.0 }
 0x405   :  { %v2110_v44 = vpop.eup %2109  ;;  %v888_v25 = vsel %vm808_vm2, %v2852_v31, %v1685_v34  ;;  %v1686_v7 = vadd.f32 -1.0, %v2108_v61  ;;  %v830_v50 = vmin.f32 %v2907_v18, 0.0  ;;  %vm814_vm11 = vcmp.gt.f32.partialorder %v2907_v18, 0.0 }
 0x406   :  { %v2112_v22 = vpop.eup %2111  ;;  %v1750_v37 = vpack.c.bf16 %v888_v25, %v888_v25  ;;  %v886_v57 = vsel %vm806_vm3, %v2858_v23, %v1683_v13  ;;  %v1684_v60 = vadd.f32 -1.0, %v2110_v44  ;;  %v858_v46 = vmul.f32 1.442695, %v832_v47 }
 0x407   :  { %v2114_v42 = vpop.eup %2113  ;;  %v1748_v9 = vpack.c.bf16 %v886_v57, %v886_v57  ;;  %v889_v20 = vsel %vm809_vm4, %v2863_v30, %v1686_v7  ;;  %v854_v31 = vmul.f32 1.442695, %v830_v50  ;;  %v1888_v10 = vpop.f32.mrb[12].mxu1  ;;  %v833_v28 = vmin.f32 %v2912_v19, 0.0 }
 0x408   :  { %v2116_v63 = vpop.eup %2115  ;;  %v1751_v54 = vpack.c.bf16 %v889_v20, %v889_v20  ;;  %v887_v3 = vsel %vm807_vm5, %v2867_v14, %v1684_v60  ;;  %2127 = vpow2.f32 %v858_v46  ;;  %v752_v23 = vpop.f32.mrb[13].mxu1  ;;  %969 = vst.msk [vmem:[%s3100_s4 + $0x8] sm:$0xf] %vm966_vm1, %v1750_v37  ;;  %v2932_v30 = vadd.f32 %v2900_v51, %v776_v33 }
 0x409   :  { %v2118_v59 = vpop.eup %2117  ;;  %v1749_v48 = vpack.c.bf16 %v887_v3, %v887_v3  ;;  %2129 = vpow2.f32 %v854_v31  ;;  %v781_v2 = vmul.f32 %v2116_v63, %v1888_v10  ;;  %v1889_v53 = vpop.f32.mrb[14].mxu1  ;;  %967 = vst.msk [vmem:[%s3100_s4] sm:$0xf] %vm966_vm1, %v1748_v9  ;;  %v860_v11 = vmul.f32 1.442695, %v833_v28 }
 0x40a   :  { %v2120_v14 = vpop.eup %2119  ;;  %v779_v29 = vmul.f32 %v2114_v42, %v752_v23  ;;  %v782_v21 = vmul.f32 %v2112_v22, %v1889_v53  ;;  %v755_v6 = vpop.f32.mrb[15].mxu1  ;;  %970 = vst.msk [vmem:[%s3100_s4 + $0xc] sm:$0xf] %vm966_vm1, %v1751_v54  ;;  %v831_v16 = vmin.f32 %v2932_v30, 0.0  ;;  %vm817_vm12 = vcmp.gt.f32.partialorder %v2912_v19, 0.0 }
 0x40b   :  { %v2122_v26 = vpop.eup %2121  ;;  %v1689_v49 = vadd.f32 -1.0, %v2120_v14  ;;  %v2946_v38 = vadd.f32 %v2900_v51, %v781_v2  ;;  %968 = vst.msk [vmem:[%s3100_s4 + $0x4] sm:$0xf] %vm966_vm1, %v1749_v48  ;;  %2131 = vpow2.f32 %v860_v11  ;;  %v780_v34 = vmul.f32 %v2118_v59, %v755_v6 }
 0x40c   :  { %v2124_v52 = vpop.eup %2123  ;;  %v1687_v0 = vadd.f32 -1.0, %v2122_v26  ;;  %v2954_v17 = vadd.f32 %v2900_v51, %v779_v29  ;;  %v856_v36 = vmul.f32 1.442695, %v831_v16  ;;  %v2960_v15 = vadd.f32 %v2900_v51, %v782_v21 }
 0x40d   :  { %v2126_v56 = vpop.eup %2125  ;;  %v892_v5 = vsel %vm812_vm6, %v2877_v12, %v1689_v49  ;;  %v1690_v41 = vadd.f32 -1.0, %v2124_v52  ;;  %v836_v8 = vmin.f32 %v2946_v38, 0.0  ;;  %v803_v44 = vadd.f32 %v2900_v51, %v780_v34 }
 0x40e   :  { %v1754_v45 = vpack.c.bf16 %v892_v5, %v892_v5  ;;  %v890_v39 = vsel %vm810_vm7, %v2881_v40, %v1687_v0  ;;  %v1688_v35 = vadd.f32 -1.0, %v2126_v56  ;;  %2133 = vpow2.f32 %v856_v36 }
 0x40f   :  { %v1752_v24 = vpack.c.bf16 %v890_v39, %v890_v39  ;;  %v893_v43 = vsel %vm813_vm8, %v2888_v58, %v1690_v41  ;;  %v866_v4 = vmul.f32 1.442695, %v836_v8  ;;  %v834_v32 = vmin.f32 %v2954_v17, 0.0 }
 0x410   :  { %v1755_v1 = vpack.c.bf16 %v893_v43, %v893_v43  ;;  %v891_v12 = vsel %vm811_vm9, %v2892_v62, %v1688_v35  ;;  %973 = vst.msk [vmem:[%s3100_s4 + $0x18] sm:$0xf] %vm966_vm1, %v1754_v45  ;;  %v837_v55 = vmin.f32 %v2960_v15, 0.0  ;;  %v835_v50 = vmin.f32 %v803_v44, 0.0 }
 0x411   :  { %v1753_v40 = vpack.c.bf16 %v891_v12, %v891_v12  ;;  %971 = vst.msk [vmem:[%s3100_s4 + $0x10] sm:$0xf] %vm966_vm1, %v1752_v24  ;;  %2135 = vpow2.f32 %v866_v4  ;;  %v862_v62 = vmul.f32 1.442695, %v834_v32  ;;  %vm815_vm13 = vcmp.gt.f32.partialorder %v2932_v30, 0.0 }
 0x412   :  { %v2128_v58 = vpop.eup %2127  ;;  %974 = vst.msk [vmem:[%s3100_s4 + $0x1c] sm:$0xf] %vm966_vm1, %v1755_v1  ;;  %v868_v47 = vmul.f32 1.442695, %v837_v55  ;;  %v864_v60 = vmul.f32 1.442695, %v835_v50 }
 0x413   :  { %v2130_v61 = vpop.eup %2129  ;;  %v1693_v13 = vadd.f32 -1.0, %v2128_v58  ;;  %972 = vst.msk [vmem:[%s3100_s4 + $0x14] sm:$0xf] %vm966_vm1, %v1753_v40  ;;  %2137 = vpow2.f32 %v862_v62  ;;  %vm820_vm14 = vcmp.gt.f32.partialorder %v2946_v38, 0.0  ;;  %vm818_vm15 = vcmp.gt.f32.partialorder %v2954_v17, 0.0 }
 0x414   :  { %v1691_v25 = vadd.f32 -1.0, %v2130_v61  ;;  %2139 = vpow2.f32 %v868_v47  ;;  %vm821_vm0 = vcmp.gt.f32.partialorder %v2960_v15, 0.0  ;;  %vm819_vm2 = vcmp.gt.f32.partialorder %v803_v44, 0.0 }
 0x415   :  { %v896_v7 = vsel %vm816_vm10, %v2903_v27, %v1693_v13  ;;  %v2132_v33 = vpop.eup %2131  ;;  %2141 = vpow2.f32 %v864_v60  ;;  %vm1645_vm3 = vcmask 126016  }
 0x416   :  { %v1758_v22 = vpack.c.bf16 %v896_v7, %v896_v7  ;;  %v894_v37 = vsel %vm814_vm11, %v2907_v18, %v1691_v25  ;;  %v1694_v57 = vadd.f32 -1.0, %v2132_v33 }
 0x417   :  { %v1756_v51 = vpack.c.bf16 %v894_v37, %v894_v37 }
 0x418   :  { %977 = vst.msk [vmem:[%s3100_s4 + $0x28] sm:$0xf] %vm966_vm1, %v1758_v22  ;;  %v2134_v46 = vpop.eup %2133  ;;  %v897_v27 = vsel %vm817_vm12, %v2912_v19, %v1694_v57 }
 0x419   :  { %975 = vst.msk [vmem:[%s3100_s4 + $0x20] sm:$0xf] %vm966_vm1, %v1756_v51  ;;  %v1759_v18 = vpack.c.bf16 %v897_v27, %v897_v27  ;;  %v1692_v42 = vadd.f32 -1.0, %v2134_v46 }
 0x41b   :  { %v2136_v9 = vpop.eup %2135  ;;  %v895_v20 = vsel %vm815_vm13, %v2932_v30, %v1692_v42  ;;  %978 = vst.msk [vmem:[%s3100_s4 + $0x2c] sm:$0xf] %vm966_vm1, %v1759_v18 }
 0x41c   :  { %v1757_v31 = vpack.c.bf16 %v895_v20, %v895_v20  ;;  %v1697_v19 = vadd.f32 -1.0, %v2136_v9 }
 0x41d   :  { %v2138_v10 = vpop.eup %2137 }
 0x41e   :  { %v2140_v63 = vpop.eup %2139  ;;  %v900_v54 = vsel %vm820_vm14, %v2946_v38, %v1697_v19  ;;  %v1695_v3 = vadd.f32 -1.0, %v2138_v10  ;;  %976 = vst.msk [vmem:[%s3100_s4 + $0x24] sm:$0xf] %vm966_vm1, %v1757_v31 }
 0x41f   :  { %v1762_v28 = vpack.c.bf16 %v900_v54, %v900_v54  ;;  %v1698_v23 = vadd.f32 -1.0, %v2140_v63  ;;  %v2142_v2 = vpop.eup %2141 }
 0x420   :  { %v898_v59 = vsel %vm818_vm15, %v2954_v17, %v1695_v3  ;;  %v1696_v14 = vadd.f32 -1.0, %v2142_v2 }
 0x421   :  { %v1760_v48 = vpack.c.bf16 %v898_v59, %v898_v59  ;;  %v901_v30 = vsel %vm821_vm0, %v2960_v15, %v1698_v23  ;;  %981 = vst.msk [vmem:[%s3100_s4 + $0x38] sm:$0xf] %vm966_vm1, %v1762_v28 }
 0x422   :  { %v1763_v53 = vpack.c.bf16 %v901_v30, %v901_v30  ;;  %v899_v11 = vsel %vm819_vm2, %v803_v44, %v1696_v14 }
 0x423   :  { %979 = vst.msk [vmem:[%s3100_s4 + $0x30] sm:$0xf] %vm966_vm1, %v1760_v48  ;;  %v1761_v29 = vpack.c.bf16 %v899_v11, %v899_v11 }
 0x424   :  { %982 = vst.msk [vmem:[%s3100_s4 + $0x3c] sm:$0xf] %vm966_vm1, %v1763_v53 }
 0x425   :  { %980 = vst.msk [vmem:[%s3100_s4 + $0x34] sm:$0xf] %vm966_vm1, %v1761_v29 }
 0x437   :  { %v1598_v21 = vpop.permute.xlu0 %1597 }
 0x438   :  { %1646 = vst.msk [vmem:[%s3100_s4] sm:$0xf] %vm1645_vm3, %v1598_v21 }
 0x439   :  { %v1602_v26 = vpop.permute.xlu1 %1601 }
 0x43a   :  { %1648 = vst.msk [vmem:[%s3100_s4 + $0x8] sm:$0xf] %vm1645_vm3, %v1602_v26 }
 0x43e   :  { %v1610_v6 = vpop.permute.xlu0 %1609 }
 0x43f   :  { %1652 = vst.msk [vmem:[%s3100_s4 + $0x18] sm:$0xf] %vm1645_vm3, %v1610_v6 }
 0x441   :  { %v1604_v38 = vpop.permute.xlu1 %1603 }
 0x442   :  { %v1606_v49 = vpop.permute.xlu0 %1605  ;;  %1649 = vst.msk [vmem:[%s3100_s4 + $0xc] sm:$0xf] %vm1645_vm3, %v1604_v38 }
 0x443   :  { %1650 = vst.msk [vmem:[%s3100_s4 + $0x10] sm:$0xf] %vm1645_vm3, %v1606_v49 }
 0x446   :  { %v1618_v16 = vpop.permute.xlu0 %1617 }
 0x447   :  { %1656 = vst.msk [vmem:[%s3100_s4 + $0x28] sm:$0xf] %vm1645_vm3, %v1618_v16 }
 0x448   :  { %v1600_v0 = vpop.permute.xlu1 %1599 }
 0x449   :  { %1647 = vst.msk [vmem:[%s3100_s4 + $0x4] sm:$0xf] %vm1645_vm3, %v1600_v0 }
 0x44a   :  { %v1614_v52 = vpop.permute.xlu0 %1613 }
 0x44b   :  { %1654 = vst.msk [vmem:[%s3100_s4 + $0x20] sm:$0xf] %vm1645_vm3, %v1614_v52 }
 0x44c   :  { %v1612_v17 = vpop.permute.xlu1 %1611 }
 0x44d   :  { %1653 = vst.msk [vmem:[%s3100_s4 + $0x1c] sm:$0xf] %vm1645_vm3, %v1612_v17 }
 0x450   :  { %v1622_v56 = vpop.permute.xlu0 %1621  ;;  %v1608_v5 = vpop.permute.xlu1 %1607 }
 0x451   :  { %1658 = vst.msk [vmem:[%s3100_s4 + $0x30] sm:$0xf] %vm1645_vm3, %v1622_v56  ;;  %1651 = vst.msk [vmem:[%s3100_s4 + $0x14] sm:$0xf] %vm1645_vm3, %v1608_v5 }
 0x454   :  { %v1626_v41 = vpop.permute.xlu0 %1625  ;;  %v1620_v36 = vpop.permute.xlu1 %1619 }
 0x455   :  { %1660 = vst.msk [vmem:[%s3100_s4 + $0x38] sm:$0xf] %vm1645_vm3, %v1626_v41  ;;  %1657 = vst.msk [vmem:[%s3100_s4 + $0x2c] sm:$0xf] %vm1645_vm3, %v1620_v36 }
 0x458   :  { %v1616_v15 = vpop.permute.xlu1 %1615 }
 0x459   :  { %1655 = vst.msk [vmem:[%s3100_s4 + $0x24] sm:$0xf] %vm1645_vm3, %v1616_v15 }
 0x45c   :  { %v1624_v45 = vpop.permute.xlu1 %1623 }
 0x45d   :  { %1659 = vst.msk [vmem:[%s3100_s4 + $0x34] sm:$0xf] %vm1645_vm3, %v1624_v45 }
 0x460   :  { %v1628_v39 = vpop.permute.xlu1 %1627 }
 0x461   :  { %1661 = vst.msk [vmem:[%s3100_s4 + $0x3c] sm:$0xf] %vm1645_vm3, %v1628_v39 }

</bundles_post_ra>
